<compile_context>
chip_gen: v7x
topology: tpu7x:2x2x1
jax: 0.10.0
libtpu: 0.0.40
codegen_flags: <defaults>
</compile_context>

<pallas_src>
import functools

import jax
import jax.numpy as jnp
from jax import lax
from jax.experimental import pallas as pl
from jax.experimental.pallas import tpu as pltpu


def _round_up(x: int, m: int) -> int:
    return ((x + m - 1) // m) * m


def _linear_kernel(x_ref, w_ref, b_ref, o_ref):
    """One output-column block: o = x @ w_block.T + b_block.

    x_ref: (B, D)   resident activations
    w_ref: (tn, D)  weight block in native nn.Linear (N, D) layout
    b_ref: (1, tn)  bias block
    o_ref: (B, tn)  output block
    """
    # Trans-B contraction: contract the shared D axis of (B, D) x (tn, D).
    # This is the pl.dot(..., trans_b=True) path on the MXU; the 4.5 MiB weight
    # tile is consumed in place (no XLU transpose in the hot loop).
    o_ref[...] = (
        lax.dot_general(
            x_ref[...],
            w_ref[...],
            dimension_numbers=(((1,), (1,)), ((), ())),
            preferred_element_type=jnp.float32,
        )
        + b_ref[...]
    )


def prepare_linear_params(weight, bias, *, tn=128):
    """One-time parameter prep (call ONCE at init, not per forward).

    Zero-pads the ragged n_label dimension up to a multiple of the output tile
    so the jitted forward never re-pads / re-streams the weight on every call.
    The weight keeps its PyTorch (N, D) layout so every (tn, D) block DMA is a
    contiguous row range.
    """
    n_label, d = weight.shape
    assert d % 128 == 0, "feature dim must be lane-aligned (all AlexNet layers are)"
    tn = min(_round_up(tn, 128), _round_up(n_label, 128))
    n_pad = _round_up(n_label, tn)
    if n_pad != n_label:
        weight = jnp.pad(weight, ((0, n_pad - n_label), (0, 0)))
        bias = jnp.pad(bias, (0, n_pad - n_label))
    # TODO(synk): optional `weight = weight.astype(jnp.bfloat16)` here for ~2x
    # on the weight stream (would also cast the x chunk in-kernel).
    return weight, bias.reshape(1, n_pad), tn


@functools.partial(jax.jit, static_argnames=("n_label", "tn"))
def linear_classifier_alexnet_fwd(x_nchw, w_prepared, b_prepared, *, n_label, tn):
    """Forward pass of LinearClassifierAlexNet(layer=5) with pre-prepared params.

    x_nchw:     (B, C, H, W) f32
    w_prepared: (N_pad, D)   f32 -- from prepare_linear_params
    b_prepared: (1, N_pad)   f32 -- from prepare_linear_params
    returns     (B, n_label) f32
    """
    B = x_nchw.shape[0]
    N_pad, D = w_prepared.shape
    x2d = x_nchw.reshape(B, D)  # Flatten == torch .view (C-major)

    grid = (N_pad // tn,)  # single grid axis: output-column blocks; K = full D

    out = pl.pallas_call(
        _linear_kernel,
        out_shape=jax.ShapeDtypeStruct((B, N_pad), jnp.float32),
        grid_spec=pltpu.PrefetchScalarGridSpec(
            num_scalar_prefetch=0,
            grid=grid,
            in_specs=[
                # Activations fully resident: one (B, D) DMA, reused every step.
                pl.BlockSpec((B, D), lambda j: (0, 0)),
                # Weights streamed as contiguous (tn, D) row blocks.
                pl.BlockSpec((tn, D), lambda j: (j, 0)),
                # Bias tile for the current output column block.
                pl.BlockSpec((1, tn), lambda j: (0, j)),
            ],
            out_specs=pl.BlockSpec((B, tn), lambda j: (0, j)),
        ),
        compiler_params=pltpu.CompilerParams(
            # N axis is independent across blocks.  On v7x this lets the two
            # TensorCores split the weight stream; on v5e/v6e (1 TC) it is a
            # no-op.  (For guaranteed cross-core split on v7x one could use
            # core-level semantics / core_map instead.)
            dimension_semantics=("parallel",),
        ),
    )(x2d, w_prepared, b_prepared)

    return out[:, :n_label] if N_pad != n_label else out


if __name__ == "__main__":
    # layer=5 config: nChannels=256, pool_size=6 -> D = 256*6*6 = 9216.
    # n_label deliberately NOT a multiple of 128 to exercise the ragged-N path.
    B, C, H, W = 2, 256, 6, 6
    N_LABEL = 200

    key = jax.random.PRNGKey(0)
    kx, kw = jax.random.split(key)

    x = jax.random.normal(kx, (B, C, H, W), dtype=jnp.float32)

    # Deterministic parameter init matching module.initilize():
    #   weight ~ N(0, 0.01), bias = 0
    weight = 0.01 * jax.random.normal(kw, (N_LABEL, C * H * W), dtype=jnp.float32)
    bias = jnp.zeros((N_LABEL,), dtype=jnp.float32)

    # One-time prep outside the per-call forward path (hoisted pad).
    w_prep, b_prep, tn = prepare_linear_params(weight, bias, tn=128)
    w_prep, b_prep = jax.block_until_ready((w_prep, b_prep))

    out = linear_classifier_alexnet_fwd(x, w_prep, b_prep, n_label=N_LABEL, tn=tn)
    out = jax.block_until_ready(out)

    # Reference check (plain JAX) against the module's math.
    ref = x.reshape(B, -1) @ weight.T + bias
    assert out.shape == (B, N_LABEL)
    assert jnp.allclose(out, ref, atol=1e-4, rtol=1e-4)

    print("KERNEL_OK")
</pallas_src>

<mosaic_0001>
module attributes {stable_mosaic.version = 11 : i64} {
  func.func @_linear_kernel(%arg0: i32, %arg1: memref<2x9216xf32, #tpu.memory_space<vmem>>, %arg2: memref<128x9216xf32, #tpu.memory_space<vmem>>, %arg3: memref<1x128xf32, #tpu.memory_space<vmem>>, %arg4: memref<2x128xf32, #tpu.memory_space<vmem>>) attributes {dimension_semantics = [#tpu.dimension_semantics<parallel>], iteration_bounds = array<i64: 2>, scalar_prefetch = 0 : i64, scratch_operands = 0 : i64, tpu.core_type = #tpu.core_type<tc>, window_params = [{pipeline_mode = #tpu.pipeline_mode<synchronous>, transform_indices = @transform_0, window_bounds = array<i64: 2, 9216>}, {transform_indices = @transform_1, window_bounds = array<i64: 128, 9216>}, {transform_indices = @transform_2, window_bounds = array<i64: 1, 128>}, {transform_indices = @transform_3, window_bounds = array<i64: 2, 128>}]} {
    %c0 = arith.constant 0 : index
    %c0_0 = arith.constant 0 : index
    %0 = vector.load %arg1[%c0, %c0_0] : memref<2x9216xf32, #tpu.memory_space<vmem>>, vector<2x9216xf32>
    %c0_1 = arith.constant 0 : index
    %c0_2 = arith.constant 0 : index
    %1 = vector.load %arg2[%c0_1, %c0_2] : memref<128x9216xf32, #tpu.memory_space<vmem>>, vector<128x9216xf32>
    %cst = arith.constant dense<0.000000e+00> : vector<2x128xf32>
    %2 = tpu.matmul %0, %1, %cst {dimension_numbers = #tpu.dot_dimension_numbers<[1], [1], [0], [0], [0, 0, 1, 0], [], []>} : vector<2x9216xf32>, vector<128x9216xf32>, vector<2x128xf32> -> vector<2x128xf32>
    %c0_3 = arith.constant 0 : index
    %c0_4 = arith.constant 0 : index
    %3 = vector.load %arg3[%c0_3, %c0_4] : memref<1x128xf32, #tpu.memory_space<vmem>>, vector<1x128xf32>
    %4 = vector.broadcast %3 : vector<1x128xf32> to vector<2x128xf32>
    %5 = arith.addf %2, %4 : vector<2x128xf32>
    %c0_5 = arith.constant 0 : index
    %c0_6 = arith.constant 0 : index
    %6 = vector.load %arg4[%c0_5, %c0_6] : memref<2x128xf32, #tpu.memory_space<vmem>>, vector<2x128xf32>
    tpu.vector_store %arg4[%c0_5, %c0_6], %5 {strides = array<i32>} : memref<2x128xf32, #tpu.memory_space<vmem>>, vector<2x128xf32>,
    return
  }
  func.func @transform_0(%arg0: i32) -> (i32, i32) {
    %c0_i32 = arith.constant 0 : i32
    %c0_i32_0 = arith.constant 0 : i32
    %c0_i32_1 = arith.constant 0 : i32
    return %c0_i32, %c0_i32_0 : i32, i32
  }
  func.func @transform_1(%arg0: i32) -> (i32, i32) {
    %c0_i32 = arith.constant 0 : i32
    %c0_i32_0 = arith.constant 0 : i32
    return %arg0, %c0_i32 : i32, i32
  }
  func.func @transform_2(%arg0: i32) -> (i32, i32) {
    %c0_i32 = arith.constant 0 : i32
    %c0_i32_0 = arith.constant 0 : i32
    return %c0_i32, %arg0 : i32, i32
  }
  func.func @transform_3(%arg0: i32) -> (i32, i32) {
    %c0_i32 = arith.constant 0 : i32
    %c0_i32_0 = arith.constant 0 : i32
    return %c0_i32, %arg0 : i32, i32
  }
}

</mosaic_0001>

<bundles_post_ra>
// kernel: linear_classifier_alexnet_fwd.1
= control target key start
LH: loop header
LB: loop body
LE: loop exit
PB: predicated region body
PF: predicated region fallthrough
CT: control target
= control target key end

     0   :  { %8 = vsyncpa [#allocation3], 0  ;;  %s7607_s0 = inlined_call_operand.vmem [shape: f32[2,9216], index: 0, kind: input, shape index: {}]   ;;  %s7608_s1 = inlined_call_operand.hbm [shape: f32[256,9216], index: 1, kind: input, shape index: {}]   ;;  %s7609_s2 = inlined_call_operand.hbm [shape: f32[1,256], index: 2, kind: input, shape index: {}]   ;;  %s7610_s3 = inlined_call_operand.hbm [shape: f32[2,256], index: 3, kind: output, shape index: {}]  }
   0x1   :  { %10 = vsyncpa [#allocation3 + $0x1], 0 }
   0x2   :  { %11 = vsyncpa [#allocation6], 0 }
   0x3   :  { %13 = vsyncpa [#allocation6 + $0x1], 0 }
   0x4   :  { %14 = vsyncpa [#allocation4], 0 }
   0x5   :  { %16 = vsyncpa [#allocation4 + $0x1], 0  ;;  %s5892_s12 = smov 0   ;;  %s5894_s13 = smov 0  }
   0x6   :  { %s5896_s14 = smov 0   ;;  %s5898_s15 = smov 0  }
   0x7 LB: > { %s5913_s16 = sadd.s32 4294967295, %s5864_s15   ;;  %s4423_s17 = sadd.s32 4294967294, %s5864_s15   ;;  %s5864_s15 = sphi %s5898_s15, %s7626_s15   ;;  %s5860_s14 = sphi %s5896_s14, %s7625_s14   ;;  %s5856_s13 = sphi %s5894_s13, %s7624_s13   ;;  %s5852_s12 = sphi %s5892_s12, %s7623_s12  }
   0x8   : > { %s5917_s18 = sadd.s32 1, %s5864_s15   ;;  %s50_s19 = sadd.s32 1, %s5860_s14 }
   0x9   : > { %s47_s20 = ssub.s32 %s5864_s15, %s5917_s18  ;;  %p57_p0 = scmp.ne.s32.totalorder %s5860_s14, %s5856_s13 }
   0xa   : > { %p48_p1 = scmp.eq.s32.totalorder %s47_s20, 0  ;;  %p58_p2 = scmp.eq.s32.totalorder %s5864_s15, 0 }
   0xb   : > { %p63_p3 = scmp.ne.s32.totalorder %s5856_s13, %s5852_s12  ;;  %p64_p4 = scmp.eq.s32.totalorder %s5913_s16, 0 }
   0xc   : > { %s5929_s21 = scalar_select %p48_p1, %s5860_s14, %s50_s19  }
   0xd   : > { %p59_p5 = por %p58_p2, %p57_p0  ;;  %p5931_p6 = por %p64_p4, %p63_p3 }
   0xe   : > { %p113_p7 = scmp.eq.s32.totalorder %s5913_s16, 1  ;;  %p119_p8 = scmp.eq.s32.totalorder %s4423_s17, 1 }
   0xf   : > { %s7613_s22 = scalar_select %p5931_p6, 1, 0 }
  0x10   : > { %p5679_p10 = scmp.lt.s32.totalorder %s5864_s15, 2  ;;  %p5938_p11 = por %p113_p7, %p57_p0 }
  0x11   : > { %p5942_p12 = por %p119_p8, %p63_p3  ;;  %s5947_s25 = sand.u32 1, %s5860_s14  }
  0x12   : > { %s7614_s23 = scalar_select %p5938_p11, 1, 0 }
  0x13   : > { %s7615_s24 = scalar_select %p5942_p12, 1, 0 }
  0x14   : > { %s5660_s26 = smul.u32 147456, %s5864_s15  ;;  %p5956_p13 = pnand %p5679_p10, %p59_p5 }
  0x15   : > { %s5659_s27 = smul.u32 9216, %s5947_s25  ;;  %s143_s7 = scalar_lea.sflag [#allocation3], %s5947_s25 }
  0x16   : > { %s5954_s30 = scalar_lea.hbm %s7608_s1, %s5660_s26  ;;  %p5736_p1 = pneg %p5956_p13 }
  0x17   : > { %s146_s5 = scalar_lea.vmem [#allocation2], %s5659_s27  ;;  %s5734_s8 = scalar_lea.hbm %s5954_s30, 147456 }
  0x18   : > { %s154_s6 = sshll.u32 %s146_s5, 4  ;;  %p5735_p0 = scmp.ne.s32.totalorder %s5954_s30, %s5734_s8  ;;  %s5960_s6 = int_to_ptr.vmem [resolvable:$true] %s154_s6 }
  0x19   : > { %s5739_s11 = scalar_lea.hbm %s7608_s1, 294912  ;;  %p5740_p4 = scmp.lt.u32.totalorder %s5954_s30, %s7608_s1 }
  0x1a   : > { %p5737_p2 = pnand %p5736_p1, %p5735_p0  ;;  %p5741_p5 = scmp.lt.u32.totalorder %s5739_s11, %s5734_s8 }
  0x1b   : > { %p5743_p8 = scmp.lt.u32.totalorder %s5734_s8, %s5954_s30 }
  0x1c   : > { %p5738_p3 = pneg %p5737_p2  ;;  %p5742_p7 = por %p5741_p5, %p5740_p4 }
  0x1e   : > { %p5744_p10 = por %p5743_p8, %p5742_p7 }
  0x20   : > { %p5745_p9 = pnand %p5744_p10, %p5738_p3 }
  0x22   : > { %5748 = shalt.err (!%p5745_p9)
}
  0x23   : > { %s5749_s20 = scalar_lea.vmem %s5960_s6, 147456  ;;  %s5866_s26 = smov [#allocation2]  }
  0x24   : > { %p5750_p0 = scmp.ne.s32.totalorder %s5960_s6, %s5749_s20  ;;  %s5754_s27 = sshll.u32 %s5866_s26, 4  ;;  %s5755_s27 = int_to_ptr.vmem [resolvable:$false] %s5754_s27 }
  0x25   : > { %s5756_s28 = scalar_lea.vmem %s5755_s27, 294912  ;;  %p5757_p11 = scmp.lt.s32.totalorder %s5960_s6, %s5755_s27 }
  0x26   : > { %p5752_p2 = pnand %p5750_p0, %p5736_p1  ;;  %p5758_p4 = scmp.lt.s32.totalorder %s5756_s28, %s5749_s20 }
  0x28   : > { %p5753_p12 = pneg %p5752_p2  ;;  %p5759_p5 = por %p5758_p4, %p5757_p11 }
  0x2a   : > { %p5760_p7 = pnand %p5759_p5, %p5753_p12 }
  0x2c   : > { %5763 = shalt.err (!%p5760_p7)
}
  0x2d   : > { %s5867_s29 = smov 9216   ;;  %s5868_s5 = smov 576  }
  0x2e   : > { %5671 = dma.hbm_to_vmem [thread:$0]  (!%p5956_p13), %s5954_s30, 147456, %s5960_s6, %s143_s7, %s5867_s29, %s5867_s29, %s5868_s5  }
  0x2f   : > { %p4430_p9 = scmp.ge.s32.totalorder %s5864_s15, 1  ;;  %p179_p3 = scmp.lt.s32.totalorder %s5864_s15, 3 }
  0x30   : > { %s4429_s9 = sshll.u32 %s5864_s15, 4  ;;  %s167_s19 = scalar_lea.vmem [#allocation5], %s5947_s25 }
  0x31   : > { %p5992_p11 = pnand %p4430_p9, %p179_p3  ;;  %s6000_s17 = scalar_lea.hbm %s7609_s2, %s4429_s9 }
  0x32   : > { %s174_s20 = sshll.u32 %s167_s19, 4  ;;  %s165_s30 = scalar_lea.sflag [#allocation6], %s5947_s25  ;;  %s175_s20 = int_to_ptr.vmem [resolvable:$true] %s174_s20 }
  0x33   : > { %s7617_s8 = scalar_select %p5992_p11, 1, 0 }
  0x34   : > { %s5764_s6 = scalar_lea.hbm %s6000_s17, 16  ;;  %s5769_s27 = scalar_lea.hbm %s7609_s2, 32 }
  0x35   : > { %p5765_p12 = scmp.ne.s32.totalorder %s6000_s17, %s5764_s6  ;;  %p5770_p0 = scmp.lt.u32.totalorder %s6000_s17, %s7609_s2 }
  0x36   : > { %p5771_p2 = scmp.lt.u32.totalorder %s5769_s27, %s5764_s6  ;;  %p5773_p5 = scmp.lt.u32.totalorder %s5764_s6, %s6000_s17 }
  0x37   : > { %p5767_p8 = pnand %p5765_p12, %p5736_p1 }
  0x38   : > { %p5772_p4 = por %p5771_p2, %p5770_p0 }
  0x39   : > { %p5768_p10 = pneg %p5767_p8 }
  0x3a   : > { %p5774_p7 = por %p5773_p5, %p5772_p4 }
  0x3c   : > { %p5775_p9 = pnand %p5774_p7, %p5768_p10 }
  0x3e   : > { %5778 = shalt.err (!%p5775_p9)
}
  0x3f   : > { %s5779_s25 = scalar_lea.vmem %s175_s20, 16  ;;  %s5869_s5 = smov [#allocation5]  }
  0x40   : > { %p5780_p3 = scmp.ne.s32.totalorder %s175_s20, %s5779_s25  ;;  %s5784_s9 = sshll.u32 %s5869_s5, 4  ;;  %s5785_s9 = int_to_ptr.vmem [resolvable:$false] %s5784_s9 }
  0x41   : > { %s5786_s10 = scalar_lea.vmem %s5785_s9, 32  ;;  %p5787_p6 = scmp.lt.s32.totalorder %s175_s20, %s5785_s9 }
  0x42   : > { %p5782_p12 = pnand %p5780_p3, %p5736_p1  ;;  %p5788_p11 = scmp.lt.s32.totalorder %s5786_s10, %s5779_s25 }
  0x44   : > { %p5783_p8 = pneg %p5782_p12  ;;  %p5789_p0 = por %p5788_p11, %p5787_p6 }
  0x46   : > { %p5790_p2 = pnand %p5789_p0, %p5783_p8 }
  0x48   : > { %5793 = shalt.err (!%p5790_p2)
}
  0x49   : > { %5674 = dma.hbm_to_vmem [thread:$0]  (!%p5956_p13), %s6000_s17, 16, %s175_s20, %s165_s30  }
  0x4a   : > { %p7618_p10 = scmp.ne.s32.totalorder %s7617_s8, 0 }
  0x4b   : > { %s6026_s11 = sand.u32 (!%p7618_p10), 1, %s5856_s13   ;;  %p7619_p6 = scmp.ne.s32.totalorder (!%p7618_p10), %s7613_s22, 0 }
  0x4c   : > { %183 = sbr.rel (%p7618_p10) target bundleno = 1472 (0x5c0), region = 32  ;;  %s186_s6 = scalar_lea.sflag (!%p7618_p10), [#allocation3], %s6026_s11 }
  0x4d   : > { %s5661_s19 = smul.u32 (!%p7618_p10), 9216, %s6026_s11 }
  0x4f   : > { %s6030_s7 = scalar_lea.vmem (!%p7618_p10), [#allocation2], %s5661_s19 }
  0x53   : > { %5839 = dma.done.wait (%p7619_p6), %s186_s6, 147456  }
  0x54   : > { %5841 = vsyncadd (%p7619_p6), %s186_s6, 4294819840  ;;  %s195_s4 = scalar_lea.sflag [#allocation6], %s6026_s11  ;;  %s197_s8 = scalar_lea.vmem [#allocation5], %s6026_s11 }
  0x55   : > { %5843 = dma.done.wait (%p7619_p6), %s195_s4, 16  }
  0x56   : > { %5845 = vsyncadd (%p7619_p6), %s195_s4, 4294967280  ;;  %v244_v0 = vld [vmem:[%s6030_s7 + $0x8] sm:$0xff]  ;;  %v243_v5 = vld [vmem:[%s6030_s7] sm:$0xff]  ;;  %v5870_v30 = vmov 1983009808   ;;  %v1424_v32 = vlaneseq  ;;  %s4431_s28 = sshll.u32 %s6026_s11, 1 }
  0x57   : > { %v316_v1 = vld [vmem:[%s6030_s7 + $0x248] sm:$0xff]  ;;  %v315_v6 = vld [vmem:[%s6030_s7 + $0x240] sm:$0xff]  ;;  %v1422_v31 = vunpack.c.l.s4 %v5870_v30  ;;  %s4434_s29 = sshll.u32 %s5913_s16, 5  ;;  %s223_s25 = scalar_lea.vmem [#allocation7], %s4431_s28 }
  0x58   : > { %v280_v2 = vld [vmem:[%s6030_s7 + $0x128] sm:$0xff]  ;;  %v4437_v3 = vpack.c.bf16 %v316_v1, %v244_v0  ;;  %v4439_v8 = vpack.c.bf16 %v315_v6, %v243_v5  ;;  %v279_v9 = vld [vmem:[%s6030_s7 + $0x120] sm:$0xff]  ;;  %v1425_v40 = vshrl.u32 %v1424_v32, 7  ;;  %s4333_s5 = sshll.u32 %s223_s25, 4  ;;  %s7563_s10 = scalar_lea.hbm %s7610_s3, %s4434_s29  ;;  %s7565_s5 = int_to_ptr.vmem [resolvable:$true] %s4333_s5 }
  0x59   : > { %v352_v4 = vld [vmem:[%s6030_s7 + $0x368] sm:$0xff]  ;;  %v351_v10 = vld [vmem:[%s6030_s7 + $0x360] sm:$0xff]  ;;  %v1423_v39 = vunpack.c.0.s8 %v1422_v31  ;;  %s5794_s16 = scalar_lea.vmem %s7565_s5, 32  ;;  %p7620_p1 = scmp.ne.s32.totalorder %s7614_s23, 0 }
  0x5a   : > { %v5013_v7 = vpack.c.bf16 %v352_v4, %v280_v2  ;;  %v388_v11 = vld [vmem:[%s6030_s7 + $0x488] sm:$0xff]  ;;  %4438 = vmatprep.subr.bf16.mxu1 %v4437_v3  ;;  %v5015_v12 = vpack.c.bf16 %v351_v10, %v279_v9  ;;  %v387_v18 = vld [vmem:[%s6030_s7 + $0x480] sm:$0xff]  ;;  %p5795_p13 = scmp.ne.s32.totalorder %s7565_s5, %s5794_s16  ;;  %s5871_s19 = smov [#allocation7]  }
  0x5b   : > { %v460_v13 = vld [vmem:[%s6030_s7 + $0x6c8] sm:$0xff]  ;;  %4440 = vmatpush1.bf16.xpose.msra.mxu1 %v4439_v8  ;;  %v459_v19 = vld [vmem:[%s6030_s7 + $0x6c0] sm:$0xff]  ;;  %v6070_v47 = vsub.s32 %v1423_v39, %v1425_v40  ;;  %s5798_s6 = sshll.u32 %s5871_s19, 4  ;;  %s5799_s6 = int_to_ptr.vmem [resolvable:$false] %s5798_s6 }
  0x5c   : > { %v424_v14 = vld [vmem:[%s6030_s7 + $0x5a8] sm:$0xff]  ;;  %5014 = vmatprep.subr.bf16.mxu0 %v5013_v7  ;;  %v4441_v16 = vpack.c.bf16 %v460_v13, %v388_v11  ;;  %v423_v20 = vld [vmem:[%s6030_s7 + $0x5a0] sm:$0xff]  ;;  %v4443_v26 = vpack.c.bf16 %v459_v19, %v387_v18  ;;  %p5796_p11 = pnand %p5795_p13, %p7620_p1  ;;  %s5800_s4 = scalar_lea.vmem %s5799_s6, 64 }
  0x5d   : > { %v496_v15 = vld [vmem:[%s6030_s7 + $0x7e8] sm:$0xff]  ;;  %5016 = vmatpush1.bf16.xpose.msra.mxu0 %v5015_v12  ;;  %v495_v21 = vld [vmem:[%s6030_s7 + $0x7e0] sm:$0xff]  ;;  %p5801_p5 = scmp.lt.s32.totalorder %s7565_s5, %s5799_s6  ;;  %p5802_p7 = scmp.lt.s32.totalorder %s5800_s4, %s5794_s16 }
  0x5e   : > { %v5017_v17 = vpack.c.bf16 %v496_v15, %v424_v14  ;;  %4442 = vmatprep.subr.bf16.mxu1 %v4441_v16  ;;  %v532_v22 = vld [vmem:[%s6030_s7 + $0x908] sm:$0xff]  ;;  %v5019_v27 = vpack.c.bf16 %v495_v21, %v423_v20  ;;  %v531_v33 = vld [vmem:[%s6030_s7 + $0x900] sm:$0xff]  ;;  %p5797_p4 = pneg %p5796_p11 }
  0x5f   : > { %v604_v23 = vld [vmem:[%s6030_s7 + $0xb48] sm:$0xff]  ;;  %v603_v34 = vld [vmem:[%s6030_s7 + $0xb40] sm:$0xff]  ;;  %p5803_p9 = por %p5802_p7, %p5801_p5 }
  0x60   : > { %5018 = vmatprep.subr.bf16.mxu0 %v5017_v17  ;;  %v568_v24 = vld [vmem:[%s6030_s7 + $0xa28] sm:$0xff]  ;;  %v4445_v28 = vpack.c.bf16 %v604_v23, %v532_v22  ;;  %v567_v35 = vld [vmem:[%s6030_s7 + $0xa20] sm:$0xff]  ;;  %v4447_v43 = vpack.c.bf16 %v603_v34, %v531_v33 }
  0x61   : > { %v640_v25 = vld [vmem:[%s6030_s7 + $0xc68] sm:$0xff]  ;;  %v639_v36 = vld [vmem:[%s6030_s7 + $0xc60] sm:$0xff]  ;;  %p5804_p3 = pnand %p5803_p9, %p5797_p4 }
  0x62   : > { %v5021_v29 = vpack.c.bf16 %v640_v25, %v568_v24  ;;  %v676_v37 = vld [vmem:[%s6030_s7 + $0xd88] sm:$0xff]  ;;  %v5023_v44 = vpack.c.bf16 %v639_v36, %v567_v35  ;;  %v675_v48 = vld [vmem:[%s6030_s7 + $0xd80] sm:$0xff] }
  0x63   : > { %4444 = vmatpush1.bf16.xpose.msra.mxu1 %v4443_v26  ;;  %v748_v38 = vld [vmem:[%s6030_s7 + $0xfc8] sm:$0xff]  ;;  %v747_v49 = vld [vmem:[%s6030_s7 + $0xfc0] sm:$0xff] }
  0x64   : > { %4446 = vmatprep.subr.bf16.mxu1 %v4445_v28  ;;  %v712_v41 = vld [vmem:[%s6030_s7 + $0xea8] sm:$0xff]  ;;  %v4449_v45 = vpack.c.bf16 %v748_v38, %v676_v37  ;;  %v711_v50 = vld [vmem:[%s6030_s7 + $0xea0] sm:$0xff]  ;;  %v4451_v60 = vpack.c.bf16 %v747_v49, %v675_v48 }
  0x65   : > { %5020 = vmatpush1.bf16.xpose.msra.mxu0 %v5019_v27  ;;  %v784_v42 = vld [vmem:[%s6030_s7 + $0x10e8] sm:$0xff]  ;;  %v783_v51 = vld [vmem:[%s6030_s7 + $0x10e0] sm:$0xff] }
  0x66   : > { %5022 = vmatprep.subr.bf16.mxu0 %v5021_v29  ;;  %v5025_v46 = vpack.c.bf16 %v784_v42, %v712_v41  ;;  %v6079_v52 = vld [vmem:[%s7607_s0] sm:$0xff]  ;;  %v820_v53 = vld [vmem:[%s6030_s7 + $0x1208] sm:$0xff]  ;;  %v5027_v62 = vpack.c.bf16 %v783_v51, %v711_v50  ;;  %v246_v42 = vld [vmem:[%s6030_s7 + $0x18] sm:$0xff] }
  0x67   : > { %v892_v54 = vld [vmem:[%s6030_s7 + $0x1448] sm:$0xff]  ;;  %v6085_v55 = vrot.slane %v6079_v52, %v6070_v47  ;;  %v819_v2 = vld [vmem:[%s6030_s7 + $0x1200] sm:$0xff]  ;;  %v1420_v50 = vcombine.high %v6079_v52, %v6079_v52  ;;  %v426_v52 = vld [vmem:[%s6030_s7 + $0x5b8] sm:$0xff] }
  0x68   : > { %v6090_v56 = vld [vmem:[%s7607_s0 + $0x48] sm:$0xff]  ;;  %v4453_v63 = vpack.c.bf16 %v892_v54, %v820_v53  ;;  %v891_v3 = vld [vmem:[%s6030_s7 + $0x1440] sm:$0xff]  ;;  %v245_v54 = vld [vmem:[%s6030_s7 + $0x10] sm:$0xff] }
  0x69   : > { %v856_v57 = vld [vmem:[%s6030_s7 + $0x1328] sm:$0xff]  ;;  %v6096_v59 = vrot.slane %v6090_v56, %v6070_v47  ;;  %v1435_v61 = vcombine.high %v6085_v55, %v6085_v55  ;;  %v855_v4 = vld [vmem:[%s6030_s7 + $0x1320] sm:$0xff]  ;;  %v4455_v10 = vpack.c.bf16 %v891_v3, %v819_v2  ;;  %v1573_v53 = vcombine.high %v6090_v56, %v6090_v56 }
  0x6a   : > { %v928_v58 = vld [vmem:[%s6030_s7 + $0x1568] sm:$0xff]  ;;  %v927_v5 = vld [vmem:[%s6030_s7 + $0x1560] sm:$0xff] }
  0x6b   : > { %4448 = vmatpush1.bf16.xpose.msra.mxu1 %v4447_v43  ;;  %v1588_v0 = vcombine.high %v6096_v59, %v6096_v59  ;;  %v5029_v1 = vpack.c.bf16 %v928_v58, %v856_v57  ;;  %1862 = vmatprep.mubr.f32.mxu1 %v1435_v61  ;;  %v964_v6 = vld [vmem:[%s6030_s7 + $0x1688] sm:$0xff]  ;;  %v5031_v11 = vpack.c.bf16 %v927_v5, %v855_v4  ;;  %v963_v14 = vld [vmem:[%s6030_s7 + $0x1680] sm:$0xff]  ;;  %v318_v43 = vld [vmem:[%s6030_s7 + $0x258] sm:$0xff] }
  0x6c   : > { %4450 = vmatprep.subr.bf16.mxu1 %v4449_v45  ;;  %v1036_v7 = vld [vmem:[%s6030_s7 + $0x18c8] sm:$0xff]  ;;  %v1035_v15 = vld [vmem:[%s6030_s7 + $0x18c0] sm:$0xff]  ;;  %v354_v45 = vld [vmem:[%s6030_s7 + $0x378] sm:$0xff]  ;;  %v4469_v49 = vpack.c.bf16 %v318_v43, %v246_v42  ;;  %v6150_v56 = vrot.slane %v1573_v53, %v6070_v47 }
  0x6d   : > { %5024 = vmatpush1.bf16.xpose.msra.mxu0 %v5023_v44  ;;  %3122 = vmatprep.mubr.f32.mxu0 %v1588_v0  ;;  %v1000_v8 = vld [vmem:[%s6030_s7 + $0x17a8] sm:$0xff]  ;;  %v4457_v12 = vpack.c.bf16 %v1036_v7, %v964_v6  ;;  %v999_v16 = vld [vmem:[%s6030_s7 + $0x17a0] sm:$0xff]  ;;  %v4459_v22 = vpack.c.bf16 %v1035_v15, %v963_v14  ;;  %v282_v44 = vld [vmem:[%s6030_s7 + $0x138] sm:$0xff] }
  0x6e   : > { %5026 = vmatprep.subr.bf16.mxu0 %v5025_v46  ;;  %v1072_v9 = vld [vmem:[%s6030_s7 + $0x19e8] sm:$0xff]  ;;  %v1071_v17 = vld [vmem:[%s6030_s7 + $0x19e0] sm:$0xff]  ;;  %v5045_v51 = vpack.c.bf16 %v354_v45, %v282_v44  ;;  %v317_v57 = vld [vmem:[%s6030_s7 + $0x250] sm:$0xff]  ;;  %v1589_v6 = vcombine.high %v6150_v56, %v6150_v56 }
  0x6f   : > { %v5033_v13 = vpack.c.bf16 %v1072_v9, %v1000_v8  ;;  %v1108_v18 = vld [vmem:[%s6030_s7 + $0x1b08] sm:$0xff]  ;;  %v5035_v23 = vpack.c.bf16 %v1071_v17, %v999_v16  ;;  %v1107_v26 = vld [vmem:[%s6030_s7 + $0x1b00] sm:$0xff]  ;;  %v281_v58 = vld [vmem:[%s6030_s7 + $0x130] sm:$0xff] }
  0x70   : > { %v1180_v19 = vld [vmem:[%s6030_s7 + $0x1d48] sm:$0xff]  ;;  %v1179_v27 = vld [vmem:[%s6030_s7 + $0x1d40] sm:$0xff]  ;;  %v390_v61 = vld [vmem:[%s6030_s7 + $0x498] sm:$0xff] }
  0x71   : > { %v1144_v20 = vld [vmem:[%s6030_s7 + $0x1c28] sm:$0xff]  ;;  %v4461_v24 = vpack.c.bf16 %v1180_v19, %v1108_v18  ;;  %v1143_v28 = vld [vmem:[%s6030_s7 + $0x1c20] sm:$0xff]  ;;  %v4463_v34 = vpack.c.bf16 %v1179_v27, %v1107_v26  ;;  %v498_v0 = vld [vmem:[%s6030_s7 + $0x7f8] sm:$0xff] }
  0x72   : > { %v1216_v21 = vld [vmem:[%s6030_s7 + $0x1e68] sm:$0xff]  ;;  %v1215_v29 = vld [vmem:[%s6030_s7 + $0x1e60] sm:$0xff]  ;;  %v5049_v4 = vpack.c.bf16 %v498_v0, %v426_v52  ;;  %v389_v7 = vld [vmem:[%s6030_s7 + $0x490] sm:$0xff] }
  0x73   : > { %4452 = vmatpush1.bf16.xpose.msra.mxu1 %v4451_v60  ;;  %v5037_v25 = vpack.c.bf16 %v1216_v21, %v1144_v20  ;;  %v1252_v30 = vld [vmem:[%s6030_s7 + $0x1f88] sm:$0xff]  ;;  %v5039_v35 = vpack.c.bf16 %v1215_v29, %v1143_v28  ;;  %v1251_v38 = vld [vmem:[%s6030_s7 + $0x1f80] sm:$0xff]  ;;  %v353_v60 = vld [vmem:[%s6030_s7 + $0x370] sm:$0xff] }
  0x74   : > { %4454 = vmatprep.subr.bf16.mxu1 %v4453_v63  ;;  %v1324_v31 = vld [vmem:[%s6030_s7 + $0x21c8] sm:$0xff]  ;;  %v1323_v39 = vld [vmem:[%s6030_s7 + $0x21c0] sm:$0xff]  ;;  %v6145_v63 = vrot.slane %v1420_v50, %v6070_v47  ;;  %v5047_v2 = vpack.c.bf16 %v353_v60, %v281_v58  ;;  %v461_v8 = vld [vmem:[%s6030_s7 + $0x6d0] sm:$0xff] }
  0x75   : > { %5028 = vmatpush1.bf16.xpose.msra.mxu0 %v5027_v62  ;;  %v1288_v32 = vld [vmem:[%s6030_s7 + $0x20a8] sm:$0xff]  ;;  %v4465_v36 = vpack.c.bf16 %v1324_v31, %v1252_v30  ;;  %v1287_v40 = vld [vmem:[%s6030_s7 + $0x20a0] sm:$0xff]  ;;  %v4467_v46 = vpack.c.bf16 %v1323_v39, %v1251_v38  ;;  %v462_v62 = vld [vmem:[%s6030_s7 + $0x6d8] sm:$0xff] }
  0x76   : > { %5030 = vmatprep.subr.bf16.mxu0 %v5029_v1  ;;  %v1360_v33 = vld [vmem:[%s6030_s7 + $0x22e8] sm:$0xff]  ;;  %v1359_v41 = vld [vmem:[%s6030_s7 + $0x22e0] sm:$0xff]  ;;  %v4471_v1 = vpack.c.bf16 %v317_v57, %v245_v54  ;;  %v4473_v3 = vpack.c.bf16 %v462_v62, %v390_v61  ;;  %v1436_v5 = vcombine.high %v6145_v63, %v6145_v63  ;;  %v425_v9 = vld [vmem:[%s6030_s7 + $0x5b0] sm:$0xff] }
  0x77   : > { %v5041_v37 = vpack.c.bf16 %v1360_v33, %v1288_v32  ;;  %v5043_v48 = vpack.c.bf16 %v1359_v41, %v1287_v40  ;;  %v533_v17 = vld [vmem:[%s6030_s7 + $0x910] sm:$0xff]  ;;  %v678_v21 = vld [vmem:[%s6030_s7 + $0xd98] sm:$0xff] }
  0x78   : > { %v605_v18 = vld [vmem:[%s6030_s7 + $0xb50] sm:$0xff]  ;;  %v822_v33 = vld [vmem:[%s6030_s7 + $0x1218] sm:$0xff] }
  0x79   : > { %v569_v19 = vld [vmem:[%s6030_s7 + $0xa30] sm:$0xff]  ;;  %v966_v45 = vld [vmem:[%s6030_s7 + $0x1698] sm:$0xff] }
  0x7a   : > { %v641_v20 = vld [vmem:[%s6030_s7 + $0xc70] sm:$0xff]  ;;  %v1110_v62 = vld [vmem:[%s6030_s7 + $0x1b18] sm:$0xff] }
  0x7b   : > { %4456 = vmatpush1.bf16.xpose.msra.mxu1 %v4455_v10  ;;  %v497_v10 = vld [vmem:[%s6030_s7 + $0x7f0] sm:$0xff]  ;;  %v5055_v26 = vpack.c.bf16 %v641_v20, %v569_v19  ;;  %v1182_v52 = vld [vmem:[%s6030_s7 + $0x1d58] sm:$0xff]  ;;  %v248_v20 = vld [vmem:[%s6030_s7 + $0x28] sm:$0xff] }
  0x7c   : > { %4458 = vmatprep.subr.bf16.mxu1 %v4457_v12  ;;  %v606_v12 = vld [vmem:[%s6030_s7 + $0xb58] sm:$0xff]  ;;  %v5051_v14 = vpack.c.bf16 %v497_v10, %v425_v9  ;;  %v677_v29 = vld [vmem:[%s6030_s7 + $0xd90] sm:$0xff] }
  0x7d   : > { %5032 = vmatpush1.bf16.xpose.msra.mxu0 %v5031_v11  ;;  %v534_v11 = vld [vmem:[%s6030_s7 + $0x918] sm:$0xff]  ;;  %v749_v30 = vld [vmem:[%s6030_s7 + $0xfd0] sm:$0xff] }
  0x7e   : > { %5034 = vmatprep.subr.bf16.mxu0 %v5033_v13  ;;  %v642_v13 = vld [vmem:[%s6030_s7 + $0xc78] sm:$0xff]  ;;  %v4477_v15 = vpack.c.bf16 %v606_v12, %v534_v11  ;;  %v713_v31 = vld [vmem:[%s6030_s7 + $0xeb0] sm:$0xff] }
  0x7f   : > { %v785_v32 = vld [vmem:[%s6030_s7 + $0x10f0] sm:$0xff]  ;;  %v1146_v0 = vld [vmem:[%s6030_s7 + $0x1c38] sm:$0xff] }
  0x80   : > { %v5059_v38 = vpack.c.bf16 %v785_v32, %v713_v31  ;;  %v821_v41 = vld [vmem:[%s6030_s7 + $0x1210] sm:$0xff]  ;;  %v1254_v10 = vld [vmem:[%s6030_s7 + $0x1f98] sm:$0xff]  ;;  %v319_v31 = vld [vmem:[%s6030_s7 + $0x260] sm:$0xff] }
  0x81   : > { %v893_v42 = vld [vmem:[%s6030_s7 + $0x1450] sm:$0xff]  ;;  %v1326_v11 = vld [vmem:[%s6030_s7 + $0x21d8] sm:$0xff]  ;;  %v283_v32 = vld [vmem:[%s6030_s7 + $0x140] sm:$0xff] }
  0x82   : > { %v857_v43 = vld [vmem:[%s6030_s7 + $0x1330] sm:$0xff]  ;;  %v4487_v50 = vpack.c.bf16 %v893_v42, %v821_v41  ;;  %v1290_v12 = vld [vmem:[%s6030_s7 + $0x20b8] sm:$0xff] }
  0x83   : > { %4460 = vmatpush1.bf16.xpose.msra.mxu1 %v4459_v22  ;;  %v750_v22 = vld [vmem:[%s6030_s7 + $0xfd8] sm:$0xff]  ;;  %v929_v44 = vld [vmem:[%s6030_s7 + $0x1570] sm:$0xff] }
  0x84   : > { %4462 = vmatprep.subr.bf16.mxu1 %v4461_v24  ;;  %v786_v24 = vld [vmem:[%s6030_s7 + $0x10f8] sm:$0xff]  ;;  %v4481_v27 = vpack.c.bf16 %v750_v22, %v678_v21  ;;  %v965_v57 = vld [vmem:[%s6030_s7 + $0x1690] sm:$0xff]  ;;  %v320_v21 = vld [vmem:[%s6030_s7 + $0x268] sm:$0xff] }
  0x85   : > { %5036 = vmatpush1.bf16.xpose.msra.mxu0 %v5035_v23  ;;  %v714_v23 = vld [vmem:[%s6030_s7 + $0xeb8] sm:$0xff]  ;;  %v1037_v58 = vld [vmem:[%s6030_s7 + $0x18d0] sm:$0xff]  ;;  %v284_v22 = vld [vmem:[%s6030_s7 + $0x148] sm:$0xff] }
  0x86   : > { %5038 = vmatprep.subr.bf16.mxu0 %v5037_v25  ;;  %v4479_v25 = vpack.c.bf16 %v605_v18, %v533_v17  ;;  %v5057_v28 = vpack.c.bf16 %v786_v24, %v714_v23  ;;  %v1001_v60 = vld [vmem:[%s6030_s7 + $0x17b0] sm:$0xff]  ;;  %v356_v23 = vld [vmem:[%s6030_s7 + $0x388] sm:$0xff] }
  0x87   : > { %v1073_v61 = vld [vmem:[%s6030_s7 + $0x19f0] sm:$0xff] }
  0x88   : > { %v1217_v9 = vld [vmem:[%s6030_s7 + $0x1e70] sm:$0xff] }
  0x89   : > { %v1325_v17 = vld [vmem:[%s6030_s7 + $0x21d0] sm:$0xff] }
  0x8a   : > { %v1289_v18 = vld [vmem:[%s6030_s7 + $0x20b0] sm:$0xff] }
  0x8b   : > { %4464 = vmatpush1.bf16.xpose.msra.mxu1 %v4463_v34  ;;  %v894_v34 = vld [vmem:[%s6030_s7 + $0x1458] sm:$0xff]  ;;  %v1361_v19 = vld [vmem:[%s6030_s7 + $0x22f0] sm:$0xff] }
  0x8c   : > { %4466 = vmatprep.subr.bf16.mxu1 %v4465_v36  ;;  %v930_v36 = vld [vmem:[%s6030_s7 + $0x1578] sm:$0xff]  ;;  %v4485_v39 = vpack.c.bf16 %v894_v34, %v822_v33  ;;  %v355_v33 = vld [vmem:[%s6030_s7 + $0x380] sm:$0xff]  ;;  %v392_v34 = vld [vmem:[%s6030_s7 + $0x4a8] sm:$0xff] }
  0x8d   : > { %5040 = vmatpush1.bf16.xpose.msra.mxu0 %v5039_v35  ;;  %v858_v35 = vld [vmem:[%s6030_s7 + $0x1338] sm:$0xff]  ;;  %v5079_v41 = vpack.c.bf16 %v355_v33, %v283_v32  ;;  %v967_v33 = vld [vmem:[%s6030_s7 + $0x16a0] sm:$0xff] }
  0x8e   : > { %5042 = vmatprep.subr.bf16.mxu0 %v5041_v37  ;;  %v4483_v37 = vpack.c.bf16 %v749_v30, %v677_v29  ;;  %v5061_v40 = vpack.c.bf16 %v930_v36, %v858_v35  ;;  %v6222_v29 = vld [vmem:[%s7607_s0 + $0x50] sm:$0xff]  ;;  %v247_v30 = vld [vmem:[%s6030_s7 + $0x20] sm:$0xff]  ;;  %v464_v35 = vld [vmem:[%s6030_s7 + $0x6e8] sm:$0xff] }
  0x8f   : > { %v4505_v42 = vpack.c.bf16 %v464_v35, %v392_v34  ;;  %v1039_v34 = vld [vmem:[%s6030_s7 + $0x18e0] sm:$0xff] }
  0x90   : > { %v1003_v35 = vld [vmem:[%s6030_s7 + $0x17c0] sm:$0xff] }
  0x93   : > { %4468 = vmatpush1.bf16.xpose.msra.mxu1 %v4467_v46  ;;  %v1038_v46 = vld [vmem:[%s6030_s7 + $0x18d8] sm:$0xff] }
  0x94   : > { %4470 = vmatprep.subr.bf16.mxu1 %v4469_v49  ;;  %v1074_v49 = vld [vmem:[%s6030_s7 + $0x19f8] sm:$0xff]  ;;  %v4489_v53 = vpack.c.bf16 %v1038_v46, %v966_v45  ;;  %v391_v46 = vld [vmem:[%s6030_s7 + $0x4a0] sm:$0xff] }
  0x95   : > { %5044 = vmatpush1.bf16.xpose.msra.mxu0 %v5043_v48  ;;  %v1002_v48 = vld [vmem:[%s6030_s7 + $0x17b8] sm:$0xff] }
  0x96   : > { %5046 = vmatprep.subr.bf16.mxu0 %v5045_v51  ;;  %v5063_v51 = vpack.c.bf16 %v929_v44, %v857_v43  ;;  %v5065_v54 = vpack.c.bf16 %v1074_v49, %v1002_v48  ;;  %v463_v48 = vld [vmem:[%s6030_s7 + $0x6e0] sm:$0xff] }
  0x97   : > { %v427_v49 = vld [vmem:[%s6030_s7 + $0x5c0] sm:$0xff] }
  0x9a   : > { %1863 = vmatmul.mubr.f32.vlgmr.msra.gmra.mrb[0].mxu1 %v6085_v55  ;;  %v570_v55 = vld [vmem:[%s6030_s7 + $0xa38] sm:$0xff] }
  0x9b   : > { %4472 = vmatpush1.bf16.xpose.msra.mxu1 %v4471_v1  ;;  %1932 = vmatprep.mubr.f32.mxu1 %v1436_v5  ;;  %v5053_v16 = vpack.c.bf16 %v642_v13, %v570_v55  ;;  %v1218_v1 = vld [vmem:[%s6030_s7 + $0x1e78] sm:$0xff] }
  0x9c   : > { %3123 = vmatmul.mubr.f32.vlgmr.msra.gmra.mrb[0].mxu0 %v6096_v59  ;;  %4474 = vmatprep.subr.bf16.mxu1 %v4473_v3  ;;  %v4475_v59 = vpack.c.bf16 %v461_v8, %v389_v7  ;;  %v5067_v3 = vpack.c.bf16 %v1073_v61, %v1001_v60  ;;  %v5069_v5 = vpack.c.bf16 %v1218_v1, %v1146_v0  ;;  %v1181_v7 = vld [vmem:[%s6030_s7 + $0x1d50] sm:$0xff]  ;;  %v1362_v55 = vld [vmem:[%s6030_s7 + $0x22f8] sm:$0xff]  ;;  %v535_v61 = vld [vmem:[%s6030_s7 + $0x920] sm:$0xff] }
  0x9d   : > { %5048 = vmatpush1.bf16.xpose.msra.mxu0 %v5047_v2  ;;  %3192 = vmatprep.mubr.f32.mxu0 %v1589_v6  ;;  %v4491_v2 = vpack.c.bf16 %v1037_v58, %v965_v57  ;;  %v1109_v6 = vld [vmem:[%s6030_s7 + $0x1b10] sm:$0xff]  ;;  %v643_v0 = vld [vmem:[%s6030_s7 + $0xc80] sm:$0xff]  ;;  %v680_v1 = vld [vmem:[%s6030_s7 + $0xda8] sm:$0xff] }
  0x9e   : > { %5050 = vmatprep.subr.bf16.mxu0 %v5049_v4  ;;  %v4493_v4 = vpack.c.bf16 %v1182_v52, %v1110_v62  ;;  %v1145_v8 = vld [vmem:[%s6030_s7 + $0x1c30] sm:$0xff]  ;;  %v4495_v13 = vpack.c.bf16 %v1181_v7, %v1109_v6  ;;  %v607_v62 = vld [vmem:[%s6030_s7 + $0xb60] sm:$0xff] }
  0x9f   : > { %v571_v52 = vld [vmem:[%s6030_s7 + $0xa40] sm:$0xff] }
  0xa0   : > { %v5087_v6 = vpack.c.bf16 %v643_v0, %v571_v52  ;;  %v1327_v52 = vld [vmem:[%s6030_s7 + $0x21e0] sm:$0xff] }
  0xa1   : > { %v1291_v0 = vld [vmem:[%s6030_s7 + $0x20c0] sm:$0xff] }
  0xa3   : > { %4476 = vmatpush1.bf16.xpose.msra.mxu1 %v4475_v59  ;;  %v5071_v59 = vpack.c.bf16 %v1217_v9, %v1145_v8  ;;  %v679_v9 = vld [vmem:[%s6030_s7 + $0xda0] sm:$0xff] }
  0xa4   : > { %4478 = vmatprep.subr.bf16.mxu1 %v4477_v15  ;;  %v5073_v15 = vpack.c.bf16 %v1362_v55, %v1290_v12  ;;  %v787_v12 = vld [vmem:[%s6030_s7 + $0x1100] sm:$0xff]  ;;  %v824_v55 = vld [vmem:[%s6030_s7 + $0x1228] sm:$0xff] }
  0xa5   : > { %5052 = vmatpush1.bf16.xpose.msra.mxu0 %v5051_v14  ;;  %v4497_v14 = vpack.c.bf16 %v1326_v11, %v1254_v10  ;;  %v751_v10 = vld [vmem:[%s6030_s7 + $0xfe0] sm:$0xff] }
  0xa6   : > { %5054 = vmatprep.subr.bf16.mxu0 %v5053_v16  ;;  %v1253_v16 = vld [vmem:[%s6030_s7 + $0x1f90] sm:$0xff]  ;;  %v715_v11 = vld [vmem:[%s6030_s7 + $0xec0] sm:$0xff] }
  0xa7   : > { %v4499_v24 = vpack.c.bf16 %v1325_v17, %v1253_v16  ;;  %v5091_v16 = vpack.c.bf16 %v787_v12, %v715_v11  ;;  %v1590_v11 = vcombine.high %v6222_v29, %v6222_v29  ;;  %v249_v12 = vld [vmem:[%s6030_s7 + $0x30] sm:$0xff] }
  0xab   : > { %4480 = vmatpush1.bf16.xpose.msra.mxu1 %v4479_v25  ;;  %v5075_v25 = vpack.c.bf16 %v1361_v19, %v1289_v18  ;;  %v823_v19 = vld [vmem:[%s6030_s7 + $0x1220] sm:$0xff] }
  0xac   : > { %4482 = vmatprep.subr.bf16.mxu1 %v4481_v27  ;;  %v5077_v27 = vpack.c.bf16 %v356_v23, %v284_v22  ;;  %v931_v22 = vld [vmem:[%s6030_s7 + $0x1580] sm:$0xff]  ;;  %v968_v23 = vld [vmem:[%s6030_s7 + $0x16a8] sm:$0xff] }
  0xad   : > { %5056 = vmatpush1.bf16.xpose.msra.mxu0 %v5055_v26  ;;  %v4501_v26 = vpack.c.bf16 %v320_v21, %v248_v20  ;;  %v895_v20 = vld [vmem:[%s6030_s7 + $0x1460] sm:$0xff] }
  0xae   : > { %5058 = vmatprep.subr.bf16.mxu0 %v5057_v28  ;;  %v6217_v28 = vld [vmem:[%s7607_s0 + $0x8] sm:$0xff]  ;;  %v859_v21 = vld [vmem:[%s6030_s7 + $0x1340] sm:$0xff] }
  0xaf   : > { %v6232_v36 = vrot.slane %v6217_v28, %v6070_v47 }
  0xb1   : > { %v1452_v44 = vcombine.high %v6232_v36, %v6232_v36 }
  0xb3   : > { %4484 = vmatpush1.bf16.xpose.msra.mxu1 %v4483_v37  ;;  %v428_v37 = vld [vmem:[%s6030_s7 + $0x5c8] sm:$0xff] }
  0xb4   : > { %4486 = vmatprep.subr.bf16.mxu1 %v4485_v39  ;;  %v6238_v39 = vrot.slane %v6222_v29, %v6070_v47  ;;  %v6318_v29 = vrot.slane %v1590_v11, %v6070_v47 }
  0xb5   : > { %5060 = vmatpush1.bf16.xpose.msra.mxu0 %v5059_v38  ;;  %v500_v38 = vld [vmem:[%s6030_s7 + $0x808] sm:$0xff] }
  0xb6   : > { %5062 = vmatprep.subr.bf16.mxu0 %v5061_v40  ;;  %v4503_v40 = vpack.c.bf16 %v319_v31, %v247_v30  ;;  %v5081_v43 = vpack.c.bf16 %v500_v38, %v428_v37  ;;  %v1605_v45 = vcombine.high %v6238_v39, %v6238_v39  ;;  %v5095_v30 = vpack.c.bf16 %v931_v22, %v859_v21  ;;  %v1075_v37 = vld [vmem:[%s6030_s7 + $0x1a00] sm:$0xff]  ;;  %v1112_v38 = vld [vmem:[%s6030_s7 + $0x1b28] sm:$0xff] }
  0xbb   : > { %4488 = vmatpush1.bf16.xpose.msra.mxu1 %v4487_v50  ;;  %v499_v50 = vld [vmem:[%s6030_s7 + $0x800] sm:$0xff] }
  0xbc   : > { %4490 = vmatprep.subr.bf16.mxu1 %v4489_v53  ;;  %v608_v53 = vld [vmem:[%s6030_s7 + $0xb68] sm:$0xff]  ;;  %v5083_v57 = vpack.c.bf16 %v499_v50, %v427_v49  ;;  %v1183_v49 = vld [vmem:[%s6030_s7 + $0x1d60] sm:$0xff] }
  0xbd   : > { %5064 = vmatpush1.bf16.xpose.msra.mxu0 %v5063_v51  ;;  %v536_v51 = vld [vmem:[%s6030_s7 + $0x928] sm:$0xff]  ;;  %v1147_v50 = vld [vmem:[%s6030_s7 + $0x1c40] sm:$0xff] }
  0xbe   : > { %5066 = vmatprep.subr.bf16.mxu0 %v5065_v54  ;;  %v644_v54 = vld [vmem:[%s6030_s7 + $0xc88] sm:$0xff]  ;;  %v4509_v58 = vpack.c.bf16 %v608_v53, %v536_v51  ;;  %v1219_v51 = vld [vmem:[%s6030_s7 + $0x1e80] sm:$0xff] }
  0xbf   : > { %v1256_v53 = vld [vmem:[%s6030_s7 + $0x1fa8] sm:$0xff] }
  0xc3   : > { %4492 = vmatpush1.bf16.xpose.msra.mxu1 %v4491_v2  ;;  %v752_v2 = vld [vmem:[%s6030_s7 + $0xfe8] sm:$0xff] }
  0xc4   : > { %4494 = vmatprep.subr.bf16.mxu1 %v4493_v4  ;;  %v788_v4 = vld [vmem:[%s6030_s7 + $0x1108] sm:$0xff]  ;;  %v4513_v7 = vpack.c.bf16 %v752_v2, %v680_v1  ;;  %v1363_v1 = vld [vmem:[%s6030_s7 + $0x2300] sm:$0xff]  ;;  %v250_v2 = vld [vmem:[%s6030_s7 + $0x38] sm:$0xff] }
  0xc5   : > { %5068 = vmatpush1.bf16.xpose.msra.mxu0 %v5067_v3  ;;  %v716_v3 = vld [vmem:[%s6030_s7 + $0xec8] sm:$0xff] }
  0xc6   : > { %5070 = vmatprep.subr.bf16.mxu0 %v5069_v5  ;;  %v4511_v5 = vpack.c.bf16 %v607_v62, %v535_v61  ;;  %v5089_v8 = vpack.c.bf16 %v788_v4, %v716_v3  ;;  %v1255_v62 = vld [vmem:[%s6030_s7 + $0x1fa0] sm:$0xff]  ;;  %v322_v3 = vld [vmem:[%s6030_s7 + $0x278] sm:$0xff] }
  0xc7   : > { %v286_v4 = vld [vmem:[%s6030_s7 + $0x158] sm:$0xff] }
  0xcb   : > { %4496 = vmatpush1.bf16.xpose.msra.mxu1 %v4495_v13  ;;  %v896_v13 = vld [vmem:[%s6030_s7 + $0x1468] sm:$0xff] }
  0xcc   : > { %4498 = vmatprep.subr.bf16.mxu1 %v4497_v14  ;;  %v932_v14 = vld [vmem:[%s6030_s7 + $0x1588] sm:$0xff]  ;;  %v4517_v17 = vpack.c.bf16 %v896_v13, %v824_v55  ;;  %v321_v55 = vld [vmem:[%s6030_s7 + $0x270] sm:$0xff] }
  0xcd   : > { %5072 = vmatpush1.bf16.xpose.msra.mxu0 %v5071_v59  ;;  %v860_v59 = vld [vmem:[%s6030_s7 + $0x1348] sm:$0xff]  ;;  %v285_v13 = vld [vmem:[%s6030_s7 + $0x150] sm:$0xff] }
  0xce   : > { %5074 = vmatprep.subr.bf16.mxu0 %v5073_v15  ;;  %v4515_v15 = vpack.c.bf16 %v751_v10, %v679_v9  ;;  %v5093_v18 = vpack.c.bf16 %v932_v14, %v860_v59  ;;  %v1437_v10 = vcombine.high %v6217_v28, %v6217_v28  ;;  %v357_v59 = vld [vmem:[%s6030_s7 + $0x390] sm:$0xff]  ;;  %v394_v14 = vld [vmem:[%s6030_s7 + $0x4b8] sm:$0xff] }
  0xcf   : > { %v502_v28 = vld [vmem:[%s6030_s7 + $0x818] sm:$0xff] }
  0xd3   : > { %4500 = vmatpush1.bf16.xpose.msra.mxu1 %v4499_v24  ;;  %v1040_v24 = vld [vmem:[%s6030_s7 + $0x18e8] sm:$0xff] }
  0xd4   : > { %4502 = vmatprep.subr.bf16.mxu1 %v4501_v26  ;;  %v1076_v26 = vld [vmem:[%s6030_s7 + $0x1a08] sm:$0xff]  ;;  %v4521_v31 = vpack.c.bf16 %v1040_v24, %v968_v23  ;;  %v1606_v23 = vcombine.high %v6318_v29, %v6318_v29  ;;  %v393_v24 = vld [vmem:[%s6030_s7 + $0x4b0] sm:$0xff] }
  0xd5   : > { %5076 = vmatpush1.bf16.xpose.msra.mxu0 %v5075_v25  ;;  %v1004_v25 = vld [vmem:[%s6030_s7 + $0x17c8] sm:$0xff] }
  0xd6   : > { %5078 = vmatprep.subr.bf16.mxu0 %v5077_v27  ;;  %v4519_v27 = vpack.c.bf16 %v895_v20, %v823_v19  ;;  %v5097_v32 = vpack.c.bf16 %v1076_v26, %v1004_v25  ;;  %v5111_v19 = vpack.c.bf16 %v357_v59, %v285_v13  ;;  %v465_v25 = vld [vmem:[%s6030_s7 + $0x6f0] sm:$0xff] }
  0xd7   : > { %v429_v26 = vld [vmem:[%s6030_s7 + $0x5d0] sm:$0xff] }
  0xd8   : > { %v1041_v13 = vld [vmem:[%s6030_s7 + $0x18f0] sm:$0xff] }
  0xd9   : > { %v1005_v59 = vld [vmem:[%s6030_s7 + $0x17d0] sm:$0xff] }
  0xda   : > { %1933 = vmatmul.mubr.f32.vlgmr.msra.gmra.mrb[0].mxu1 %v6145_v63  ;;  %v572_v63 = vld [vmem:[%s6030_s7 + $0xa48] sm:$0xff] }
  0xdb   : > { %4504 = vmatpush1.bf16.xpose.msra.mxu1 %v4503_v40  ;;  %2002 = vmatprep.mubr.f32.mxu1 %v1452_v44  ;;  %v5085_v60 = vpack.c.bf16 %v644_v54, %v572_v63  ;;  %v1184_v40 = vld [vmem:[%s6030_s7 + $0x1d68] sm:$0xff]  ;;  %v5099_v44 = vpack.c.bf16 %v1075_v37, %v1003_v35  ;;  %v537_v37 = vld [vmem:[%s6030_s7 + $0x930] sm:$0xff] }
  0xdc   : > { %3193 = vmatmul.mubr.f32.vlgmr.msra.gmra.mrb[0].mxu0 %v6150_v56  ;;  %4506 = vmatprep.subr.bf16.mxu1 %v4505_v42  ;;  %v4507_v56 = vpack.c.bf16 %v463_v48, %v391_v46  ;;  %v1220_v42 = vld [vmem:[%s6030_s7 + $0x1e88] sm:$0xff]  ;;  %v1111_v48 = vld [vmem:[%s6030_s7 + $0x1b20] sm:$0xff] }
  0xdd   : > { %5080 = vmatpush1.bf16.xpose.msra.mxu0 %v5079_v41  ;;  %3262 = vmatprep.mubr.f32.mxu0 %v1605_v45  ;;  %v1148_v41 = vld [vmem:[%s6030_s7 + $0x1c48] sm:$0xff]  ;;  %v4525_v45 = vpack.c.bf16 %v1184_v40, %v1112_v38  ;;  %v609_v38 = vld [vmem:[%s6030_s7 + $0xb70] sm:$0xff] }
  0xde   : > { %5082 = vmatprep.subr.bf16.mxu0 %v5081_v43  ;;  %v4523_v43 = vpack.c.bf16 %v1039_v34, %v967_v33  ;;  %v5101_v46 = vpack.c.bf16 %v1220_v42, %v1148_v41  ;;  %v1328_v63 = vld [vmem:[%s6030_s7 + $0x21e8] sm:$0xff]  ;;  %v573_v40 = vld [vmem:[%s6030_s7 + $0xa50] sm:$0xff]  ;;  %v682_v42 = vld [vmem:[%s6030_s7 + $0xdb8] sm:$0xff] }
  0xdf   : > { %v1292_v54 = vld [vmem:[%s6030_s7 + $0x20c8] sm:$0xff]  ;;  %v645_v41 = vld [vmem:[%s6030_s7 + $0xc90] sm:$0xff] }
  0xe3   : > { %4508 = vmatpush1.bf16.xpose.msra.mxu1 %v4507_v56  ;;  %v1364_v56 = vld [vmem:[%s6030_s7 + $0x2308] sm:$0xff] }
  0xe4   : > { %4510 = vmatprep.subr.bf16.mxu1 %v4509_v58  ;;  %v5103_v58 = vpack.c.bf16 %v1219_v51, %v1147_v50  ;;  %v5105_v61 = vpack.c.bf16 %v1364_v56, %v1292_v54  ;;  %v681_v51 = vld [vmem:[%s6030_s7 + $0xdb0] sm:$0xff]  ;;  %v826_v56 = vld [vmem:[%s6030_s7 + $0x1238] sm:$0xff] }
  0xe5   : > { %5084 = vmatpush1.bf16.xpose.msra.mxu0 %v5083_v57  ;;  %v4527_v57 = vpack.c.bf16 %v1183_v49, %v1111_v48  ;;  %v5119_v48 = vpack.c.bf16 %v645_v41, %v573_v40  ;;  %v789_v54 = vld [vmem:[%s6030_s7 + $0x1110] sm:$0xff]  ;;  %v252_v41 = vld [vmem:[%s6030_s7 + $0x48] sm:$0xff] }
  0xe6   : > { %5086 = vmatprep.subr.bf16.mxu0 %v5085_v60  ;;  %v4529_v60 = vpack.c.bf16 %v1328_v63, %v1256_v53  ;;  %v753_v53 = vld [vmem:[%s6030_s7 + $0xff0] sm:$0xff] }
  0xe7   : > { %v717_v63 = vld [vmem:[%s6030_s7 + $0xed0] sm:$0xff] }
  0xe8   : > { %v1365_v40 = vld [vmem:[%s6030_s7 + $0x2310] sm:$0xff] }
  0xeb   : > { %4512 = vmatpush1.bf16.xpose.msra.mxu1 %v4511_v5  ;;  %v358_v5 = vld [vmem:[%s6030_s7 + $0x398] sm:$0xff] }
  0xec   : > { %4514 = vmatprep.subr.bf16.mxu1 %v4513_v7  ;;  %v5107_v7 = vpack.c.bf16 %v1363_v1, %v1291_v0  ;;  %v5109_v9 = vpack.c.bf16 %v358_v5, %v286_v4  ;;  %v825_v1 = vld [vmem:[%s6030_s7 + $0x1230] sm:$0xff]  ;;  %v970_v5 = vld [vmem:[%s6030_s7 + $0x16b8] sm:$0xff] }
  0xed   : > { %5088 = vmatpush1.bf16.xpose.msra.mxu0 %v5087_v6  ;;  %v4531_v6 = vpack.c.bf16 %v1327_v52, %v1255_v62  ;;  %v5123_v62 = vpack.c.bf16 %v789_v54, %v717_v63  ;;  %v933_v4 = vld [vmem:[%s6030_s7 + $0x1590] sm:$0xff]  ;;  %v323_v63 = vld [vmem:[%s6030_s7 + $0x280] sm:$0xff] }
  0xee   : > { %5090 = vmatprep.subr.bf16.mxu0 %v5089_v8  ;;  %v4533_v8 = vpack.c.bf16 %v322_v3, %v250_v2  ;;  %v897_v2 = vld [vmem:[%s6030_s7 + $0x1470] sm:$0xff]  ;;  %v287_v54 = vld [vmem:[%s6030_s7 + $0x160] sm:$0xff] }
  0xef   : > { %v861_v3 = vld [vmem:[%s6030_s7 + $0x1350] sm:$0xff] }
  0xf3   : > { %4516 = vmatpush1.bf16.xpose.msra.mxu1 %v4515_v15  ;;  %v466_v15 = vld [vmem:[%s6030_s7 + $0x6f8] sm:$0xff] }
  0xf4   : > { %4518 = vmatprep.subr.bf16.mxu1 %v4517_v17  ;;  %v430_v17 = vld [vmem:[%s6030_s7 + $0x5d8] sm:$0xff]  ;;  %v4537_v20 = vpack.c.bf16 %v466_v15, %v394_v14  ;;  %v1077_v14 = vld [vmem:[%s6030_s7 + $0x1a10] sm:$0xff] }
  0xf5   : > { %5092 = vmatpush1.bf16.xpose.msra.mxu0 %v5091_v16  ;;  %v6313_v16 = vrot.slane %v1437_v10, %v6070_v47  ;;  %v5113_v21 = vpack.c.bf16 %v502_v28, %v430_v17  ;;  %v5127_v10 = vpack.c.bf16 %v933_v4, %v861_v3  ;;  %v1114_v15 = vld [vmem:[%s6030_s7 + $0x1b38] sm:$0xff] }
  0xf6   : > { %5094 = vmatprep.subr.bf16.mxu0 %v5093_v18  ;;  %v4535_v18 = vpack.c.bf16 %v321_v55, %v249_v12  ;;  %v969_v55 = vld [vmem:[%s6030_s7 + $0x16b0] sm:$0xff]  ;;  %v1186_v17 = vld [vmem:[%s6030_s7 + $0x1d78] sm:$0xff] }
  0xf7   : > { %v1453_v22 = vcombine.high %v6313_v16, %v6313_v16  ;;  %v1150_v28 = vld [vmem:[%s6030_s7 + $0x1c58] sm:$0xff] }
  0xfb   : > { %4520 = vmatpush1.bf16.xpose.msra.mxu1 %v4519_v27  ;;  %v501_v27 = vld [vmem:[%s6030_s7 + $0x810] sm:$0xff] }
  0xfc   : > { %4522 = vmatprep.subr.bf16.mxu1 %v4521_v31  ;;  %v610_v31 = vld [vmem:[%s6030_s7 + $0xb78] sm:$0xff]  ;;  %v5115_v33 = vpack.c.bf16 %v501_v27, %v429_v26  ;;  %v1221_v26 = vld [vmem:[%s6030_s7 + $0x1e90] sm:$0xff] }
  0xfd   : > { %5096 = vmatpush1.bf16.xpose.msra.mxu0 %v5095_v30  ;;  %v538_v30 = vld [vmem:[%s6030_s7 + $0x938] sm:$0xff] }
  0xfe   : > { %5098 = vmatprep.subr.bf16.mxu0 %v5097_v32  ;;  %v646_v32 = vld [vmem:[%s6030_s7 + $0xc98] sm:$0xff]  ;;  %v4541_v34 = vpack.c.bf16 %v610_v31, %v538_v30 }
  0xff   : > { %v1258_v27 = vld [vmem:[%s6030_s7 + $0x1fb8] sm:$0xff] }
 0x100   : > { %v1330_v30 = vld [vmem:[%s6030_s7 + $0x21f8] sm:$0xff] }
 0x101   : > { %v1294_v31 = vld [vmem:[%s6030_s7 + $0x20d8] sm:$0xff] }
 0x103   : > { %4524 = vmatpush1.bf16.xpose.msra.mxu1 %v4523_v43  ;;  %v754_v43 = vld [vmem:[%s6030_s7 + $0xff8] sm:$0xff] }
 0x104   : > { %4526 = vmatprep.subr.bf16.mxu1 %v4525_v45  ;;  %v790_v45 = vld [vmem:[%s6030_s7 + $0x1118] sm:$0xff]  ;;  %v4545_v49 = vpack.c.bf16 %v754_v43, %v682_v42  ;;  %v324_v42 = vld [vmem:[%s6030_s7 + $0x288] sm:$0xff] }
 0x105   : > { %5100 = vmatpush1.bf16.xpose.msra.mxu0 %v5099_v44  ;;  %v718_v44 = vld [vmem:[%s6030_s7 + $0xed8] sm:$0xff]  ;;  %v288_v43 = vld [vmem:[%s6030_s7 + $0x168] sm:$0xff] }
 0x106   : > { %5102 = vmatprep.subr.bf16.mxu0 %v5101_v46  ;;  %v4543_v46 = vpack.c.bf16 %v609_v38, %v537_v37  ;;  %v5121_v50 = vpack.c.bf16 %v790_v45, %v718_v44  ;;  %v1329_v37 = vld [vmem:[%s6030_s7 + $0x21f0] sm:$0xff]  ;;  %v360_v44 = vld [vmem:[%s6030_s7 + $0x3a8] sm:$0xff] }
 0x107   : > { %v1293_v38 = vld [vmem:[%s6030_s7 + $0x20d0] sm:$0xff] }
 0x10b   : > { %4528 = vmatpush1.bf16.xpose.msra.mxu1 %v4527_v57  ;;  %v898_v57 = vld [vmem:[%s6030_s7 + $0x1478] sm:$0xff] }
 0x10c   : > { %4530 = vmatprep.subr.bf16.mxu1 %v4529_v60  ;;  %v934_v60 = vld [vmem:[%s6030_s7 + $0x1598] sm:$0xff]  ;;  %v4549_v52 = vpack.c.bf16 %v898_v57, %v826_v56  ;;  %v359_v56 = vld [vmem:[%s6030_s7 + $0x3a0] sm:$0xff]  ;;  %v396_v57 = vld [vmem:[%s6030_s7 + $0x4c8] sm:$0xff] }
 0x10d   : > { %5104 = vmatpush1.bf16.xpose.msra.mxu0 %v5103_v58  ;;  %v862_v58 = vld [vmem:[%s6030_s7 + $0x1358] sm:$0xff] }
 0x10e   : > { %5106 = vmatprep.subr.bf16.mxu0 %v5105_v61  ;;  %v4547_v61 = vpack.c.bf16 %v753_v53, %v681_v51  ;;  %v5125_v0 = vpack.c.bf16 %v934_v60, %v862_v58  ;;  %v6390_v51 = vld [vmem:[%s7607_s0 + $0x58] sm:$0xff]  ;;  %v251_v53 = vld [vmem:[%s6030_s7 + $0x40] sm:$0xff]  ;;  %v468_v58 = vld [vmem:[%s6030_s7 + $0x708] sm:$0xff] }
 0x113   : > { %4532 = vmatpush1.bf16.xpose.msra.mxu1 %v4531_v6  ;;  %v1042_v6 = vld [vmem:[%s6030_s7 + $0x18f8] sm:$0xff] }
 0x114   : > { %4534 = vmatprep.subr.bf16.mxu1 %v4533_v8  ;;  %v1078_v8 = vld [vmem:[%s6030_s7 + $0x1a18] sm:$0xff]  ;;  %v4553_v11 = vpack.c.bf16 %v1042_v6, %v970_v5  ;;  %v395_v6 = vld [vmem:[%s6030_s7 + $0x4c0] sm:$0xff] }
 0x115   : > { %5108 = vmatpush1.bf16.xpose.msra.mxu0 %v5107_v7  ;;  %v1006_v7 = vld [vmem:[%s6030_s7 + $0x17d8] sm:$0xff] }
 0x116   : > { %5110 = vmatprep.subr.bf16.mxu0 %v5109_v9  ;;  %v4551_v9 = vpack.c.bf16 %v897_v2, %v825_v1  ;;  %v5129_v12 = vpack.c.bf16 %v1078_v8, %v1006_v7  ;;  %v5143_v1 = vpack.c.bf16 %v359_v56, %v287_v54  ;;  %v4569_v2 = vpack.c.bf16 %v468_v58, %v396_v57  ;;  %v467_v7 = vld [vmem:[%s6030_s7 + $0x700] sm:$0xff] }
 0x117   : > { %v431_v8 = vld [vmem:[%s6030_s7 + $0x5e0] sm:$0xff] }
 0x118   : > { %v971_v56 = vld [vmem:[%s6030_s7 + $0x16c0] sm:$0xff] }
 0x119   : > { %v1043_v57 = vld [vmem:[%s6030_s7 + $0x1900] sm:$0xff] }
 0x11a   : > { %2003 = vmatmul.mubr.f32.vlgmr.msra.gmra.mrb[0].mxu1 %v6232_v36  ;;  %v574_v36 = vld [vmem:[%s6030_s7 + $0xa58] sm:$0xff]  ;;  %v1007_v58 = vld [vmem:[%s6030_s7 + $0x17e0] sm:$0xff] }
 0x11b   : > { %4536 = vmatpush1.bf16.xpose.msra.mxu1 %v4535_v18  ;;  %2072 = vmatprep.mubr.f32.mxu1 %v1453_v22  ;;  %v5117_v35 = vpack.c.bf16 %v646_v32, %v574_v36  ;;  %v1222_v18 = vld [vmem:[%s6030_s7 + $0x1e98] sm:$0xff] }
 0x11c   : > { %3263 = vmatmul.mubr.f32.vlgmr.msra.gmra.mrb[0].mxu0 %v6238_v39  ;;  %4538 = vmatprep.subr.bf16.mxu1 %v4537_v20  ;;  %v4539_v39 = vpack.c.bf16 %v465_v25, %v393_v24  ;;  %v5131_v20 = vpack.c.bf16 %v1077_v14, %v1005_v59  ;;  %v5133_v22 = vpack.c.bf16 %v1222_v18, %v1150_v28  ;;  %v1185_v24 = vld [vmem:[%s6030_s7 + $0x1d70] sm:$0xff]  ;;  %v1366_v36 = vld [vmem:[%s6030_s7 + $0x2318] sm:$0xff]  ;;  %v539_v14 = vld [vmem:[%s6030_s7 + $0x940] sm:$0xff] }
 0x11d   : > { %5112 = vmatpush1.bf16.xpose.msra.mxu0 %v5111_v19  ;;  %3332 = vmatprep.mubr.f32.mxu0 %v1606_v23  ;;  %v4555_v19 = vpack.c.bf16 %v1041_v13, %v969_v55  ;;  %v1113_v23 = vld [vmem:[%s6030_s7 + $0x1b30] sm:$0xff]  ;;  %v647_v28 = vld [vmem:[%s6030_s7 + $0xca0] sm:$0xff]  ;;  %v684_v18 = vld [vmem:[%s6030_s7 + $0xdc8] sm:$0xff] }
 0x11e   : > { %5114 = vmatprep.subr.bf16.mxu0 %v5113_v21  ;;  %v4557_v21 = vpack.c.bf16 %v1186_v17, %v1114_v15  ;;  %v1149_v25 = vld [vmem:[%s6030_s7 + $0x1c50] sm:$0xff]  ;;  %v4559_v32 = vpack.c.bf16 %v1185_v24, %v1113_v23  ;;  %v611_v15 = vld [vmem:[%s6030_s7 + $0xb80] sm:$0xff] }
 0x11f   : > { %v575_v17 = vld [vmem:[%s6030_s7 + $0xa60] sm:$0xff] }
 0x120   : > { %v5151_v23 = vpack.c.bf16 %v647_v28, %v575_v17  ;;  %v1331_v17 = vld [vmem:[%s6030_s7 + $0x2200] sm:$0xff] }
 0x121   : > { %v1295_v28 = vld [vmem:[%s6030_s7 + $0x20e0] sm:$0xff] }
 0x123   : > { %4540 = vmatpush1.bf16.xpose.msra.mxu1 %v4539_v39  ;;  %v5135_v39 = vpack.c.bf16 %v1221_v26, %v1149_v25  ;;  %v683_v26 = vld [vmem:[%s6030_s7 + $0xdc0] sm:$0xff] }
 0x124   : > { %4542 = vmatprep.subr.bf16.mxu1 %v4541_v34  ;;  %v5137_v34 = vpack.c.bf16 %v1366_v36, %v1294_v31  ;;  %v791_v31 = vld [vmem:[%s6030_s7 + $0x1120] sm:$0xff]  ;;  %v828_v36 = vld [vmem:[%s6030_s7 + $0x1248] sm:$0xff] }
 0x125   : > { %5116 = vmatpush1.bf16.xpose.msra.mxu0 %v5115_v33  ;;  %v4561_v33 = vpack.c.bf16 %v1330_v30, %v1258_v27  ;;  %v755_v27 = vld [vmem:[%s6030_s7 + $0x1000] sm:$0xff] }
 0x126   : > { %5118 = vmatprep.subr.bf16.mxu0 %v5117_v35  ;;  %v1257_v35 = vld [vmem:[%s6030_s7 + $0x1fb0] sm:$0xff]  ;;  %v719_v30 = vld [vmem:[%s6030_s7 + $0xee0] sm:$0xff] }
 0x127   : > { %v4563_v45 = vpack.c.bf16 %v1329_v37, %v1257_v35  ;;  %v5155_v35 = vpack.c.bf16 %v791_v31, %v719_v30  ;;  %v1607_v30 = vcombine.high %v6390_v51, %v6390_v51  ;;  %v253_v31 = vld [vmem:[%s6030_s7 + $0x50] sm:$0xff] }
 0x12b   : > { %4544 = vmatpush1.bf16.xpose.msra.mxu1 %v4543_v46  ;;  %v5139_v46 = vpack.c.bf16 %v1365_v40, %v1293_v38  ;;  %v827_v40 = vld [vmem:[%s6030_s7 + $0x1240] sm:$0xff] }
 0x12c   : > { %4546 = vmatprep.subr.bf16.mxu1 %v4545_v49  ;;  %v5141_v49 = vpack.c.bf16 %v360_v44, %v288_v43  ;;  %v935_v43 = vld [vmem:[%s6030_s7 + $0x15a0] sm:$0xff]  ;;  %v972_v44 = vld [vmem:[%s6030_s7 + $0x16c8] sm:$0xff] }
 0x12d   : > { %5120 = vmatpush1.bf16.xpose.msra.mxu0 %v5119_v48  ;;  %v4565_v48 = vpack.c.bf16 %v324_v42, %v252_v41  ;;  %v899_v41 = vld [vmem:[%s6030_s7 + $0x1480] sm:$0xff] }
 0x12e   : > { %5122 = vmatprep.subr.bf16.mxu0 %v5121_v50  ;;  %v6385_v50 = vld [vmem:[%s7607_s0 + $0x10] sm:$0xff]  ;;  %v863_v42 = vld [vmem:[%s6030_s7 + $0x1360] sm:$0xff] }
 0x12f   : > { %v6400_v60 = vrot.slane %v6385_v50, %v6070_v47 }
 0x131   : > { %v1469_v4 = vcombine.high %v6400_v60, %v6400_v60 }
 0x133   : > { %4548 = vmatpush1.bf16.xpose.msra.mxu1 %v4547_v61  ;;  %v432_v61 = vld [vmem:[%s6030_s7 + $0x5e8] sm:$0xff] }
 0x134   : > { %4550 = vmatprep.subr.bf16.mxu1 %v4549_v52  ;;  %v6406_v52 = vrot.slane %v6390_v51, %v6070_v47  ;;  %v6486_v51 = vrot.slane %v1607_v30, %v6070_v47 }
 0x135   : > { %5124 = vmatpush1.bf16.xpose.msra.mxu0 %v5123_v62  ;;  %v504_v62 = vld [vmem:[%s6030_s7 + $0x828] sm:$0xff] }
 0x136   : > { %5126 = vmatprep.subr.bf16.mxu0 %v5125_v0  ;;  %v4567_v0 = vpack.c.bf16 %v323_v63, %v251_v53  ;;  %v5145_v3 = vpack.c.bf16 %v504_v62, %v432_v61  ;;  %v1622_v5 = vcombine.high %v6406_v52, %v6406_v52  ;;  %v5159_v53 = vpack.c.bf16 %v935_v43, %v863_v42  ;;  %v1079_v61 = vld [vmem:[%s6030_s7 + $0x1a20] sm:$0xff]  ;;  %v1116_v62 = vld [vmem:[%s6030_s7 + $0x1b48] sm:$0xff] }
 0x13b   : > { %4552 = vmatpush1.bf16.xpose.msra.mxu1 %v4551_v9  ;;  %v503_v9 = vld [vmem:[%s6030_s7 + $0x820] sm:$0xff] }
 0x13c   : > { %4554 = vmatprep.subr.bf16.mxu1 %v4553_v11  ;;  %v612_v11 = vld [vmem:[%s6030_s7 + $0xb88] sm:$0xff]  ;;  %v5147_v55 = vpack.c.bf16 %v503_v9, %v431_v8  ;;  %v1187_v8 = vld [vmem:[%s6030_s7 + $0x1d80] sm:$0xff] }
 0x13d   : > { %5128 = vmatpush1.bf16.xpose.msra.mxu0 %v5127_v10  ;;  %v540_v10 = vld [vmem:[%s6030_s7 + $0x948] sm:$0xff]  ;;  %v1151_v9 = vld [vmem:[%s6030_s7 + $0x1c60] sm:$0xff] }
 0x13e   : > { %5130 = vmatprep.subr.bf16.mxu0 %v5129_v12  ;;  %v648_v12 = vld [vmem:[%s6030_s7 + $0xca8] sm:$0xff]  ;;  %v4573_v13 = vpack.c.bf16 %v612_v11, %v540_v10  ;;  %v1223_v10 = vld [vmem:[%s6030_s7 + $0x1ea0] sm:$0xff] }
 0x13f   : > { %v1260_v11 = vld [vmem:[%s6030_s7 + $0x1fc8] sm:$0xff] }
 0x143   : > { %4556 = vmatpush1.bf16.xpose.msra.mxu1 %v4555_v19  ;;  %v756_v19 = vld [vmem:[%s6030_s7 + $0x1008] sm:$0xff] }
 0x144   : > { %4558 = vmatprep.subr.bf16.mxu1 %v4557_v21  ;;  %v792_v21 = vld [vmem:[%s6030_s7 + $0x1128] sm:$0xff]  ;;  %v4577_v24 = vpack.c.bf16 %v756_v19, %v684_v18  ;;  %v1367_v18 = vld [vmem:[%s6030_s7 + $0x2320] sm:$0xff]  ;;  %v254_v19 = vld [vmem:[%s6030_s7 + $0x58] sm:$0xff] }
 0x145   : > { %5132 = vmatpush1.bf16.xpose.msra.mxu0 %v5131_v20  ;;  %v720_v20 = vld [vmem:[%s6030_s7 + $0xee8] sm:$0xff] }
 0x146   : > { %5134 = vmatprep.subr.bf16.mxu0 %v5133_v22  ;;  %v4575_v22 = vpack.c.bf16 %v611_v15, %v539_v14  ;;  %v5153_v25 = vpack.c.bf16 %v792_v21, %v720_v20  ;;  %v1259_v15 = vld [vmem:[%s6030_s7 + $0x1fc0] sm:$0xff]  ;;  %v326_v20 = vld [vmem:[%s6030_s7 + $0x298] sm:$0xff] }
 0x147   : > { %v290_v21 = vld [vmem:[%s6030_s7 + $0x178] sm:$0xff] }
 0x14b   : > { %4560 = vmatpush1.bf16.xpose.msra.mxu1 %v4559_v32  ;;  %v900_v32 = vld [vmem:[%s6030_s7 + $0x1488] sm:$0xff] }
 0x14c   : > { %4562 = vmatprep.subr.bf16.mxu1 %v4561_v33  ;;  %v936_v33 = vld [vmem:[%s6030_s7 + $0x15a8] sm:$0xff]  ;;  %v4581_v37 = vpack.c.bf16 %v900_v32, %v828_v36  ;;  %v325_v36 = vld [vmem:[%s6030_s7 + $0x290] sm:$0xff] }
 0x14d   : > { %5136 = vmatpush1.bf16.xpose.msra.mxu0 %v5135_v39  ;;  %v864_v39 = vld [vmem:[%s6030_s7 + $0x1368] sm:$0xff]  ;;  %v289_v32 = vld [vmem:[%s6030_s7 + $0x170] sm:$0xff] }
 0x14e   : > { %5138 = vmatprep.subr.bf16.mxu0 %v5137_v34  ;;  %v4579_v34 = vpack.c.bf16 %v755_v27, %v683_v26  ;;  %v5157_v38 = vpack.c.bf16 %v936_v33, %v864_v39  ;;  %v1454_v27 = vcombine.high %v6385_v50, %v6385_v50  ;;  %v361_v39 = vld [vmem:[%s6030_s7 + $0x3b0] sm:$0xff]  ;;  %v398_v33 = vld [vmem:[%s6030_s7 + $0x4d8] sm:$0xff] }
 0x14f   : > { %v506_v50 = vld [vmem:[%s6030_s7 + $0x838] sm:$0xff] }
 0x153   : > { %4564 = vmatpush1.bf16.xpose.msra.mxu1 %v4563_v45  ;;  %v1044_v45 = vld [vmem:[%s6030_s7 + $0x1908] sm:$0xff] }
 0x154   : > { %4566 = vmatprep.subr.bf16.mxu1 %v4565_v48  ;;  %v1080_v48 = vld [vmem:[%s6030_s7 + $0x1a28] sm:$0xff]  ;;  %v4585_v63 = vpack.c.bf16 %v1044_v45, %v972_v44  ;;  %v1623_v44 = vcombine.high %v6486_v51, %v6486_v51  ;;  %v397_v45 = vld [vmem:[%s6030_s7 + $0x4d0] sm:$0xff] }
 0x155   : > { %5140 = vmatpush1.bf16.xpose.msra.mxu0 %v5139_v46  ;;  %v1008_v46 = vld [vmem:[%s6030_s7 + $0x17e8] sm:$0xff] }
 0x156   : > { %5142 = vmatprep.subr.bf16.mxu0 %v5141_v49  ;;  %v4583_v49 = vpack.c.bf16 %v899_v41, %v827_v40  ;;  %v5161_v54 = vpack.c.bf16 %v1080_v48, %v1008_v46  ;;  %v5175_v40 = vpack.c.bf16 %v361_v39, %v289_v32  ;;  %v469_v46 = vld [vmem:[%s6030_s7 + $0x710] sm:$0xff] }
 0x157   : > { %v433_v48 = vld [vmem:[%s6030_s7 + $0x5f0] sm:$0xff] }
 0x158   : > { %v1045_v32 = vld [vmem:[%s6030_s7 + $0x1910] sm:$0xff] }
 0x159   : > { %v1009_v39 = vld [vmem:[%s6030_s7 + $0x17f0] sm:$0xff] }
 0x15a   : > { %2073 = vmatmul.mubr.f32.vlgmr.msra.gmra.mrb[0].mxu1 %v6313_v16  ;;  %v576_v16 = vld [vmem:[%s6030_s7 + $0xa68] sm:$0xff] }
 0x15b   : > { %4568 = vmatpush1.bf16.xpose.msra.mxu1 %v4567_v0  ;;  %2142 = vmatprep.mubr.f32.mxu1 %v1469_v4  ;;  %v5149_v59 = vpack.c.bf16 %v648_v12, %v576_v16  ;;  %v1188_v0 = vld [vmem:[%s6030_s7 + $0x1d88] sm:$0xff]  ;;  %v5163_v4 = vpack.c.bf16 %v1079_v61, %v1007_v58  ;;  %v541_v61 = vld [vmem:[%s6030_s7 + $0x950] sm:$0xff] }
 0x15c   : > { %3333 = vmatmul.mubr.f32.vlgmr.msra.gmra.mrb[0].mxu0 %v6318_v29  ;;  %4570 = vmatprep.subr.bf16.mxu1 %v4569_v2  ;;  %v4571_v29 = vpack.c.bf16 %v467_v7, %v395_v6  ;;  %v1224_v2 = vld [vmem:[%s6030_s7 + $0x1ea8] sm:$0xff]  ;;  %v1115_v7 = vld [vmem:[%s6030_s7 + $0x1b40] sm:$0xff] }
 0x15d   : > { %5144 = vmatpush1.bf16.xpose.msra.mxu0 %v5143_v1  ;;  %3402 = vmatprep.mubr.f32.mxu0 %v1622_v5  ;;  %v1152_v1 = vld [vmem:[%s6030_s7 + $0x1c68] sm:$0xff]  ;;  %v4589_v5 = vpack.c.bf16 %v1188_v0, %v1116_v62  ;;  %v613_v62 = vld [vmem:[%s6030_s7 + $0xb90] sm:$0xff] }
 0x15e   : > { %5146 = vmatprep.subr.bf16.mxu0 %v5145_v3  ;;  %v4587_v3 = vpack.c.bf16 %v1043_v57, %v971_v56  ;;  %v5165_v6 = vpack.c.bf16 %v1224_v2, %v1152_v1  ;;  %v1332_v16 = vld [vmem:[%s6030_s7 + $0x2208] sm:$0xff]  ;;  %v577_v0 = vld [vmem:[%s6030_s7 + $0xa70] sm:$0xff]  ;;  %v686_v2 = vld [vmem:[%s6030_s7 + $0xdd8] sm:$0xff] }
 0x15f   : > { %v1296_v12 = vld [vmem:[%s6030_s7 + $0x20e8] sm:$0xff]  ;;  %v649_v1 = vld [vmem:[%s6030_s7 + $0xcb0] sm:$0xff] }
 0x163   : > { %4572 = vmatpush1.bf16.xpose.msra.mxu1 %v4571_v29  ;;  %v1368_v29 = vld [vmem:[%s6030_s7 + $0x2328] sm:$0xff] }
 0x164   : > { %4574 = vmatprep.subr.bf16.mxu1 %v4573_v13  ;;  %v5167_v13 = vpack.c.bf16 %v1223_v10, %v1151_v9  ;;  %v5169_v14 = vpack.c.bf16 %v1368_v29, %v1296_v12  ;;  %v685_v10 = vld [vmem:[%s6030_s7 + $0xdd0] sm:$0xff]  ;;  %v830_v29 = vld [vmem:[%s6030_s7 + $0x1258] sm:$0xff] }
 0x165   : > { %5148 = vmatpush1.bf16.xpose.msra.mxu0 %v5147_v55  ;;  %v4591_v55 = vpack.c.bf16 %v1187_v8, %v1115_v7  ;;  %v5183_v7 = vpack.c.bf16 %v649_v1, %v577_v0  ;;  %v793_v12 = vld [vmem:[%s6030_s7 + $0x1130] sm:$0xff]  ;;  %v256_v1 = vld [vmem:[%s6030_s7 + $0x68] sm:$0xff] }
 0x166   : > { %5150 = vmatprep.subr.bf16.mxu0 %v5149_v59  ;;  %v4593_v59 = vpack.c.bf16 %v1332_v16, %v1260_v11  ;;  %v757_v11 = vld [vmem:[%s6030_s7 + $0x1010] sm:$0xff] }
 0x167   : > { %v721_v16 = vld [vmem:[%s6030_s7 + $0xef0] sm:$0xff] }
 0x168   : > { %v1369_v0 = vld [vmem:[%s6030_s7 + $0x2330] sm:$0xff] }
 0x16b   : > { %4576 = vmatpush1.bf16.xpose.msra.mxu1 %v4575_v22  ;;  %v362_v22 = vld [vmem:[%s6030_s7 + $0x3b8] sm:$0xff] }
 0x16c   : > { %4578 = vmatprep.subr.bf16.mxu1 %v4577_v24  ;;  %v5171_v24 = vpack.c.bf16 %v1367_v18, %v1295_v28  ;;  %v5173_v26 = vpack.c.bf16 %v362_v22, %v290_v21  ;;  %v829_v18 = vld [vmem:[%s6030_s7 + $0x1250] sm:$0xff]  ;;  %v974_v22 = vld [vmem:[%s6030_s7 + $0x16d8] sm:$0xff] }
 0x16d   : > { %5152 = vmatpush1.bf16.xpose.msra.mxu0 %v5151_v23  ;;  %v4595_v23 = vpack.c.bf16 %v1331_v17, %v1259_v15  ;;  %v5187_v15 = vpack.c.bf16 %v793_v12, %v721_v16  ;;  %v937_v21 = vld [vmem:[%s6030_s7 + $0x15b0] sm:$0xff]  ;;  %v327_v16 = vld [vmem:[%s6030_s7 + $0x2a0] sm:$0xff] }
 0x16e   : > { %5154 = vmatprep.subr.bf16.mxu0 %v5153_v25  ;;  %v4597_v25 = vpack.c.bf16 %v326_v20, %v254_v19  ;;  %v901_v19 = vld [vmem:[%s6030_s7 + $0x1490] sm:$0xff]  ;;  %v291_v12 = vld [vmem:[%s6030_s7 + $0x180] sm:$0xff] }
 0x16f   : > { %v865_v20 = vld [vmem:[%s6030_s7 + $0x1370] sm:$0xff] }
 0x173   : > { %4580 = vmatpush1.bf16.xpose.msra.mxu1 %v4579_v34  ;;  %v470_v34 = vld [vmem:[%s6030_s7 + $0x718] sm:$0xff] }
 0x174   : > { %4582 = vmatprep.subr.bf16.mxu1 %v4581_v37  ;;  %v434_v37 = vld [vmem:[%s6030_s7 + $0x5f8] sm:$0xff]  ;;  %v4601_v41 = vpack.c.bf16 %v470_v34, %v398_v33  ;;  %v1081_v33 = vld [vmem:[%s6030_s7 + $0x1a30] sm:$0xff] }
 0x175   : > { %5156 = vmatpush1.bf16.xpose.msra.mxu0 %v5155_v35  ;;  %v6481_v35 = vrot.slane %v1454_v27, %v6070_v47  ;;  %v5177_v42 = vpack.c.bf16 %v506_v50, %v434_v37  ;;  %v5191_v27 = vpack.c.bf16 %v937_v21, %v865_v20  ;;  %v1118_v34 = vld [vmem:[%s6030_s7 + $0x1b58] sm:$0xff] }
 0x176   : > { %5158 = vmatprep.subr.bf16.mxu0 %v5157_v38  ;;  %v4599_v38 = vpack.c.bf16 %v325_v36, %v253_v31  ;;  %v973_v36 = vld [vmem:[%s6030_s7 + $0x16d0] sm:$0xff]  ;;  %v1190_v37 = vld [vmem:[%s6030_s7 + $0x1d98] sm:$0xff] }
 0x177   : > { %v1470_v43 = vcombine.high %v6481_v35, %v6481_v35  ;;  %v1154_v50 = vld [vmem:[%s6030_s7 + $0x1c78] sm:$0xff] }
 0x17b   : > { %4584 = vmatpush1.bf16.xpose.msra.mxu1 %v4583_v49  ;;  %v505_v49 = vld [vmem:[%s6030_s7 + $0x830] sm:$0xff] }
 0x17c   : > { %4586 = vmatprep.subr.bf16.mxu1 %v4585_v63  ;;  %v614_v63 = vld [vmem:[%s6030_s7 + $0xb98] sm:$0xff]  ;;  %v5179_v56 = vpack.c.bf16 %v505_v49, %v433_v48  ;;  %v1225_v48 = vld [vmem:[%s6030_s7 + $0x1eb0] sm:$0xff] }
 0x17d   : > { %5160 = vmatpush1.bf16.xpose.msra.mxu0 %v5159_v53  ;;  %v542_v53 = vld [vmem:[%s6030_s7 + $0x958] sm:$0xff] }
 0x17e   : > { %5162 = vmatprep.subr.bf16.mxu0 %v5161_v54  ;;  %v650_v54 = vld [vmem:[%s6030_s7 + $0xcb8] sm:$0xff]  ;;  %v4605_v57 = vpack.c.bf16 %v614_v63, %v542_v53 }
 0x17f   : > { %v1262_v49 = vld [vmem:[%s6030_s7 + $0x1fd8] sm:$0xff] }
 0x180   : > { %v1334_v53 = vld [vmem:[%s6030_s7 + $0x2218] sm:$0xff] }
 0x181   : > { %v1298_v63 = vld [vmem:[%s6030_s7 + $0x20f8] sm:$0xff] }
 0x183   : > { %4588 = vmatpush1.bf16.xpose.msra.mxu1 %v4587_v3  ;;  %v758_v3 = vld [vmem:[%s6030_s7 + $0x1018] sm:$0xff] }
 0x184   : > { %4590 = vmatprep.subr.bf16.mxu1 %v4589_v5  ;;  %v794_v5 = vld [vmem:[%s6030_s7 + $0x1138] sm:$0xff]  ;;  %v4609_v8 = vpack.c.bf16 %v758_v3, %v686_v2  ;;  %v328_v2 = vld [vmem:[%s6030_s7 + $0x2a8] sm:$0xff] }
 0x185   : > { %5164 = vmatpush1.bf16.xpose.msra.mxu0 %v5163_v4  ;;  %v722_v4 = vld [vmem:[%s6030_s7 + $0xef8] sm:$0xff]  ;;  %v292_v3 = vld [vmem:[%s6030_s7 + $0x188] sm:$0xff] }
 0x186   : > { %5166 = vmatprep.subr.bf16.mxu0 %v5165_v6  ;;  %v4607_v6 = vpack.c.bf16 %v613_v62, %v541_v61  ;;  %v5185_v9 = vpack.c.bf16 %v794_v5, %v722_v4  ;;  %v1333_v61 = vld [vmem:[%s6030_s7 + $0x2210] sm:$0xff]  ;;  %v364_v4 = vld [vmem:[%s6030_s7 + $0x3c8] sm:$0xff] }
 0x187   : > { %v1297_v62 = vld [vmem:[%s6030_s7 + $0x20f0] sm:$0xff] }
 0x18b   : > { %4592 = vmatpush1.bf16.xpose.msra.mxu1 %v4591_v55  ;;  %v902_v55 = vld [vmem:[%s6030_s7 + $0x1498] sm:$0xff] }
 0x18c   : > { %4594 = vmatprep.subr.bf16.mxu1 %v4593_v59  ;;  %v938_v59 = vld [vmem:[%s6030_s7 + $0x15b8] sm:$0xff]  ;;  %v4613_v17 = vpack.c.bf16 %v902_v55, %v830_v29  ;;  %v363_v29 = vld [vmem:[%s6030_s7 + $0x3c0] sm:$0xff]  ;;  %v400_v55 = vld [vmem:[%s6030_s7 + $0x4e8] sm:$0xff] }
 0x18d   : > { %5168 = vmatpush1.bf16.xpose.msra.mxu0 %v5167_v13  ;;  %v866_v13 = vld [vmem:[%s6030_s7 + $0x1378] sm:$0xff] }
 0x18e   : > { %5170 = vmatprep.subr.bf16.mxu0 %v5169_v14  ;;  %v4611_v14 = vpack.c.bf16 %v757_v11, %v685_v10  ;;  %v5189_v28 = vpack.c.bf16 %v938_v59, %v866_v13  ;;  %v6558_v10 = vld [vmem:[%s7607_s0 + $0x60] sm:$0xff]  ;;  %v472_v13 = vld [vmem:[%s6030_s7 + $0x728] sm:$0xff] }
 0x18f   : > { %v255_v11 = vld [vmem:[%s6030_s7 + $0x60] sm:$0xff] }
 0x193   : > { %4596 = vmatpush1.bf16.xpose.msra.mxu1 %v4595_v23  ;;  %v1046_v23 = vld [vmem:[%s6030_s7 + $0x1918] sm:$0xff] }
 0x194   : > { %4598 = vmatprep.subr.bf16.mxu1 %v4597_v25  ;;  %v1082_v25 = vld [vmem:[%s6030_s7 + $0x1a38] sm:$0xff]  ;;  %v4617_v30 = vpack.c.bf16 %v1046_v23, %v974_v22  ;;  %v399_v23 = vld [vmem:[%s6030_s7 + $0x4e0] sm:$0xff] }
 0x195   : > { %5172 = vmatpush1.bf16.xpose.msra.mxu0 %v5171_v24  ;;  %v1010_v24 = vld [vmem:[%s6030_s7 + $0x17f8] sm:$0xff] }
 0x196   : > { %5174 = vmatprep.subr.bf16.mxu0 %v5173_v26  ;;  %v4615_v26 = vpack.c.bf16 %v901_v19, %v829_v18  ;;  %v5193_v31 = vpack.c.bf16 %v1082_v25, %v1010_v24  ;;  %v5207_v18 = vpack.c.bf16 %v363_v29, %v291_v12  ;;  %v4633_v19 = vpack.c.bf16 %v472_v13, %v400_v55  ;;  %v471_v24 = vld [vmem:[%s6030_s7 + $0x720] sm:$0xff] }
 0x197   : > { %v435_v25 = vld [vmem:[%s6030_s7 + $0x600] sm:$0xff] }
 0x198   : > { %v975_v29 = vld [vmem:[%s6030_s7 + $0x16e0] sm:$0xff] }
 0x199   : > { %v1047_v55 = vld [vmem:[%s6030_s7 + $0x1920] sm:$0xff] }
 0x19a   : > { %2143 = vmatmul.mubr.f32.vlgmr.msra.gmra.mrb[0].mxu1 %v6400_v60  ;;  %v578_v60 = vld [vmem:[%s6030_s7 + $0xa78] sm:$0xff]  ;;  %v1011_v13 = vld [vmem:[%s6030_s7 + $0x1800] sm:$0xff] }
 0x19b   : > { %4600 = vmatpush1.bf16.xpose.msra.mxu1 %v4599_v38  ;;  %2212 = vmatprep.mubr.f32.mxu1 %v1470_v43  ;;  %v5181_v58 = vpack.c.bf16 %v650_v54, %v578_v60  ;;  %v1226_v38 = vld [vmem:[%s6030_s7 + $0x1eb8] sm:$0xff] }
 0x19c   : > { %3403 = vmatmul.mubr.f32.vlgmr.msra.gmra.mrb[0].mxu0 %v6406_v52  ;;  %4602 = vmatprep.subr.bf16.mxu1 %v4601_v41  ;;  %v4603_v52 = vpack.c.bf16 %v469_v46, %v397_v45  ;;  %v5195_v41 = vpack.c.bf16 %v1081_v33, %v1009_v39  ;;  %v5197_v43 = vpack.c.bf16 %v1226_v38, %v1154_v50  ;;  %v1189_v45 = vld [vmem:[%s6030_s7 + $0x1d90] sm:$0xff]  ;;  %v1370_v60 = vld [vmem:[%s6030_s7 + $0x2338] sm:$0xff]  ;;  %v543_v33 = vld [vmem:[%s6030_s7 + $0x960] sm:$0xff] }
 0x19d   : > { %5176 = vmatpush1.bf16.xpose.msra.mxu0 %v5175_v40  ;;  %3472 = vmatprep.mubr.f32.mxu0 %v1623_v44  ;;  %v4619_v40 = vpack.c.bf16 %v1045_v32, %v973_v36  ;;  %v1117_v44 = vld [vmem:[%s6030_s7 + $0x1b50] sm:$0xff]  ;;  %v651_v50 = vld [vmem:[%s6030_s7 + $0xcc0] sm:$0xff]  ;;  %v688_v38 = vld [vmem:[%s6030_s7 + $0xde8] sm:$0xff] }
 0x19e   : > { %5178 = vmatprep.subr.bf16.mxu0 %v5177_v42  ;;  %v4621_v42 = vpack.c.bf16 %v1190_v37, %v1118_v34  ;;  %v1153_v46 = vld [vmem:[%s6030_s7 + $0x1c70] sm:$0xff]  ;;  %v4623_v54 = vpack.c.bf16 %v1189_v45, %v1117_v44  ;;  %v615_v34 = vld [vmem:[%s6030_s7 + $0xba0] sm:$0xff] }
 0x19f   : > { %v579_v37 = vld [vmem:[%s6030_s7 + $0xa80] sm:$0xff] }
 0x1a0   : > { %v5215_v44 = vpack.c.bf16 %v651_v50, %v579_v37  ;;  %v1335_v37 = vld [vmem:[%s6030_s7 + $0x2220] sm:$0xff] }
 0x1a1   : > { %v1299_v50 = vld [vmem:[%s6030_s7 + $0x2100] sm:$0xff] }
 0x1a3   : > { %4604 = vmatpush1.bf16.xpose.msra.mxu1 %v4603_v52  ;;  %v5199_v52 = vpack.c.bf16 %v1225_v48, %v1153_v46  ;;  %v687_v48 = vld [vmem:[%s6030_s7 + $0xde0] sm:$0xff] }
 0x1a4   : > { %4606 = vmatprep.subr.bf16.mxu1 %v4605_v57  ;;  %v5201_v57 = vpack.c.bf16 %v1370_v60, %v1298_v63  ;;  %v795_v63 = vld [vmem:[%s6030_s7 + $0x1140] sm:$0xff]  ;;  %v832_v60 = vld [vmem:[%s6030_s7 + $0x1268] sm:$0xff] }
 0x1a5   : > { %5180 = vmatpush1.bf16.xpose.msra.mxu0 %v5179_v56  ;;  %v4625_v56 = vpack.c.bf16 %v1334_v53, %v1262_v49  ;;  %v759_v49 = vld [vmem:[%s6030_s7 + $0x1020] sm:$0xff] }
 0x1a6   : > { %5182 = vmatprep.subr.bf16.mxu0 %v5181_v58  ;;  %v1261_v58 = vld [vmem:[%s6030_s7 + $0x1fd0] sm:$0xff]  ;;  %v723_v53 = vld [vmem:[%s6030_s7 + $0xf00] sm:$0xff] }
 0x1a7   : > { %v4627_v5 = vpack.c.bf16 %v1333_v61, %v1261_v58  ;;  %v5219_v58 = vpack.c.bf16 %v795_v63, %v723_v53  ;;  %v1624_v53 = vcombine.high %v6558_v10, %v6558_v10  ;;  %v257_v63 = vld [vmem:[%s6030_s7 + $0x70] sm:$0xff] }
 0x1ab   : > { %4608 = vmatpush1.bf16.xpose.msra.mxu1 %v4607_v6  ;;  %v5203_v6 = vpack.c.bf16 %v1369_v0, %v1297_v62  ;;  %v831_v0 = vld [vmem:[%s6030_s7 + $0x1260] sm:$0xff] }
 0x1ac   : > { %4610 = vmatprep.subr.bf16.mxu1 %v4609_v8  ;;  %v5205_v8 = vpack.c.bf16 %v364_v4, %v292_v3  ;;  %v939_v3 = vld [vmem:[%s6030_s7 + $0x15c0] sm:$0xff]  ;;  %v976_v4 = vld [vmem:[%s6030_s7 + $0x16e8] sm:$0xff] }
 0x1ad   : > { %5184 = vmatpush1.bf16.xpose.msra.mxu0 %v5183_v7  ;;  %v4629_v7 = vpack.c.bf16 %v328_v2, %v256_v1  ;;  %v903_v1 = vld [vmem:[%s6030_s7 + $0x14a0] sm:$0xff] }
 0x1ae   : > { %5186 = vmatprep.subr.bf16.mxu0 %v5185_v9  ;;  %v6553_v9 = vld [vmem:[%s7607_s0 + $0x18] sm:$0xff]  ;;  %v867_v2 = vld [vmem:[%s6030_s7 + $0x1380] sm:$0xff] }
 0x1af   : > { %v6568_v59 = vrot.slane %v6553_v9, %v6070_v47 }
 0x1b1   : > { %v1486_v21 = vcombine.high %v6568_v59, %v6568_v59 }
 0x1b3   : > { %4612 = vmatpush1.bf16.xpose.msra.mxu1 %v4611_v14  ;;  %v436_v14 = vld [vmem:[%s6030_s7 + $0x608] sm:$0xff] }
 0x1b4   : > { %4614 = vmatprep.subr.bf16.mxu1 %v4613_v17  ;;  %v6574_v17 = vrot.slane %v6558_v10, %v6070_v47  ;;  %v6654_v10 = vrot.slane %v1624_v53, %v6070_v47 }
 0x1b5   : > { %5188 = vmatpush1.bf16.xpose.msra.mxu0 %v5187_v15  ;;  %v508_v15 = vld [vmem:[%s6030_s7 + $0x848] sm:$0xff] }
 0x1b6   : > { %5190 = vmatprep.subr.bf16.mxu0 %v5189_v28  ;;  %v4631_v28 = vpack.c.bf16 %v327_v16, %v255_v11  ;;  %v5209_v20 = vpack.c.bf16 %v508_v15, %v436_v14  ;;  %v1639_v22 = vcombine.high %v6574_v17, %v6574_v17  ;;  %v5223_v11 = vpack.c.bf16 %v939_v3, %v867_v2  ;;  %v1083_v14 = vld [vmem:[%s6030_s7 + $0x1a40] sm:$0xff]  ;;  %v1120_v15 = vld [vmem:[%s6030_s7 + $0x1b68] sm:$0xff] }
 0x1bb   : > { %4616 = vmatpush1.bf16.xpose.msra.mxu1 %v4615_v26  ;;  %v507_v26 = vld [vmem:[%s6030_s7 + $0x840] sm:$0xff] }
 0x1bc   : > { %4618 = vmatprep.subr.bf16.mxu1 %v4617_v30  ;;  %v616_v30 = vld [vmem:[%s6030_s7 + $0xba8] sm:$0xff]  ;;  %v5211_v36 = vpack.c.bf16 %v507_v26, %v435_v25  ;;  %v1191_v25 = vld [vmem:[%s6030_s7 + $0x1da0] sm:$0xff] }
 0x1bd   : > { %5192 = vmatpush1.bf16.xpose.msra.mxu0 %v5191_v27  ;;  %v544_v27 = vld [vmem:[%s6030_s7 + $0x968] sm:$0xff]  ;;  %v1155_v26 = vld [vmem:[%s6030_s7 + $0x1c80] sm:$0xff] }
 0x1be   : > { %5194 = vmatprep.subr.bf16.mxu0 %v5193_v31  ;;  %v652_v31 = vld [vmem:[%s6030_s7 + $0xcc8] sm:$0xff]  ;;  %v4637_v32 = vpack.c.bf16 %v616_v30, %v544_v27  ;;  %v1227_v27 = vld [vmem:[%s6030_s7 + $0x1ec0] sm:$0xff] }
 0x1bf   : > { %v1264_v30 = vld [vmem:[%s6030_s7 + $0x1fe8] sm:$0xff] }
 0x1c3   : > { %4620 = vmatpush1.bf16.xpose.msra.mxu1 %v4619_v40  ;;  %v760_v40 = vld [vmem:[%s6030_s7 + $0x1028] sm:$0xff] }
 0x1c4   : > { %4622 = vmatprep.subr.bf16.mxu1 %v4621_v42  ;;  %v796_v42 = vld [vmem:[%s6030_s7 + $0x1148] sm:$0xff]  ;;  %v4641_v45 = vpack.c.bf16 %v760_v40, %v688_v38  ;;  %v1371_v38 = vld [vmem:[%s6030_s7 + $0x2340] sm:$0xff]  ;;  %v258_v40 = vld [vmem:[%s6030_s7 + $0x78] sm:$0xff] }
 0x1c5   : > { %5196 = vmatpush1.bf16.xpose.msra.mxu0 %v5195_v41  ;;  %v724_v41 = vld [vmem:[%s6030_s7 + $0xf08] sm:$0xff] }
 0x1c6   : > { %5198 = vmatprep.subr.bf16.mxu0 %v5197_v43  ;;  %v4639_v43 = vpack.c.bf16 %v615_v34, %v543_v33  ;;  %v5217_v46 = vpack.c.bf16 %v796_v42, %v724_v41  ;;  %v1263_v34 = vld [vmem:[%s6030_s7 + $0x1fe0] sm:$0xff]  ;;  %v330_v41 = vld [vmem:[%s6030_s7 + $0x2b8] sm:$0xff] }
 0x1c7   : > { %v294_v42 = vld [vmem:[%s6030_s7 + $0x198] sm:$0xff] }
 0x1cb   : > { %4624 = vmatpush1.bf16.xpose.msra.mxu1 %v4623_v54  ;;  %v904_v54 = vld [vmem:[%s6030_s7 + $0x14a8] sm:$0xff] }
 0x1cc   : > { %4626 = vmatprep.subr.bf16.mxu1 %v4625_v56  ;;  %v940_v56 = vld [vmem:[%s6030_s7 + $0x15c8] sm:$0xff]  ;;  %v4645_v61 = vpack.c.bf16 %v904_v54, %v832_v60  ;;  %v329_v60 = vld [vmem:[%s6030_s7 + $0x2b0] sm:$0xff] }
 0x1cd   : > { %5200 = vmatpush1.bf16.xpose.msra.mxu0 %v5199_v52  ;;  %v868_v52 = vld [vmem:[%s6030_s7 + $0x1388] sm:$0xff]  ;;  %v293_v54 = vld [vmem:[%s6030_s7 + $0x190] sm:$0xff] }
 0x1ce   : > { %5202 = vmatprep.subr.bf16.mxu0 %v5201_v57  ;;  %v4643_v57 = vpack.c.bf16 %v759_v49, %v687_v48  ;;  %v5221_v62 = vpack.c.bf16 %v940_v56, %v868_v52  ;;  %v1471_v49 = vcombine.high %v6553_v9, %v6553_v9  ;;  %v365_v52 = vld [vmem:[%s6030_s7 + $0x3d0] sm:$0xff]  ;;  %v402_v56 = vld [vmem:[%s6030_s7 + $0x4f8] sm:$0xff] }
 0x1cf   : > { %v510_v9 = vld [vmem:[%s6030_s7 + $0x858] sm:$0xff] }
 0x1d3   : > { %4628 = vmatpush1.bf16.xpose.msra.mxu1 %v4627_v5  ;;  %v1048_v5 = vld [vmem:[%s6030_s7 + $0x1928] sm:$0xff] }
 0x1d4   : > { %4630 = vmatprep.subr.bf16.mxu1 %v4629_v7  ;;  %v1084_v7 = vld [vmem:[%s6030_s7 + $0x1a48] sm:$0xff]  ;;  %v4649_v16 = vpack.c.bf16 %v1048_v5, %v976_v4  ;;  %v1640_v4 = vcombine.high %v6654_v10, %v6654_v10  ;;  %v401_v5 = vld [vmem:[%s6030_s7 + $0x4f0] sm:$0xff] }
 0x1d5   : > { %5204 = vmatpush1.bf16.xpose.msra.mxu0 %v5203_v6  ;;  %v1012_v6 = vld [vmem:[%s6030_s7 + $0x1808] sm:$0xff] }
 0x1d6   : > { %5206 = vmatprep.subr.bf16.mxu0 %v5205_v8  ;;  %v4647_v8 = vpack.c.bf16 %v903_v1, %v831_v0  ;;  %v5225_v12 = vpack.c.bf16 %v1084_v7, %v1012_v6  ;;  %v5239_v0 = vpack.c.bf16 %v365_v52, %v293_v54  ;;  %v473_v6 = vld [vmem:[%s6030_s7 + $0x730] sm:$0xff] }
 0x1d7   : > { %v437_v7 = vld [vmem:[%s6030_s7 + $0x610] sm:$0xff] }
 0x1d8   : > { %v1049_v54 = vld [vmem:[%s6030_s7 + $0x1930] sm:$0xff] }
 0x1d9   : > { %v1013_v52 = vld [vmem:[%s6030_s7 + $0x1810] sm:$0xff] }
 0x1da   : > { %2213 = vmatmul.mubr.f32.vlgmr.msra.gmra.mrb[0].mxu1 %v6481_v35  ;;  %v580_v35 = vld [vmem:[%s6030_s7 + $0xa88] sm:$0xff] }
 0x1db   : > { %4632 = vmatpush1.bf16.xpose.msra.mxu1 %v4631_v28  ;;  %2282 = vmatprep.mubr.f32.mxu1 %v1486_v21  ;;  %v5213_v39 = vpack.c.bf16 %v652_v31, %v580_v35  ;;  %v1192_v28 = vld [vmem:[%s6030_s7 + $0x1da8] sm:$0xff]  ;;  %v5227_v21 = vpack.c.bf16 %v1083_v14, %v1011_v13  ;;  %v545_v14 = vld [vmem:[%s6030_s7 + $0x970] sm:$0xff] }
 0x1dc   : > { %3473 = vmatmul.mubr.f32.vlgmr.msra.gmra.mrb[0].mxu0 %v6486_v51  ;;  %4634 = vmatprep.subr.bf16.mxu1 %v4633_v19  ;;  %v4635_v51 = vpack.c.bf16 %v471_v24, %v399_v23  ;;  %v1228_v19 = vld [vmem:[%s6030_s7 + $0x1ec8] sm:$0xff]  ;;  %v1119_v24 = vld [vmem:[%s6030_s7 + $0x1b60] sm:$0xff] }
 0x1dd   : > { %5208 = vmatpush1.bf16.xpose.msra.mxu0 %v5207_v18  ;;  %3542 = vmatprep.mubr.f32.mxu0 %v1639_v22  ;;  %v1156_v18 = vld [vmem:[%s6030_s7 + $0x1c88] sm:$0xff]  ;;  %v4653_v22 = vpack.c.bf16 %v1192_v28, %v1120_v15  ;;  %v617_v15 = vld [vmem:[%s6030_s7 + $0xbb0] sm:$0xff] }
 0x1de   : > { %5210 = vmatprep.subr.bf16.mxu0 %v5209_v20  ;;  %v4651_v20 = vpack.c.bf16 %v1047_v55, %v975_v29  ;;  %v5229_v23 = vpack.c.bf16 %v1228_v19, %v1156_v18  ;;  %v1336_v35 = vld [vmem:[%s6030_s7 + $0x2228] sm:$0xff]  ;;  %v581_v28 = vld [vmem:[%s6030_s7 + $0xa90] sm:$0xff]  ;;  %v690_v19 = vld [vmem:[%s6030_s7 + $0xdf8] sm:$0xff] }
 0x1df   : > { %v1300_v31 = vld [vmem:[%s6030_s7 + $0x2108] sm:$0xff]  ;;  %v653_v18 = vld [vmem:[%s6030_s7 + $0xcd0] sm:$0xff] }
 0x1e3   : > { %4636 = vmatpush1.bf16.xpose.msra.mxu1 %v4635_v51  ;;  %v1372_v51 = vld [vmem:[%s6030_s7 + $0x2348] sm:$0xff] }
 0x1e4   : > { %4638 = vmatprep.subr.bf16.mxu1 %v4637_v32  ;;  %v5231_v32 = vpack.c.bf16 %v1227_v27, %v1155_v26  ;;  %v5233_v33 = vpack.c.bf16 %v1372_v51, %v1300_v31  ;;  %v689_v27 = vld [vmem:[%s6030_s7 + $0xdf0] sm:$0xff]  ;;  %v834_v51 = vld [vmem:[%s6030_s7 + $0x1278] sm:$0xff] }
 0x1e5   : > { %5212 = vmatpush1.bf16.xpose.msra.mxu0 %v5211_v36  ;;  %v4655_v36 = vpack.c.bf16 %v1191_v25, %v1119_v24  ;;  %v5247_v24 = vpack.c.bf16 %v653_v18, %v581_v28  ;;  %v797_v31 = vld [vmem:[%s6030_s7 + $0x1150] sm:$0xff]  ;;  %v260_v18 = vld [vmem:[%s6030_s7 + $0x88] sm:$0xff] }
 0x1e6   : > { %5214 = vmatprep.subr.bf16.mxu0 %v5213_v39  ;;  %v4657_v39 = vpack.c.bf16 %v1336_v35, %v1264_v30  ;;  %v761_v30 = vld [vmem:[%s6030_s7 + $0x1030] sm:$0xff] }
 0x1e7   : > { %v725_v35 = vld [vmem:[%s6030_s7 + $0xf10] sm:$0xff] }
 0x1e8   : > { %v1373_v28 = vld [vmem:[%s6030_s7 + $0x2350] sm:$0xff] }
 0x1eb   : > { %4640 = vmatpush1.bf16.xpose.msra.mxu1 %v4639_v43  ;;  %v366_v43 = vld [vmem:[%s6030_s7 + $0x3d8] sm:$0xff] }
 0x1ec   : > { %4642 = vmatprep.subr.bf16.mxu1 %v4641_v45  ;;  %v5235_v45 = vpack.c.bf16 %v1371_v38, %v1299_v50  ;;  %v5237_v48 = vpack.c.bf16 %v366_v43, %v294_v42  ;;  %v833_v38 = vld [vmem:[%s6030_s7 + $0x1270] sm:$0xff]  ;;  %v978_v43 = vld [vmem:[%s6030_s7 + $0x16f8] sm:$0xff] }
 0x1ed   : > { %5216 = vmatpush1.bf16.xpose.msra.mxu0 %v5215_v44  ;;  %v4659_v44 = vpack.c.bf16 %v1335_v37, %v1263_v34  ;;  %v5251_v34 = vpack.c.bf16 %v797_v31, %v725_v35  ;;  %v941_v42 = vld [vmem:[%s6030_s7 + $0x15d0] sm:$0xff]  ;;  %v331_v35 = vld [vmem:[%s6030_s7 + $0x2c0] sm:$0xff] }
 0x1ee   : > { %5218 = vmatprep.subr.bf16.mxu0 %v5217_v46  ;;  %v4661_v46 = vpack.c.bf16 %v330_v41, %v258_v40  ;;  %v905_v40 = vld [vmem:[%s6030_s7 + $0x14b0] sm:$0xff]  ;;  %v295_v31 = vld [vmem:[%s6030_s7 + $0x1a0] sm:$0xff] }
 0x1ef   : > { %v869_v41 = vld [vmem:[%s6030_s7 + $0x1390] sm:$0xff] }
 0x1f3   : > { %4644 = vmatpush1.bf16.xpose.msra.mxu1 %v4643_v57  ;;  %v474_v57 = vld [vmem:[%s6030_s7 + $0x738] sm:$0xff] }
 0x1f4   : > { %4646 = vmatprep.subr.bf16.mxu1 %v4645_v61  ;;  %v438_v61 = vld [vmem:[%s6030_s7 + $0x618] sm:$0xff]  ;;  %v4665_v1 = vpack.c.bf16 %v474_v57, %v402_v56  ;;  %v1085_v56 = vld [vmem:[%s6030_s7 + $0x1a50] sm:$0xff] }
 0x1f5   : > { %5220 = vmatpush1.bf16.xpose.msra.mxu0 %v5219_v58  ;;  %v6649_v58 = vrot.slane %v1471_v49, %v6070_v47  ;;  %v5241_v2 = vpack.c.bf16 %v510_v9, %v438_v61  ;;  %v5255_v49 = vpack.c.bf16 %v941_v42, %v869_v41  ;;  %v1122_v57 = vld [vmem:[%s6030_s7 + $0x1b78] sm:$0xff] }
 0x1f6   : > { %5222 = vmatprep.subr.bf16.mxu0 %v5221_v62  ;;  %v4663_v62 = vpack.c.bf16 %v329_v60, %v257_v63  ;;  %v977_v60 = vld [vmem:[%s6030_s7 + $0x16f0] sm:$0xff]  ;;  %v1194_v61 = vld [vmem:[%s6030_s7 + $0x1db8] sm:$0xff] }
 0x1f7   : > { %v1487_v3 = vcombine.high %v6649_v58, %v6649_v58  ;;  %v1158_v9 = vld [vmem:[%s6030_s7 + $0x1c98] sm:$0xff] }
 0x1fb   : > { %4648 = vmatpush1.bf16.xpose.msra.mxu1 %v4647_v8  ;;  %v509_v8 = vld [vmem:[%s6030_s7 + $0x850] sm:$0xff] }
 0x1fc   : > { %4650 = vmatprep.subr.bf16.mxu1 %v4649_v16  ;;  %v618_v16 = vld [vmem:[%s6030_s7 + $0xbb8] sm:$0xff]  ;;  %v5243_v29 = vpack.c.bf16 %v509_v8, %v437_v7  ;;  %v1229_v7 = vld [vmem:[%s6030_s7 + $0x1ed0] sm:$0xff] }
 0x1fd   : > { %5224 = vmatpush1.bf16.xpose.msra.mxu0 %v5223_v11  ;;  %v546_v11 = vld [vmem:[%s6030_s7 + $0x978] sm:$0xff] }
 0x1fe   : > { %5226 = vmatprep.subr.bf16.mxu0 %v5225_v12  ;;  %v654_v12 = vld [vmem:[%s6030_s7 + $0xcd8] sm:$0xff]  ;;  %v4669_v55 = vpack.c.bf16 %v618_v16, %v546_v11 }
 0x1ff   : > { %v1266_v8 = vld [vmem:[%s6030_s7 + $0x1ff8] sm:$0xff] }
 0x200   : > { %v1338_v11 = vld [vmem:[%s6030_s7 + $0x2238] sm:$0xff] }
 0x201   : > { %v1302_v16 = vld [vmem:[%s6030_s7 + $0x2118] sm:$0xff] }
 0x203   : > { %4652 = vmatpush1.bf16.xpose.msra.mxu1 %v4651_v20  ;;  %v762_v20 = vld [vmem:[%s6030_s7 + $0x1038] sm:$0xff] }
 0x204   : > { %4654 = vmatprep.subr.bf16.mxu1 %v4653_v22  ;;  %v798_v22 = vld [vmem:[%s6030_s7 + $0x1158] sm:$0xff]  ;;  %v4673_v25 = vpack.c.bf16 %v762_v20, %v690_v19  ;;  %v332_v19 = vld [vmem:[%s6030_s7 + $0x2c8] sm:$0xff] }
 0x205   : > { %5228 = vmatpush1.bf16.xpose.msra.mxu0 %v5227_v21  ;;  %v726_v21 = vld [vmem:[%s6030_s7 + $0xf18] sm:$0xff]  ;;  %v296_v20 = vld [vmem:[%s6030_s7 + $0x1a8] sm:$0xff] }
 0x206   : > { %5230 = vmatprep.subr.bf16.mxu0 %v5229_v23  ;;  %v4671_v23 = vpack.c.bf16 %v617_v15, %v545_v14  ;;  %v5249_v26 = vpack.c.bf16 %v798_v22, %v726_v21  ;;  %v1337_v14 = vld [vmem:[%s6030_s7 + $0x2230] sm:$0xff]  ;;  %v368_v21 = vld [vmem:[%s6030_s7 + $0x3e8] sm:$0xff] }
 0x207   : > { %v1301_v15 = vld [vmem:[%s6030_s7 + $0x2110] sm:$0xff] }
 0x20b   : > { %4656 = vmatpush1.bf16.xpose.msra.mxu1 %v4655_v36  ;;  %v906_v36 = vld [vmem:[%s6030_s7 + $0x14b8] sm:$0xff] }
 0x20c   : > { %4658 = vmatprep.subr.bf16.mxu1 %v4657_v39  ;;  %v942_v39 = vld [vmem:[%s6030_s7 + $0x15d8] sm:$0xff]  ;;  %v4677_v37 = vpack.c.bf16 %v906_v36, %v834_v51  ;;  %v367_v51 = vld [vmem:[%s6030_s7 + $0x3e0] sm:$0xff]  ;;  %v404_v36 = vld [vmem:[%s6030_s7 + $0x508] sm:$0xff] }
 0x20d   : > { %5232 = vmatpush1.bf16.xpose.msra.mxu0 %v5231_v32  ;;  %v870_v32 = vld [vmem:[%s6030_s7 + $0x1398] sm:$0xff] }
 0x20e   : > { %5234 = vmatprep.subr.bf16.mxu0 %v5233_v33  ;;  %v4675_v33 = vpack.c.bf16 %v761_v30, %v689_v27  ;;  %v5253_v50 = vpack.c.bf16 %v942_v39, %v870_v32  ;;  %v6726_v27 = vld [vmem:[%s7607_s0 + $0x68] sm:$0xff]  ;;  %v259_v30 = vld [vmem:[%s6030_s7 + $0x80] sm:$0xff] }
 0x20f   : > { %v476_v32 = vld [vmem:[%s6030_s7 + $0x748] sm:$0xff] }
 0x213   : > { %4660 = vmatpush1.bf16.xpose.msra.mxu1 %v4659_v44  ;;  %v1050_v44 = vld [vmem:[%s6030_s7 + $0x1938] sm:$0xff] }
 0x214   : > { %4662 = vmatprep.subr.bf16.mxu1 %v4661_v46  ;;  %v1086_v46 = vld [vmem:[%s6030_s7 + $0x1a58] sm:$0xff]  ;;  %v4681_v53 = vpack.c.bf16 %v1050_v44, %v978_v43  ;;  %v403_v44 = vld [vmem:[%s6030_s7 + $0x500] sm:$0xff] }
 0x215   : > { %5236 = vmatpush1.bf16.xpose.msra.mxu0 %v5235_v45  ;;  %v1014_v45 = vld [vmem:[%s6030_s7 + $0x1818] sm:$0xff] }
 0x216   : > { %5238 = vmatprep.subr.bf16.mxu0 %v5237_v48  ;;  %v4679_v48 = vpack.c.bf16 %v905_v40, %v833_v38  ;;  %v5257_v63 = vpack.c.bf16 %v1086_v46, %v1014_v45  ;;  %v5271_v38 = vpack.c.bf16 %v367_v51, %v295_v31  ;;  %v4697_v40 = vpack.c.bf16 %v476_v32, %v404_v36  ;;  %v475_v45 = vld [vmem:[%s6030_s7 + $0x740] sm:$0xff] }
 0x217   : > { %v439_v46 = vld [vmem:[%s6030_s7 + $0x620] sm:$0xff] }
 0x218   : > { %v979_v51 = vld [vmem:[%s6030_s7 + $0x1700] sm:$0xff] }
 0x219   : > { %v1051_v36 = vld [vmem:[%s6030_s7 + $0x1940] sm:$0xff] }
 0x21a   : > { %2283 = vmatmul.mubr.f32.vlgmr.msra.gmra.mrb[0].mxu1 %v6568_v59  ;;  %v582_v59 = vld [vmem:[%s6030_s7 + $0xa98] sm:$0xff]  ;;  %v1015_v32 = vld [vmem:[%s6030_s7 + $0x1820] sm:$0xff] }
 0x21b   : > { %4664 = vmatpush1.bf16.xpose.msra.mxu1 %v4663_v62  ;;  %2352 = vmatprep.mubr.f32.mxu1 %v1487_v3  ;;  %v5245_v13 = vpack.c.bf16 %v654_v12, %v582_v59  ;;  %v1230_v62 = vld [vmem:[%s6030_s7 + $0x1ed8] sm:$0xff] }
 0x21c   : > { %3543 = vmatmul.mubr.f32.vlgmr.msra.gmra.mrb[0].mxu0 %v6574_v17  ;;  %4666 = vmatprep.subr.bf16.mxu1 %v4665_v1  ;;  %v4667_v17 = vpack.c.bf16 %v473_v6, %v401_v5  ;;  %v5259_v1 = vpack.c.bf16 %v1085_v56, %v1013_v52  ;;  %v5261_v3 = vpack.c.bf16 %v1230_v62, %v1158_v9  ;;  %v1193_v5 = vld [vmem:[%s6030_s7 + $0x1db0] sm:$0xff]  ;;  %v1374_v59 = vld [vmem:[%s6030_s7 + $0x2358] sm:$0xff]  ;;  %v547_v56 = vld [vmem:[%s6030_s7 + $0x980] sm:$0xff] }
 0x21d   : > { %5240 = vmatpush1.bf16.xpose.msra.mxu0 %v5239_v0  ;;  %3612 = vmatprep.mubr.f32.mxu0 %v1640_v4  ;;  %v4683_v0 = vpack.c.bf16 %v1049_v54, %v977_v60  ;;  %v1121_v4 = vld [vmem:[%s6030_s7 + $0x1b70] sm:$0xff]  ;;  %v655_v9 = vld [vmem:[%s6030_s7 + $0xce0] sm:$0xff]  ;;  %v692_v62 = vld [vmem:[%s6030_s7 + $0xe08] sm:$0xff] }
 0x21e   : > { %5242 = vmatprep.subr.bf16.mxu0 %v5241_v2  ;;  %v4685_v2 = vpack.c.bf16 %v1194_v61, %v1122_v57  ;;  %v1157_v6 = vld [vmem:[%s6030_s7 + $0x1c90] sm:$0xff]  ;;  %v4687_v12 = vpack.c.bf16 %v1193_v5, %v1121_v4  ;;  %v619_v57 = vld [vmem:[%s6030_s7 + $0xbc0] sm:$0xff] }
 0x21f   : > { %v583_v61 = vld [vmem:[%s6030_s7 + $0xaa0] sm:$0xff] }
 0x220   : > { %v5279_v4 = vpack.c.bf16 %v655_v9, %v583_v61  ;;  %v1339_v61 = vld [vmem:[%s6030_s7 + $0x2240] sm:$0xff] }
 0x221   : > { %v1303_v9 = vld [vmem:[%s6030_s7 + $0x2120] sm:$0xff] }
 0x223   : > { %4668 = vmatpush1.bf16.xpose.msra.mxu1 %v4667_v17  ;;  %v5263_v17 = vpack.c.bf16 %v1229_v7, %v1157_v6  ;;  %v691_v7 = vld [vmem:[%s6030_s7 + $0xe00] sm:$0xff] }
 0x224   : > { %4670 = vmatprep.subr.bf16.mxu1 %v4669_v55  ;;  %v5265_v55 = vpack.c.bf16 %v1374_v59, %v1302_v16  ;;  %v799_v16 = vld [vmem:[%s6030_s7 + $0x1160] sm:$0xff]  ;;  %v836_v59 = vld [vmem:[%s6030_s7 + $0x1288] sm:$0xff] }
 0x225   : > { %5244 = vmatpush1.bf16.xpose.msra.mxu0 %v5243_v29  ;;  %v4689_v29 = vpack.c.bf16 %v1338_v11, %v1266_v8  ;;  %v763_v8 = vld [vmem:[%s6030_s7 + $0x1040] sm:$0xff] }
 0x226   : > { %5246 = vmatprep.subr.bf16.mxu0 %v5245_v13  ;;  %v1265_v13 = vld [vmem:[%s6030_s7 + $0x1ff0] sm:$0xff]  ;;  %v727_v11 = vld [vmem:[%s6030_s7 + $0xf20] sm:$0xff] }
 0x227   : > { %v4691_v22 = vpack.c.bf16 %v1337_v14, %v1265_v13  ;;  %v5283_v13 = vpack.c.bf16 %v799_v16, %v727_v11  ;;  %v1641_v11 = vcombine.high %v6726_v27, %v6726_v27  ;;  %v261_v16 = vld [vmem:[%s6030_s7 + $0x90] sm:$0xff] }
 0x22b   : > { %4672 = vmatpush1.bf16.xpose.msra.mxu1 %v4671_v23  ;;  %v5267_v23 = vpack.c.bf16 %v1373_v28, %v1301_v15  ;;  %v835_v28 = vld [vmem:[%s6030_s7 + $0x1280] sm:$0xff] }
 0x22c   : > { %4674 = vmatprep.subr.bf16.mxu1 %v4673_v25  ;;  %v5269_v25 = vpack.c.bf16 %v368_v21, %v296_v20  ;;  %v943_v20 = vld [vmem:[%s6030_s7 + $0x15e0] sm:$0xff]  ;;  %v980_v21 = vld [vmem:[%s6030_s7 + $0x1708] sm:$0xff] }
 0x22d   : > { %5248 = vmatpush1.bf16.xpose.msra.mxu0 %v5247_v24  ;;  %v4693_v24 = vpack.c.bf16 %v332_v19, %v260_v18  ;;  %v907_v18 = vld [vmem:[%s6030_s7 + $0x14c0] sm:$0xff] }
 0x22e   : > { %5250 = vmatprep.subr.bf16.mxu0 %v5249_v26  ;;  %v6721_v26 = vld [vmem:[%s7607_s0 + $0x20] sm:$0xff] }
 0x22f   : > { %v6736_v39 = vrot.slane %v6721_v26, %v6070_v47  ;;  %v871_v19 = vld [vmem:[%s6030_s7 + $0x13a0] sm:$0xff] }
 0x231   : > { %v1503_v42 = vcombine.high %v6736_v39, %v6736_v39 }
 0x233   : > { %4676 = vmatpush1.bf16.xpose.msra.mxu1 %v4675_v33  ;;  %v440_v33 = vld [vmem:[%s6030_s7 + $0x628] sm:$0xff] }
 0x234   : > { %4678 = vmatprep.subr.bf16.mxu1 %v4677_v37  ;;  %v6742_v37 = vrot.slane %v6726_v27, %v6070_v47  ;;  %v6822_v27 = vrot.slane %v1641_v11, %v6070_v47 }
 0x235   : > { %5252 = vmatpush1.bf16.xpose.msra.mxu0 %v5251_v34  ;;  %v512_v34 = vld [vmem:[%s6030_s7 + $0x868] sm:$0xff] }
 0x236   : > { %5254 = vmatprep.subr.bf16.mxu0 %v5253_v50  ;;  %v4695_v50 = vpack.c.bf16 %v331_v35, %v259_v30  ;;  %v5273_v41 = vpack.c.bf16 %v512_v34, %v440_v33  ;;  %v1656_v43 = vcombine.high %v6742_v37, %v6742_v37  ;;  %v5287_v30 = vpack.c.bf16 %v943_v20, %v871_v19  ;;  %v1087_v33 = vld [vmem:[%s6030_s7 + $0x1a60] sm:$0xff]  ;;  %v1124_v34 = vld [vmem:[%s6030_s7 + $0x1b88] sm:$0xff] }
 0x23b   : > { %4680 = vmatpush1.bf16.xpose.msra.mxu1 %v4679_v48  ;;  %v511_v48 = vld [vmem:[%s6030_s7 + $0x860] sm:$0xff] }
 0x23c   : > { %4682 = vmatprep.subr.bf16.mxu1 %v4681_v53  ;;  %v620_v53 = vld [vmem:[%s6030_s7 + $0xbc8] sm:$0xff]  ;;  %v5275_v60 = vpack.c.bf16 %v511_v48, %v439_v46  ;;  %v1195_v46 = vld [vmem:[%s6030_s7 + $0x1dc0] sm:$0xff] }
 0x23d   : > { %5256 = vmatpush1.bf16.xpose.msra.mxu0 %v5255_v49  ;;  %v548_v49 = vld [vmem:[%s6030_s7 + $0x988] sm:$0xff]  ;;  %v1159_v48 = vld [vmem:[%s6030_s7 + $0x1ca0] sm:$0xff] }
 0x23e   : > { %5258 = vmatprep.subr.bf16.mxu0 %v5257_v63  ;;  %v656_v63 = vld [vmem:[%s6030_s7 + $0xce8] sm:$0xff]  ;;  %v4701_v54 = vpack.c.bf16 %v620_v53, %v548_v49  ;;  %v1231_v49 = vld [vmem:[%s6030_s7 + $0x1ee0] sm:$0xff] }
 0x23f   : > { %v1268_v53 = vld [vmem:[%s6030_s7 + $0x2008] sm:$0xff] }
 0x243   : > { %4684 = vmatpush1.bf16.xpose.msra.mxu1 %v4683_v0  ;;  %v764_v0 = vld [vmem:[%s6030_s7 + $0x1048] sm:$0xff] }
 0x244   : > { %4686 = vmatprep.subr.bf16.mxu1 %v4685_v2  ;;  %v800_v2 = vld [vmem:[%s6030_s7 + $0x1168] sm:$0xff]  ;;  %v4705_v5 = vpack.c.bf16 %v764_v0, %v692_v62  ;;  %v1375_v62 = vld [vmem:[%s6030_s7 + $0x2360] sm:$0xff]  ;;  %v262_v0 = vld [vmem:[%s6030_s7 + $0x98] sm:$0xff] }
 0x245   : > { %5260 = vmatpush1.bf16.xpose.msra.mxu0 %v5259_v1  ;;  %v728_v1 = vld [vmem:[%s6030_s7 + $0xf28] sm:$0xff] }
 0x246   : > { %5262 = vmatprep.subr.bf16.mxu0 %v5261_v3  ;;  %v4703_v3 = vpack.c.bf16 %v619_v57, %v547_v56  ;;  %v5281_v6 = vpack.c.bf16 %v800_v2, %v728_v1  ;;  %v1267_v57 = vld [vmem:[%s6030_s7 + $0x2000] sm:$0xff]  ;;  %v334_v1 = vld [vmem:[%s6030_s7 + $0x2d8] sm:$0xff] }
 0x247   : > { %v298_v2 = vld [vmem:[%s6030_s7 + $0x1b8] sm:$0xff] }
 0x24b   : > { %4688 = vmatpush1.bf16.xpose.msra.mxu1 %v4687_v12  ;;  %v908_v12 = vld [vmem:[%s6030_s7 + $0x14c8] sm:$0xff] }
 0x24c   : > { %4690 = vmatprep.subr.bf16.mxu1 %v4689_v29  ;;  %v944_v29 = vld [vmem:[%s6030_s7 + $0x15e8] sm:$0xff]  ;;  %v4709_v14 = vpack.c.bf16 %v908_v12, %v836_v59  ;;  %v333_v59 = vld [vmem:[%s6030_s7 + $0x2d0] sm:$0xff] }
 0x24d   : > { %5264 = vmatpush1.bf16.xpose.msra.mxu0 %v5263_v17  ;;  %v872_v17 = vld [vmem:[%s6030_s7 + $0x13a8] sm:$0xff]  ;;  %v297_v12 = vld [vmem:[%s6030_s7 + $0x1b0] sm:$0xff] }
 0x24e   : > { %5266 = vmatprep.subr.bf16.mxu0 %v5265_v55  ;;  %v4707_v55 = vpack.c.bf16 %v763_v8, %v691_v7  ;;  %v5285_v15 = vpack.c.bf16 %v944_v29, %v872_v17  ;;  %v1488_v8 = vcombine.high %v6721_v26, %v6721_v26  ;;  %v369_v17 = vld [vmem:[%s6030_s7 + $0x3f0] sm:$0xff]  ;;  %v406_v29 = vld [vmem:[%s6030_s7 + $0x518] sm:$0xff] }
 0x24f   : > { %v514_v26 = vld [vmem:[%s6030_s7 + $0x878] sm:$0xff] }
 0x253   : > { %4692 = vmatpush1.bf16.xpose.msra.mxu1 %v4691_v22  ;;  %v1052_v22 = vld [vmem:[%s6030_s7 + $0x1948] sm:$0xff] }
 0x254   : > { %4694 = vmatprep.subr.bf16.mxu1 %v4693_v24  ;;  %v1088_v24 = vld [vmem:[%s6030_s7 + $0x1a68] sm:$0xff]  ;;  %v4713_v35 = vpack.c.bf16 %v1052_v22, %v980_v21  ;;  %v1657_v21 = vcombine.high %v6822_v27, %v6822_v27  ;;  %v405_v22 = vld [vmem:[%s6030_s7 + $0x510] sm:$0xff] }
 0x255   : > { %5268 = vmatpush1.bf16.xpose.msra.mxu0 %v5267_v23  ;;  %v1016_v23 = vld [vmem:[%s6030_s7 + $0x1828] sm:$0xff] }
 0x256   : > { %5270 = vmatprep.subr.bf16.mxu0 %v5269_v25  ;;  %v4711_v25 = vpack.c.bf16 %v907_v18, %v835_v28  ;;  %v5289_v31 = vpack.c.bf16 %v1088_v24, %v1016_v23  ;;  %v5303_v28 = vpack.c.bf16 %v369_v17, %v297_v12  ;;  %v477_v23 = vld [vmem:[%s6030_s7 + $0x750] sm:$0xff] }
 0x257   : > { %v441_v24 = vld [vmem:[%s6030_s7 + $0x630] sm:$0xff] }
 0x258   : > { %v1053_v12 = vld [vmem:[%s6030_s7 + $0x1950] sm:$0xff] }
 0x259   : > { %v1017_v17 = vld [vmem:[%s6030_s7 + $0x1830] sm:$0xff] }
 0x25a   : > { %2353 = vmatmul.mubr.f32.vlgmr.msra.gmra.mrb[0].mxu1 %v6649_v58  ;;  %v584_v58 = vld [vmem:[%s6030_s7 + $0xaa8] sm:$0xff] }
 0x25b   : > { %4696 = vmatpush1.bf16.xpose.msra.mxu1 %v4695_v50  ;;  %2422 = vmatprep.mubr.f32.mxu1 %v1503_v42  ;;  %v5277_v52 = vpack.c.bf16 %v656_v63, %v584_v58  ;;  %v1196_v50 = vld [vmem:[%s6030_s7 + $0x1dc8] sm:$0xff]  ;;  %v5291_v42 = vpack.c.bf16 %v1087_v33, %v1015_v32  ;;  %v549_v33 = vld [vmem:[%s6030_s7 + $0x990] sm:$0xff] }
 0x25c   : > { %3613 = vmatmul.mubr.f32.vlgmr.msra.gmra.mrb[0].mxu0 %v6654_v10  ;;  %4698 = vmatprep.subr.bf16.mxu1 %v4697_v40  ;;  %v4699_v10 = vpack.c.bf16 %v475_v45, %v403_v44  ;;  %v1232_v40 = vld [vmem:[%s6030_s7 + $0x1ee8] sm:$0xff]  ;;  %v1123_v45 = vld [vmem:[%s6030_s7 + $0x1b80] sm:$0xff] }
 0x25d   : > { %5272 = vmatpush1.bf16.xpose.msra.mxu0 %v5271_v38  ;;  %3682 = vmatprep.mubr.f32.mxu0 %v1656_v43  ;;  %v1160_v38 = vld [vmem:[%s6030_s7 + $0x1ca8] sm:$0xff]  ;;  %v4717_v43 = vpack.c.bf16 %v1196_v50, %v1124_v34  ;;  %v621_v34 = vld [vmem:[%s6030_s7 + $0xbd0] sm:$0xff] }
 0x25e   : > { %5274 = vmatprep.subr.bf16.mxu0 %v5273_v41  ;;  %v4715_v41 = vpack.c.bf16 %v1051_v36, %v979_v51  ;;  %v5293_v44 = vpack.c.bf16 %v1232_v40, %v1160_v38  ;;  %v1340_v58 = vld [vmem:[%s6030_s7 + $0x2248] sm:$0xff]  ;;  %v585_v50 = vld [vmem:[%s6030_s7 + $0xab0] sm:$0xff]  ;;  %v694_v40 = vld [vmem:[%s6030_s7 + $0xe18] sm:$0xff] }
 0x25f   : > { %v1304_v63 = vld [vmem:[%s6030_s7 + $0x2128] sm:$0xff]  ;;  %v657_v38 = vld [vmem:[%s6030_s7 + $0xcf0] sm:$0xff] }
 0x263   : > { %4700 = vmatpush1.bf16.xpose.msra.mxu1 %v4699_v10  ;;  %v1376_v10 = vld [vmem:[%s6030_s7 + $0x2368] sm:$0xff] }
 0x264   : > { %4702 = vmatprep.subr.bf16.mxu1 %v4701_v54  ;;  %v5295_v54 = vpack.c.bf16 %v1231_v49, %v1159_v48  ;;  %v5297_v56 = vpack.c.bf16 %v1376_v10, %v1304_v63  ;;  %v693_v49 = vld [vmem:[%s6030_s7 + $0xe10] sm:$0xff]  ;;  %v838_v10 = vld [vmem:[%s6030_s7 + $0x1298] sm:$0xff] }
 0x265   : > { %5276 = vmatpush1.bf16.xpose.msra.mxu0 %v5275_v60  ;;  %v4719_v60 = vpack.c.bf16 %v1195_v46, %v1123_v45  ;;  %v5311_v45 = vpack.c.bf16 %v657_v38, %v585_v50  ;;  %v801_v63 = vld [vmem:[%s6030_s7 + $0x1170] sm:$0xff]  ;;  %v264_v38 = vld [vmem:[%s6030_s7 + $0xa8] sm:$0xff] }
 0x266   : > { %5278 = vmatprep.subr.bf16.mxu0 %v5277_v52  ;;  %v4721_v52 = vpack.c.bf16 %v1340_v58, %v1268_v53  ;;  %v765_v53 = vld [vmem:[%s6030_s7 + $0x1050] sm:$0xff] }
 0x267   : > { %v729_v58 = vld [vmem:[%s6030_s7 + $0xf30] sm:$0xff] }
 0x268   : > { %v1377_v50 = vld [vmem:[%s6030_s7 + $0x2370] sm:$0xff] }
 0x26b   : > { %4704 = vmatpush1.bf16.xpose.msra.mxu1 %v4703_v3  ;;  %v370_v3 = vld [vmem:[%s6030_s7 + $0x3f8] sm:$0xff] }
 0x26c   : > { %4706 = vmatprep.subr.bf16.mxu1 %v4705_v5  ;;  %v5299_v5 = vpack.c.bf16 %v1375_v62, %v1303_v9  ;;  %v5301_v7 = vpack.c.bf16 %v370_v3, %v298_v2  ;;  %v837_v62 = vld [vmem:[%s6030_s7 + $0x1290] sm:$0xff]  ;;  %v982_v3 = vld [vmem:[%s6030_s7 + $0x1718] sm:$0xff] }
 0x26d   : > { %5280 = vmatpush1.bf16.xpose.msra.mxu0 %v5279_v4  ;;  %v4723_v4 = vpack.c.bf16 %v1339_v61, %v1267_v57  ;;  %v5315_v57 = vpack.c.bf16 %v801_v63, %v729_v58  ;;  %v945_v2 = vld [vmem:[%s6030_s7 + $0x15f0] sm:$0xff]  ;;  %v335_v58 = vld [vmem:[%s6030_s7 + $0x2e0] sm:$0xff] }
 0x26e   : > { %5282 = vmatprep.subr.bf16.mxu0 %v5281_v6  ;;  %v4725_v6 = vpack.c.bf16 %v334_v1, %v262_v0  ;;  %v909_v0 = vld [vmem:[%s6030_s7 + $0x14d0] sm:$0xff]  ;;  %v299_v63 = vld [vmem:[%s6030_s7 + $0x1c0] sm:$0xff] }
 0x26f   : > { %v873_v1 = vld [vmem:[%s6030_s7 + $0x13b0] sm:$0xff] }
 0x273   : > { %4708 = vmatpush1.bf16.xpose.msra.mxu1 %v4707_v55  ;;  %v478_v55 = vld [vmem:[%s6030_s7 + $0x758] sm:$0xff] }
 0x274   : > { %4710 = vmatprep.subr.bf16.mxu1 %v4709_v14  ;;  %v442_v14 = vld [vmem:[%s6030_s7 + $0x638] sm:$0xff]  ;;  %v4729_v18 = vpack.c.bf16 %v478_v55, %v406_v29  ;;  %v1089_v29 = vld [vmem:[%s6030_s7 + $0x1a70] sm:$0xff] }
 0x275   : > { %5284 = vmatpush1.bf16.xpose.msra.mxu0 %v5283_v13  ;;  %v6817_v13 = vrot.slane %v1488_v8, %v6070_v47  ;;  %v5305_v19 = vpack.c.bf16 %v514_v26, %v442_v14  ;;  %v5319_v8 = vpack.c.bf16 %v945_v2, %v873_v1  ;;  %v1126_v55 = vld [vmem:[%s6030_s7 + $0x1b98] sm:$0xff] }
 0x276   : > { %5286 = vmatprep.subr.bf16.mxu0 %v5285_v15  ;;  %v4727_v15 = vpack.c.bf16 %v333_v59, %v261_v16  ;;  %v981_v59 = vld [vmem:[%s6030_s7 + $0x1710] sm:$0xff]  ;;  %v1198_v14 = vld [vmem:[%s6030_s7 + $0x1dd8] sm:$0xff] }
 0x277   : > { %v1504_v20 = vcombine.high %v6817_v13, %v6817_v13  ;;  %v1162_v26 = vld [vmem:[%s6030_s7 + $0x1cb8] sm:$0xff] }
 0x27b   : > { %4712 = vmatpush1.bf16.xpose.msra.mxu1 %v4711_v25  ;;  %v513_v25 = vld [vmem:[%s6030_s7 + $0x870] sm:$0xff] }
 0x27c   : > { %4714 = vmatprep.subr.bf16.mxu1 %v4713_v35  ;;  %v622_v35 = vld [vmem:[%s6030_s7 + $0xbd8] sm:$0xff]  ;;  %v5307_v51 = vpack.c.bf16 %v513_v25, %v441_v24  ;;  %v1233_v24 = vld [vmem:[%s6030_s7 + $0x1ef0] sm:$0xff] }
 0x27d   : > { %5288 = vmatpush1.bf16.xpose.msra.mxu0 %v5287_v30  ;;  %v550_v30 = vld [vmem:[%s6030_s7 + $0x998] sm:$0xff] }
 0x27e   : > { %5290 = vmatprep.subr.bf16.mxu0 %v5289_v31  ;;  %v658_v31 = vld [vmem:[%s6030_s7 + $0xcf8] sm:$0xff]  ;;  %v4733_v36 = vpack.c.bf16 %v622_v35, %v550_v30 }
 0x27f   : > { %v1270_v25 = vld [vmem:[%s6030_s7 + $0x2018] sm:$0xff] }
 0x280   : > { %v1342_v30 = vld [vmem:[%s6030_s7 + $0x2258] sm:$0xff] }
 0x281   : > { %v1306_v35 = vld [vmem:[%s6030_s7 + $0x2138] sm:$0xff] }
 0x283   : > { %4716 = vmatpush1.bf16.xpose.msra.mxu1 %v4715_v41  ;;  %v766_v41 = vld [vmem:[%s6030_s7 + $0x1058] sm:$0xff] }
 0x284   : > { %4718 = vmatprep.subr.bf16.mxu1 %v4717_v43  ;;  %v802_v43 = vld [vmem:[%s6030_s7 + $0x1178] sm:$0xff]  ;;  %v4737_v46 = vpack.c.bf16 %v766_v41, %v694_v40  ;;  %v336_v40 = vld [vmem:[%s6030_s7 + $0x2e8] sm:$0xff] }
 0x285   : > { %5292 = vmatpush1.bf16.xpose.msra.mxu0 %v5291_v42  ;;  %v730_v42 = vld [vmem:[%s6030_s7 + $0xf38] sm:$0xff]  ;;  %v300_v41 = vld [vmem:[%s6030_s7 + $0x1c8] sm:$0xff] }
 0x286   : > { %5294 = vmatprep.subr.bf16.mxu0 %v5293_v44  ;;  %v4735_v44 = vpack.c.bf16 %v621_v34, %v549_v33  ;;  %v5313_v48 = vpack.c.bf16 %v802_v43, %v730_v42  ;;  %v1341_v33 = vld [vmem:[%s6030_s7 + $0x2250] sm:$0xff]  ;;  %v372_v42 = vld [vmem:[%s6030_s7 + $0x408] sm:$0xff] }
 0x287   : > { %v1305_v34 = vld [vmem:[%s6030_s7 + $0x2130] sm:$0xff] }
 0x28b   : > { %4720 = vmatpush1.bf16.xpose.msra.mxu1 %v4719_v60  ;;  %v910_v60 = vld [vmem:[%s6030_s7 + $0x14d8] sm:$0xff] }
 0x28c   : > { %4722 = vmatprep.subr.bf16.mxu1 %v4721_v52  ;;  %v946_v52 = vld [vmem:[%s6030_s7 + $0x15f8] sm:$0xff]  ;;  %v4741_v61 = vpack.c.bf16 %v910_v60, %v838_v10  ;;  %v371_v10 = vld [vmem:[%s6030_s7 + $0x400] sm:$0xff]  ;;  %v408_v60 = vld [vmem:[%s6030_s7 + $0x528] sm:$0xff] }
 0x28d   : > { %5296 = vmatpush1.bf16.xpose.msra.mxu0 %v5295_v54  ;;  %v874_v54 = vld [vmem:[%s6030_s7 + $0x13b8] sm:$0xff] }
 0x28e   : > { %5298 = vmatprep.subr.bf16.mxu0 %v5297_v56  ;;  %v4739_v56 = vpack.c.bf16 %v765_v53, %v693_v49  ;;  %v5317_v9 = vpack.c.bf16 %v946_v52, %v874_v54  ;;  %v6894_v49 = vld [vmem:[%s7607_s0 + $0x70] sm:$0xff]  ;;  %v263_v53 = vld [vmem:[%s6030_s7 + $0xa0] sm:$0xff]  ;;  %v480_v54 = vld [vmem:[%s6030_s7 + $0x768] sm:$0xff] }
 0x293   : > { %4724 = vmatpush1.bf16.xpose.msra.mxu1 %v4723_v4  ;;  %v1054_v4 = vld [vmem:[%s6030_s7 + $0x1958] sm:$0xff] }
 0x294   : > { %4726 = vmatprep.subr.bf16.mxu1 %v4725_v6  ;;  %v1090_v6 = vld [vmem:[%s6030_s7 + $0x1a78] sm:$0xff]  ;;  %v4745_v11 = vpack.c.bf16 %v1054_v4, %v982_v3  ;;  %v407_v4 = vld [vmem:[%s6030_s7 + $0x520] sm:$0xff] }
 0x295   : > { %5300 = vmatpush1.bf16.xpose.msra.mxu0 %v5299_v5  ;;  %v1018_v5 = vld [vmem:[%s6030_s7 + $0x1838] sm:$0xff] }
 0x296   : > { %5302 = vmatprep.subr.bf16.mxu0 %v5301_v7  ;;  %v4743_v7 = vpack.c.bf16 %v909_v0, %v837_v62  ;;  %v5321_v16 = vpack.c.bf16 %v1090_v6, %v1018_v5  ;;  %v5335_v62 = vpack.c.bf16 %v371_v10, %v299_v63  ;;  %v4761_v0 = vpack.c.bf16 %v480_v54, %v408_v60  ;;  %v479_v5 = vld [vmem:[%s6030_s7 + $0x760] sm:$0xff] }
 0x297   : > { %v443_v6 = vld [vmem:[%s6030_s7 + $0x640] sm:$0xff] }
 0x298   : > { %v983_v10 = vld [vmem:[%s6030_s7 + $0x1720] sm:$0xff] }
 0x299   : > { %v1055_v60 = vld [vmem:[%s6030_s7 + $0x1960] sm:$0xff] }
 0x29a   : > { %2423 = vmatmul.mubr.f32.vlgmr.msra.gmra.mrb[0].mxu1 %v6736_v39  ;;  %v586_v39 = vld [vmem:[%s6030_s7 + $0xab8] sm:$0xff]  ;;  %v1019_v54 = vld [vmem:[%s6030_s7 + $0x1840] sm:$0xff] }
 0x29b   : > { %4728 = vmatpush1.bf16.xpose.msra.mxu1 %v4727_v15  ;;  %2492 = vmatprep.mubr.f32.mxu1 %v1504_v20  ;;  %v5309_v32 = vpack.c.bf16 %v658_v31, %v586_v39  ;;  %v1234_v15 = vld [vmem:[%s6030_s7 + $0x1ef8] sm:$0xff] }
 0x29c   : > { %3683 = vmatmul.mubr.f32.vlgmr.msra.gmra.mrb[0].mxu0 %v6742_v37  ;;  %4730 = vmatprep.subr.bf16.mxu1 %v4729_v18  ;;  %v4731_v37 = vpack.c.bf16 %v477_v23, %v405_v22  ;;  %v5323_v18 = vpack.c.bf16 %v1089_v29, %v1017_v17  ;;  %v5325_v20 = vpack.c.bf16 %v1234_v15, %v1162_v26  ;;  %v1197_v22 = vld [vmem:[%s6030_s7 + $0x1dd0] sm:$0xff]  ;;  %v1378_v39 = vld [vmem:[%s6030_s7 + $0x2378] sm:$0xff]  ;;  %v551_v29 = vld [vmem:[%s6030_s7 + $0x9a0] sm:$0xff] }
 0x29d   : > { %5304 = vmatpush1.bf16.xpose.msra.mxu0 %v5303_v28  ;;  %3752 = vmatprep.mubr.f32.mxu0 %v1657_v21  ;;  %v4747_v28 = vpack.c.bf16 %v1053_v12, %v981_v59  ;;  %v1125_v21 = vld [vmem:[%s6030_s7 + $0x1b90] sm:$0xff]  ;;  %v659_v26 = vld [vmem:[%s6030_s7 + $0xd00] sm:$0xff]  ;;  %v696_v15 = vld [vmem:[%s6030_s7 + $0xe28] sm:$0xff] }
 0x29e   : > { %5306 = vmatprep.subr.bf16.mxu0 %v5305_v19  ;;  %v4749_v19 = vpack.c.bf16 %v1198_v14, %v1126_v55  ;;  %v1161_v23 = vld [vmem:[%s6030_s7 + $0x1cb0] sm:$0xff]  ;;  %v4751_v31 = vpack.c.bf16 %v1197_v22, %v1125_v21  ;;  %v623_v55 = vld [vmem:[%s6030_s7 + $0xbe0] sm:$0xff] }
 0x29f   : > { %v587_v14 = vld [vmem:[%s6030_s7 + $0xac0] sm:$0xff] }
 0x2a0   : > { %v5343_v21 = vpack.c.bf16 %v659_v26, %v587_v14  ;;  %v1343_v14 = vld [vmem:[%s6030_s7 + $0x2260] sm:$0xff] }
 0x2a1   : > { %v1307_v26 = vld [vmem:[%s6030_s7 + $0x2140] sm:$0xff] }
 0x2a3   : > { %4732 = vmatpush1.bf16.xpose.msra.mxu1 %v4731_v37  ;;  %v5327_v37 = vpack.c.bf16 %v1233_v24, %v1161_v23  ;;  %v695_v24 = vld [vmem:[%s6030_s7 + $0xe20] sm:$0xff] }
 0x2a4   : > { %4734 = vmatprep.subr.bf16.mxu1 %v4733_v36  ;;  %v5329_v36 = vpack.c.bf16 %v1378_v39, %v1306_v35  ;;  %v803_v35 = vld [vmem:[%s6030_s7 + $0x1180] sm:$0xff]  ;;  %v840_v39 = vld [vmem:[%s6030_s7 + $0x12a8] sm:$0xff] }
 0x2a5   : > { %5308 = vmatpush1.bf16.xpose.msra.mxu0 %v5307_v51  ;;  %v4753_v51 = vpack.c.bf16 %v1342_v30, %v1270_v25  ;;  %v767_v25 = vld [vmem:[%s6030_s7 + $0x1060] sm:$0xff] }
 0x2a6   : > { %5310 = vmatprep.subr.bf16.mxu0 %v5309_v32  ;;  %v1269_v32 = vld [vmem:[%s6030_s7 + $0x2010] sm:$0xff]  ;;  %v731_v30 = vld [vmem:[%s6030_s7 + $0xf40] sm:$0xff] }
 0x2a7   : > { %v4755_v43 = vpack.c.bf16 %v1341_v33, %v1269_v32  ;;  %v5347_v32 = vpack.c.bf16 %v803_v35, %v731_v30  ;;  %v1658_v30 = vcombine.high %v6894_v49, %v6894_v49  ;;  %v265_v35 = vld [vmem:[%s6030_s7 + $0xb0] sm:$0xff] }
 0x2ab   : > { %4736 = vmatpush1.bf16.xpose.msra.mxu1 %v4735_v44  ;;  %v5331_v44 = vpack.c.bf16 %v1377_v50, %v1305_v34  ;;  %v839_v50 = vld [vmem:[%s6030_s7 + $0x12a0] sm:$0xff] }
 0x2ac   : > { %4738 = vmatprep.subr.bf16.mxu1 %v4737_v46  ;;  %v5333_v46 = vpack.c.bf16 %v372_v42, %v300_v41  ;;  %v947_v41 = vld [vmem:[%s6030_s7 + $0x1600] sm:$0xff]  ;;  %v984_v42 = vld [vmem:[%s6030_s7 + $0x1728] sm:$0xff] }
 0x2ad   : > { %5312 = vmatpush1.bf16.xpose.msra.mxu0 %v5311_v45  ;;  %v4757_v45 = vpack.c.bf16 %v336_v40, %v264_v38  ;;  %v911_v38 = vld [vmem:[%s6030_s7 + $0x14e0] sm:$0xff] }
 0x2ae   : > { %5314 = vmatprep.subr.bf16.mxu0 %v5313_v48  ;;  %v6889_v48 = vld [vmem:[%s7607_s0 + $0x28] sm:$0xff]  ;;  %v875_v40 = vld [vmem:[%s6030_s7 + $0x13c0] sm:$0xff] }
 0x2af   : > { %v6904_v52 = vrot.slane %v6889_v48, %v6070_v47 }
 0x2b1   : > { %v1520_v2 = vcombine.high %v6904_v52, %v6904_v52 }
 0x2b3   : > { %4740 = vmatpush1.bf16.xpose.msra.mxu1 %v4739_v56  ;;  %v444_v56 = vld [vmem:[%s6030_s7 + $0x648] sm:$0xff] }
 0x2b4   : > { %4742 = vmatprep.subr.bf16.mxu1 %v4741_v61  ;;  %v6910_v61 = vrot.slane %v6894_v49, %v6070_v47  ;;  %v6990_v49 = vrot.slane %v1658_v30, %v6070_v47 }
 0x2b5   : > { %5316 = vmatpush1.bf16.xpose.msra.mxu0 %v5315_v57  ;;  %v516_v57 = vld [vmem:[%s6030_s7 + $0x888] sm:$0xff] }
 0x2b6   : > { %5318 = vmatprep.subr.bf16.mxu0 %v5317_v9  ;;  %v4759_v9 = vpack.c.bf16 %v335_v58, %v263_v53  ;;  %v5337_v1 = vpack.c.bf16 %v516_v57, %v444_v56  ;;  %v1673_v3 = vcombine.high %v6910_v61, %v6910_v61  ;;  %v5351_v53 = vpack.c.bf16 %v947_v41, %v875_v40  ;;  %v1091_v56 = vld [vmem:[%s6030_s7 + $0x1a80] sm:$0xff]  ;;  %v1128_v57 = vld [vmem:[%s6030_s7 + $0x1ba8] sm:$0xff] }
 0x2bb   : > { %4744 = vmatpush1.bf16.xpose.msra.mxu1 %v4743_v7  ;;  %v515_v7 = vld [vmem:[%s6030_s7 + $0x880] sm:$0xff] }
 0x2bc   : > { %4746 = vmatprep.subr.bf16.mxu1 %v4745_v11  ;;  %v624_v11 = vld [vmem:[%s6030_s7 + $0xbe8] sm:$0xff]  ;;  %v5339_v59 = vpack.c.bf16 %v515_v7, %v443_v6  ;;  %v1199_v6 = vld [vmem:[%s6030_s7 + $0x1de0] sm:$0xff] }
 0x2bd   : > { %5320 = vmatpush1.bf16.xpose.msra.mxu0 %v5319_v8  ;;  %v552_v8 = vld [vmem:[%s6030_s7 + $0x9a8] sm:$0xff]  ;;  %v1163_v7 = vld [vmem:[%s6030_s7 + $0x1cc0] sm:$0xff] }
 0x2be   : > { %5322 = vmatprep.subr.bf16.mxu0 %v5321_v16  ;;  %v660_v16 = vld [vmem:[%s6030_s7 + $0xd08] sm:$0xff]  ;;  %v4765_v12 = vpack.c.bf16 %v624_v11, %v552_v8  ;;  %v1235_v8 = vld [vmem:[%s6030_s7 + $0x1f00] sm:$0xff] }
 0x2bf   : > { %v1272_v11 = vld [vmem:[%s6030_s7 + $0x2028] sm:$0xff] }
 0x2c3   : > { %4748 = vmatpush1.bf16.xpose.msra.mxu1 %v4747_v28  ;;  %v768_v28 = vld [vmem:[%s6030_s7 + $0x1068] sm:$0xff] }
 0x2c4   : > { %4750 = vmatprep.subr.bf16.mxu1 %v4749_v19  ;;  %v804_v19 = vld [vmem:[%s6030_s7 + $0x1188] sm:$0xff]  ;;  %v4769_v22 = vpack.c.bf16 %v768_v28, %v696_v15  ;;  %v1379_v15 = vld [vmem:[%s6030_s7 + $0x2380] sm:$0xff]  ;;  %v266_v28 = vld [vmem:[%s6030_s7 + $0xb8] sm:$0xff] }
 0x2c5   : > { %5324 = vmatpush1.bf16.xpose.msra.mxu0 %v5323_v18  ;;  %v732_v18 = vld [vmem:[%s6030_s7 + $0xf48] sm:$0xff] }
 0x2c6   : > { %5326 = vmatprep.subr.bf16.mxu0 %v5325_v20  ;;  %v4767_v20 = vpack.c.bf16 %v623_v55, %v551_v29  ;;  %v5345_v23 = vpack.c.bf16 %v804_v19, %v732_v18  ;;  %v1271_v55 = vld [vmem:[%s6030_s7 + $0x2020] sm:$0xff]  ;;  %v338_v18 = vld [vmem:[%s6030_s7 + $0x2f8] sm:$0xff] }
 0x2c7   : > { %v302_v19 = vld [vmem:[%s6030_s7 + $0x1d8] sm:$0xff] }
 0x2cb   : > { %4752 = vmatpush1.bf16.xpose.msra.mxu1 %v4751_v31  ;;  %v912_v31 = vld [vmem:[%s6030_s7 + $0x14e8] sm:$0xff] }
 0x2cc   : > { %4754 = vmatprep.subr.bf16.mxu1 %v4753_v51  ;;  %v948_v51 = vld [vmem:[%s6030_s7 + $0x1608] sm:$0xff]  ;;  %v4773_v33 = vpack.c.bf16 %v912_v31, %v840_v39  ;;  %v337_v39 = vld [vmem:[%s6030_s7 + $0x2f0] sm:$0xff] }
 0x2cd   : > { %5328 = vmatpush1.bf16.xpose.msra.mxu0 %v5327_v37  ;;  %v876_v37 = vld [vmem:[%s6030_s7 + $0x13c8] sm:$0xff]  ;;  %v301_v31 = vld [vmem:[%s6030_s7 + $0x1d0] sm:$0xff] }
 0x2ce   : > { %5330 = vmatprep.subr.bf16.mxu0 %v5329_v36  ;;  %v4771_v36 = vpack.c.bf16 %v767_v25, %v695_v24  ;;  %v5349_v34 = vpack.c.bf16 %v948_v51, %v876_v37  ;;  %v1505_v25 = vcombine.high %v6889_v48, %v6889_v48  ;;  %v373_v37 = vld [vmem:[%s6030_s7 + $0x410] sm:$0xff]  ;;  %v410_v51 = vld [vmem:[%s6030_s7 + $0x538] sm:$0xff] }
 0x2cf   : > { %v518_v48 = vld [vmem:[%s6030_s7 + $0x898] sm:$0xff] }
 0x2d3   : > { %4756 = vmatpush1.bf16.xpose.msra.mxu1 %v4755_v43  ;;  %v1056_v43 = vld [vmem:[%s6030_s7 + $0x1968] sm:$0xff] }
 0x2d4   : > { %4758 = vmatprep.subr.bf16.mxu1 %v4757_v45  ;;  %v1092_v45 = vld [vmem:[%s6030_s7 + $0x1a88] sm:$0xff]  ;;  %v4777_v58 = vpack.c.bf16 %v1056_v43, %v984_v42  ;;  %v1674_v42 = vcombine.high %v6990_v49, %v6990_v49  ;;  %v409_v43 = vld [vmem:[%s6030_s7 + $0x530] sm:$0xff] }
 0x2d5   : > { %5332 = vmatpush1.bf16.xpose.msra.mxu0 %v5331_v44  ;;  %v1020_v44 = vld [vmem:[%s6030_s7 + $0x1848] sm:$0xff] }
 0x2d6   : > { %5334 = vmatprep.subr.bf16.mxu0 %v5333_v46  ;;  %v4775_v46 = vpack.c.bf16 %v911_v38, %v839_v50  ;;  %v5353_v63 = vpack.c.bf16 %v1092_v45, %v1020_v44  ;;  %v5367_v50 = vpack.c.bf16 %v373_v37, %v301_v31  ;;  %v481_v44 = vld [vmem:[%s6030_s7 + $0x770] sm:$0xff] }
 0x2d7   : > { %v445_v45 = vld [vmem:[%s6030_s7 + $0x650] sm:$0xff] }
 0x2d8   : > { %v1057_v31 = vld [vmem:[%s6030_s7 + $0x1970] sm:$0xff] }
 0x2d9   : > { %v1021_v37 = vld [vmem:[%s6030_s7 + $0x1850] sm:$0xff] }
 0x2da   : > { %2493 = vmatmul.mubr.f32.vlgmr.msra.gmra.mrb[0].mxu1 %v6817_v13  ;;  %v588_v13 = vld [vmem:[%s6030_s7 + $0xac8] sm:$0xff] }
 0x2db   : > { %4760 = vmatpush1.bf16.xpose.msra.mxu1 %v4759_v9  ;;  %2562 = vmatprep.mubr.f32.mxu1 %v1520_v2  ;;  %v5341_v17 = vpack.c.bf16 %v660_v16, %v588_v13  ;;  %v1200_v9 = vld [vmem:[%s6030_s7 + $0x1de8] sm:$0xff]  ;;  %v5355_v2 = vpack.c.bf16 %v1091_v56, %v1019_v54  ;;  %v553_v56 = vld [vmem:[%s6030_s7 + $0x9b0] sm:$0xff] }
 0x2dc   : > { %3753 = vmatmul.mubr.f32.vlgmr.msra.gmra.mrb[0].mxu0 %v6822_v27  ;;  %4762 = vmatprep.subr.bf16.mxu1 %v4761_v0  ;;  %v4763_v27 = vpack.c.bf16 %v479_v5, %v407_v4  ;;  %v1236_v0 = vld [vmem:[%s6030_s7 + $0x1f08] sm:$0xff]  ;;  %v1127_v5 = vld [vmem:[%s6030_s7 + $0x1ba0] sm:$0xff] }
 0x2dd   : > { %5336 = vmatpush1.bf16.xpose.msra.mxu0 %v5335_v62  ;;  %3822 = vmatprep.mubr.f32.mxu0 %v1673_v3  ;;  %v1164_v62 = vld [vmem:[%s6030_s7 + $0x1cc8] sm:$0xff]  ;;  %v4781_v3 = vpack.c.bf16 %v1200_v9, %v1128_v57  ;;  %v625_v57 = vld [vmem:[%s6030_s7 + $0xbf0] sm:$0xff] }
 0x2de   : > { %5338 = vmatprep.subr.bf16.mxu0 %v5337_v1  ;;  %v4779_v1 = vpack.c.bf16 %v1055_v60, %v983_v10  ;;  %v5357_v4 = vpack.c.bf16 %v1236_v0, %v1164_v62  ;;  %v1344_v13 = vld [vmem:[%s6030_s7 + $0x2268] sm:$0xff]  ;;  %v589_v9 = vld [vmem:[%s6030_s7 + $0xad0] sm:$0xff]  ;;  %v698_v0 = vld [vmem:[%s6030_s7 + $0xe38] sm:$0xff] }
 0x2df   : > { %v1308_v16 = vld [vmem:[%s6030_s7 + $0x2148] sm:$0xff]  ;;  %v661_v62 = vld [vmem:[%s6030_s7 + $0xd10] sm:$0xff] }
 0x2e3   : > { %4764 = vmatpush1.bf16.xpose.msra.mxu1 %v4763_v27  ;;  %v1380_v27 = vld [vmem:[%s6030_s7 + $0x2388] sm:$0xff] }
 0x2e4   : > { %4766 = vmatprep.subr.bf16.mxu1 %v4765_v12  ;;  %v5359_v12 = vpack.c.bf16 %v1235_v8, %v1163_v7  ;;  %v5361_v29 = vpack.c.bf16 %v1380_v27, %v1308_v16  ;;  %v697_v8 = vld [vmem:[%s6030_s7 + $0xe30] sm:$0xff]  ;;  %v842_v27 = vld [vmem:[%s6030_s7 + $0x12b8] sm:$0xff] }
 0x2e5   : > { %5340 = vmatpush1.bf16.xpose.msra.mxu0 %v5339_v59  ;;  %v4783_v59 = vpack.c.bf16 %v1199_v6, %v1127_v5  ;;  %v5375_v5 = vpack.c.bf16 %v661_v62, %v589_v9  ;;  %v805_v16 = vld [vmem:[%s6030_s7 + $0x1190] sm:$0xff]  ;;  %v268_v62 = vld [vmem:[%s6030_s7 + $0xc8] sm:$0xff] }
 0x2e6   : > { %5342 = vmatprep.subr.bf16.mxu0 %v5341_v17  ;;  %v4785_v17 = vpack.c.bf16 %v1344_v13, %v1272_v11  ;;  %v769_v11 = vld [vmem:[%s6030_s7 + $0x1070] sm:$0xff] }
 0x2e7   : > { %v733_v13 = vld [vmem:[%s6030_s7 + $0xf50] sm:$0xff] }
 0x2e8   : > { %v1381_v9 = vld [vmem:[%s6030_s7 + $0x2390] sm:$0xff] }
 0x2eb   : > { %4768 = vmatpush1.bf16.xpose.msra.mxu1 %v4767_v20  ;;  %v374_v20 = vld [vmem:[%s6030_s7 + $0x418] sm:$0xff] }
 0x2ec   : > { %4770 = vmatprep.subr.bf16.mxu1 %v4769_v22  ;;  %v5363_v22 = vpack.c.bf16 %v1379_v15, %v1307_v26  ;;  %v5365_v24 = vpack.c.bf16 %v374_v20, %v302_v19  ;;  %v841_v15 = vld [vmem:[%s6030_s7 + $0x12b0] sm:$0xff]  ;;  %v986_v20 = vld [vmem:[%s6030_s7 + $0x1738] sm:$0xff] }
 0x2ed   : > { %5344 = vmatpush1.bf16.xpose.msra.mxu0 %v5343_v21  ;;  %v4787_v21 = vpack.c.bf16 %v1343_v14, %v1271_v55  ;;  %v5379_v55 = vpack.c.bf16 %v805_v16, %v733_v13  ;;  %v949_v19 = vld [vmem:[%s6030_s7 + $0x1610] sm:$0xff]  ;;  %v339_v13 = vld [vmem:[%s6030_s7 + $0x300] sm:$0xff] }
 0x2ee   : > { %5346 = vmatprep.subr.bf16.mxu0 %v5345_v23  ;;  %v4789_v23 = vpack.c.bf16 %v338_v18, %v266_v28  ;;  %v913_v28 = vld [vmem:[%s6030_s7 + $0x14f0] sm:$0xff]  ;;  %v303_v16 = vld [vmem:[%s6030_s7 + $0x1e0] sm:$0xff] }
 0x2ef   : > { %v877_v18 = vld [vmem:[%s6030_s7 + $0x13d0] sm:$0xff] }
 0x2f3   : > { %4772 = vmatpush1.bf16.xpose.msra.mxu1 %v4771_v36  ;;  %v482_v36 = vld [vmem:[%s6030_s7 + $0x778] sm:$0xff] }
 0x2f4   : > { %4774 = vmatprep.subr.bf16.mxu1 %v4773_v33  ;;  %v446_v33 = vld [vmem:[%s6030_s7 + $0x658] sm:$0xff]  ;;  %v4793_v38 = vpack.c.bf16 %v482_v36, %v410_v51  ;;  %v1093_v51 = vld [vmem:[%s6030_s7 + $0x1a90] sm:$0xff] }
 0x2f5   : > { %5348 = vmatpush1.bf16.xpose.msra.mxu0 %v5347_v32  ;;  %v6985_v32 = vrot.slane %v1505_v25, %v6070_v47  ;;  %v5369_v40 = vpack.c.bf16 %v518_v48, %v446_v33  ;;  %v5383_v25 = vpack.c.bf16 %v949_v19, %v877_v18  ;;  %v1130_v36 = vld [vmem:[%s6030_s7 + $0x1bb8] sm:$0xff] }
 0x2f6   : > { %5350 = vmatprep.subr.bf16.mxu0 %v5349_v34  ;;  %v4791_v34 = vpack.c.bf16 %v337_v39, %v265_v35  ;;  %v985_v39 = vld [vmem:[%s6030_s7 + $0x1730] sm:$0xff]  ;;  %v1202_v33 = vld [vmem:[%s6030_s7 + $0x1df8] sm:$0xff] }
 0x2f7   : > { %v1521_v41 = vcombine.high %v6985_v32, %v6985_v32  ;;  %v1166_v48 = vld [vmem:[%s6030_s7 + $0x1cd8] sm:$0xff] }
 0x2fb   : > { %4776 = vmatpush1.bf16.xpose.msra.mxu1 %v4775_v46  ;;  %v517_v46 = vld [vmem:[%s6030_s7 + $0x890] sm:$0xff] }
 0x2fc   : > { %4778 = vmatprep.subr.bf16.mxu1 %v4777_v58  ;;  %v626_v58 = vld [vmem:[%s6030_s7 + $0xbf8] sm:$0xff]  ;;  %v5371_v10 = vpack.c.bf16 %v517_v46, %v445_v45  ;;  %v1237_v45 = vld [vmem:[%s6030_s7 + $0x1f10] sm:$0xff] }
 0x2fd   : > { %5352 = vmatpush1.bf16.xpose.msra.mxu0 %v5351_v53  ;;  %v554_v53 = vld [vmem:[%s6030_s7 + $0x9b8] sm:$0xff] }
 0x2fe   : > { %5354 = vmatprep.subr.bf16.mxu0 %v5353_v63  ;;  %v662_v63 = vld [vmem:[%s6030_s7 + $0xd18] sm:$0xff]  ;;  %v4797_v60 = vpack.c.bf16 %v626_v58, %v554_v53 }
 0x2ff   : > { %v1274_v46 = vld [vmem:[%s6030_s7 + $0x2038] sm:$0xff] }
 0x300   : > { %v1346_v53 = vld [vmem:[%s6030_s7 + $0x2278] sm:$0xff] }
 0x301   : > { %v1310_v58 = vld [vmem:[%s6030_s7 + $0x2158] sm:$0xff] }
 0x303   : > { %4780 = vmatpush1.bf16.xpose.msra.mxu1 %v4779_v1  ;;  %v770_v1 = vld [vmem:[%s6030_s7 + $0x1078] sm:$0xff] }
 0x304   : > { %4782 = vmatprep.subr.bf16.mxu1 %v4781_v3  ;;  %v806_v3 = vld [vmem:[%s6030_s7 + $0x1198] sm:$0xff]  ;;  %v4801_v6 = vpack.c.bf16 %v770_v1, %v698_v0  ;;  %v340_v0 = vld [vmem:[%s6030_s7 + $0x308] sm:$0xff] }
 0x305   : > { %5356 = vmatpush1.bf16.xpose.msra.mxu0 %v5355_v2  ;;  %v734_v2 = vld [vmem:[%s6030_s7 + $0xf58] sm:$0xff]  ;;  %v304_v1 = vld [vmem:[%s6030_s7 + $0x1e8] sm:$0xff] }
 0x306   : > { %5358 = vmatprep.subr.bf16.mxu0 %v5357_v4  ;;  %v4799_v4 = vpack.c.bf16 %v625_v57, %v553_v56  ;;  %v5377_v7 = vpack.c.bf16 %v806_v3, %v734_v2  ;;  %v1345_v56 = vld [vmem:[%s6030_s7 + $0x2270] sm:$0xff]  ;;  %v376_v2 = vld [vmem:[%s6030_s7 + $0x428] sm:$0xff] }
 0x307   : > { %v1309_v57 = vld [vmem:[%s6030_s7 + $0x2150] sm:$0xff] }
 0x30b   : > { %4784 = vmatpush1.bf16.xpose.msra.mxu1 %v4783_v59  ;;  %v914_v59 = vld [vmem:[%s6030_s7 + $0x14f8] sm:$0xff] }
 0x30c   : > { %4786 = vmatprep.subr.bf16.mxu1 %v4785_v17  ;;  %v950_v17 = vld [vmem:[%s6030_s7 + $0x1618] sm:$0xff]  ;;  %v4805_v14 = vpack.c.bf16 %v914_v59, %v842_v27  ;;  %v375_v27 = vld [vmem:[%s6030_s7 + $0x420] sm:$0xff]  ;;  %v412_v59 = vld [vmem:[%s6030_s7 + $0x548] sm:$0xff] }
 0x30d   : > { %5360 = vmatpush1.bf16.xpose.msra.mxu0 %v5359_v12  ;;  %v878_v12 = vld [vmem:[%s6030_s7 + $0x13d8] sm:$0xff] }
 0x30e   : > { %5362 = vmatprep.subr.bf16.mxu0 %v5361_v29  ;;  %v4803_v29 = vpack.c.bf16 %v769_v11, %v697_v8  ;;  %v5381_v26 = vpack.c.bf16 %v950_v17, %v878_v12  ;;  %v7062_v8 = vld [vmem:[%s7607_s0 + $0x78] sm:$0xff]  ;;  %v267_v11 = vld [vmem:[%s6030_s7 + $0xc0] sm:$0xff]  ;;  %v484_v12 = vld [vmem:[%s6030_s7 + $0x788] sm:$0xff] }
 0x313   : > { %4788 = vmatpush1.bf16.xpose.msra.mxu1 %v4787_v21  ;;  %v1058_v21 = vld [vmem:[%s6030_s7 + $0x1978] sm:$0xff] }
 0x314   : > { %4790 = vmatprep.subr.bf16.mxu1 %v4789_v23  ;;  %v1094_v23 = vld [vmem:[%s6030_s7 + $0x1a98] sm:$0xff]  ;;  %v4809_v30 = vpack.c.bf16 %v1058_v21, %v986_v20  ;;  %v411_v21 = vld [vmem:[%s6030_s7 + $0x540] sm:$0xff] }
 0x315   : > { %5364 = vmatpush1.bf16.xpose.msra.mxu0 %v5363_v22  ;;  %v1022_v22 = vld [vmem:[%s6030_s7 + $0x1858] sm:$0xff] }
 0x316   : > { %5366 = vmatprep.subr.bf16.mxu0 %v5365_v24  ;;  %v4807_v24 = vpack.c.bf16 %v913_v28, %v841_v15  ;;  %v5385_v35 = vpack.c.bf16 %v1094_v23, %v1022_v22  ;;  %v5399_v15 = vpack.c.bf16 %v375_v27, %v303_v16  ;;  %v4825_v28 = vpack.c.bf16 %v484_v12, %v412_v59  ;;  %v483_v22 = vld [vmem:[%s6030_s7 + $0x780] sm:$0xff] }
 0x317   : > { %v447_v23 = vld [vmem:[%s6030_s7 + $0x660] sm:$0xff] }
 0x318   : > { %v987_v27 = vld [vmem:[%s6030_s7 + $0x1740] sm:$0xff] }
 0x319   : > { %v1059_v59 = vld [vmem:[%s6030_s7 + $0x1980] sm:$0xff] }
 0x31a   : > { %2563 = vmatmul.mubr.f32.vlgmr.msra.gmra.mrb[0].mxu1 %v6904_v52  ;;  %v590_v52 = vld [vmem:[%s6030_s7 + $0xad8] sm:$0xff]  ;;  %v1023_v12 = vld [vmem:[%s6030_s7 + $0x1860] sm:$0xff] }
 0x31b   : > { %4792 = vmatpush1.bf16.xpose.msra.mxu1 %v4791_v34  ;;  %2632 = vmatprep.mubr.f32.mxu1 %v1521_v41  ;;  %v5373_v54 = vpack.c.bf16 %v662_v63, %v590_v52  ;;  %v1238_v34 = vld [vmem:[%s6030_s7 + $0x1f18] sm:$0xff] }
 0x31c   : > { %3823 = vmatmul.mubr.f32.vlgmr.msra.gmra.mrb[0].mxu0 %v6910_v61  ;;  %4794 = vmatprep.subr.bf16.mxu1 %v4793_v38  ;;  %v4795_v61 = vpack.c.bf16 %v481_v44, %v409_v43  ;;  %v5387_v38 = vpack.c.bf16 %v1093_v51, %v1021_v37  ;;  %v5389_v41 = vpack.c.bf16 %v1238_v34, %v1166_v48  ;;  %v1201_v43 = vld [vmem:[%s6030_s7 + $0x1df0] sm:$0xff]  ;;  %v1382_v52 = vld [vmem:[%s6030_s7 + $0x2398] sm:$0xff]  ;;  %v555_v51 = vld [vmem:[%s6030_s7 + $0x9c0] sm:$0xff] }
 0x31d   : > { %5368 = vmatpush1.bf16.xpose.msra.mxu0 %v5367_v50  ;;  %3892 = vmatprep.mubr.f32.mxu0 %v1674_v42  ;;  %v4811_v50 = vpack.c.bf16 %v1057_v31, %v985_v39  ;;  %v1129_v42 = vld [vmem:[%s6030_s7 + $0x1bb0] sm:$0xff]  ;;  %v663_v48 = vld [vmem:[%s6030_s7 + $0xd20] sm:$0xff]  ;;  %v700_v34 = vld [vmem:[%s6030_s7 + $0xe48] sm:$0xff] }
 0x31e   : > { %5370 = vmatprep.subr.bf16.mxu0 %v5369_v40  ;;  %v4813_v40 = vpack.c.bf16 %v1202_v33, %v1130_v36  ;;  %v1165_v44 = vld [vmem:[%s6030_s7 + $0x1cd0] sm:$0xff]  ;;  %v4815_v63 = vpack.c.bf16 %v1201_v43, %v1129_v42  ;;  %v627_v36 = vld [vmem:[%s6030_s7 + $0xc00] sm:$0xff] }
 0x31f   : > { %v591_v33 = vld [vmem:[%s6030_s7 + $0xae0] sm:$0xff] }
 0x320   : > { %v5407_v42 = vpack.c.bf16 %v663_v48, %v591_v33  ;;  %v1347_v33 = vld [vmem:[%s6030_s7 + $0x2280] sm:$0xff] }
 0x321   : > { %v1311_v48 = vld [vmem:[%s6030_s7 + $0x2160] sm:$0xff] }
 0x323   : > { %4796 = vmatpush1.bf16.xpose.msra.mxu1 %v4795_v61  ;;  %v5391_v61 = vpack.c.bf16 %v1237_v45, %v1165_v44  ;;  %v699_v45 = vld [vmem:[%s6030_s7 + $0xe40] sm:$0xff] }
 0x324   : > { %4798 = vmatprep.subr.bf16.mxu1 %v4797_v60  ;;  %v5393_v60 = vpack.c.bf16 %v1382_v52, %v1310_v58  ;;  %v807_v58 = vld [vmem:[%s6030_s7 + $0x11a0] sm:$0xff]  ;;  %v844_v52 = vld [vmem:[%s6030_s7 + $0x12c8] sm:$0xff] }
 0x325   : > { %5372 = vmatpush1.bf16.xpose.msra.mxu0 %v5371_v10  ;;  %v4817_v10 = vpack.c.bf16 %v1346_v53, %v1274_v46  ;;  %v771_v46 = vld [vmem:[%s6030_s7 + $0x1080] sm:$0xff] }
 0x326   : > { %5374 = vmatprep.subr.bf16.mxu0 %v5373_v54  ;;  %v1273_v54 = vld [vmem:[%s6030_s7 + $0x2030] sm:$0xff]  ;;  %v735_v53 = vld [vmem:[%s6030_s7 + $0xf60] sm:$0xff] }
 0x327   : > { %v4819_v3 = vpack.c.bf16 %v1345_v56, %v1273_v54  ;;  %v5411_v54 = vpack.c.bf16 %v807_v58, %v735_v53  ;;  %v1675_v53 = vcombine.high %v7062_v8, %v7062_v8  ;;  %v269_v58 = vld [vmem:[%s6030_s7 + $0xd0] sm:$0xff] }
 0x32b   : > { %4800 = vmatpush1.bf16.xpose.msra.mxu1 %v4799_v4  ;;  %v5395_v4 = vpack.c.bf16 %v1381_v9, %v1309_v57  ;;  %v843_v9 = vld [vmem:[%s6030_s7 + $0x12c0] sm:$0xff] }
 0x32c   : > { %4802 = vmatprep.subr.bf16.mxu1 %v4801_v6  ;;  %v5397_v6 = vpack.c.bf16 %v376_v2, %v304_v1  ;;  %v951_v1 = vld [vmem:[%s6030_s7 + $0x1620] sm:$0xff]  ;;  %v988_v2 = vld [vmem:[%s6030_s7 + $0x1748] sm:$0xff] }
 0x32d   : > { %5376 = vmatpush1.bf16.xpose.msra.mxu0 %v5375_v5  ;;  %v4821_v5 = vpack.c.bf16 %v340_v0, %v268_v62  ;;  %v915_v62 = vld [vmem:[%s6030_s7 + $0x1500] sm:$0xff] }
 0x32e   : > { %5378 = vmatprep.subr.bf16.mxu0 %v5377_v7  ;;  %v7057_v7 = vld [vmem:[%s7607_s0 + $0x30] sm:$0xff]  ;;  %v879_v0 = vld [vmem:[%s6030_s7 + $0x13e0] sm:$0xff] }
 0x32f   : > { %v7072_v17 = vrot.slane %v7057_v7, %v6070_v47 }
 0x331   : > { %v1537_v19 = vcombine.high %v7072_v17, %v7072_v17 }
 0x333   : > { %4804 = vmatpush1.bf16.xpose.msra.mxu1 %v4803_v29  ;;  %v448_v29 = vld [vmem:[%s6030_s7 + $0x668] sm:$0xff] }
 0x334   : > { %4806 = vmatprep.subr.bf16.mxu1 %v4805_v14  ;;  %v7078_v14 = vrot.slane %v7062_v8, %v6070_v47  ;;  %v7158_v8 = vrot.slane %v1675_v53, %v6070_v47 }
 0x335   : > { %5380 = vmatpush1.bf16.xpose.msra.mxu0 %v5379_v55  ;;  %v520_v55 = vld [vmem:[%s6030_s7 + $0x8a8] sm:$0xff] }
 0x336   : > { %5382 = vmatprep.subr.bf16.mxu0 %v5381_v26  ;;  %v4823_v26 = vpack.c.bf16 %v339_v13, %v267_v11  ;;  %v5401_v18 = vpack.c.bf16 %v520_v55, %v448_v29  ;;  %v1690_v20 = vcombine.high %v7078_v14, %v7078_v14  ;;  %v5415_v11 = vpack.c.bf16 %v951_v1, %v879_v0  ;;  %v1095_v29 = vld [vmem:[%s6030_s7 + $0x1aa0] sm:$0xff]  ;;  %v1132_v55 = vld [vmem:[%s6030_s7 + $0x1bc8] sm:$0xff] }
 0x33b   : > { %4808 = vmatpush1.bf16.xpose.msra.mxu1 %v4807_v24  ;;  %v519_v24 = vld [vmem:[%s6030_s7 + $0x8a0] sm:$0xff] }
 0x33c   : > { %4810 = vmatprep.subr.bf16.mxu1 %v4809_v30  ;;  %v628_v30 = vld [vmem:[%s6030_s7 + $0xc08] sm:$0xff]  ;;  %v5403_v39 = vpack.c.bf16 %v519_v24, %v447_v23  ;;  %v1203_v23 = vld [vmem:[%s6030_s7 + $0x1e00] sm:$0xff] }
 0x33d   : > { %5384 = vmatpush1.bf16.xpose.msra.mxu0 %v5383_v25  ;;  %v556_v25 = vld [vmem:[%s6030_s7 + $0x9c8] sm:$0xff]  ;;  %v1167_v24 = vld [vmem:[%s6030_s7 + $0x1ce0] sm:$0xff] }
 0x33e   : > { %5386 = vmatprep.subr.bf16.mxu0 %v5385_v35  ;;  %v664_v35 = vld [vmem:[%s6030_s7 + $0xd28] sm:$0xff]  ;;  %v4829_v31 = vpack.c.bf16 %v628_v30, %v556_v25  ;;  %v1239_v25 = vld [vmem:[%s6030_s7 + $0x1f20] sm:$0xff] }
 0x33f   : > { %v1276_v30 = vld [vmem:[%s6030_s7 + $0x2048] sm:$0xff] }
 0x343   : > { %4812 = vmatpush1.bf16.xpose.msra.mxu1 %v4811_v50  ;;  %v772_v50 = vld [vmem:[%s6030_s7 + $0x1088] sm:$0xff] }
 0x344   : > { %4814 = vmatprep.subr.bf16.mxu1 %v4813_v40  ;;  %v808_v40 = vld [vmem:[%s6030_s7 + $0x11a8] sm:$0xff]  ;;  %v4833_v43 = vpack.c.bf16 %v772_v50, %v700_v34  ;;  %v1383_v34 = vld [vmem:[%s6030_s7 + $0x23a0] sm:$0xff]  ;;  %v270_v50 = vld [vmem:[%s6030_s7 + $0xd8] sm:$0xff] }
 0x345   : > { %5388 = vmatpush1.bf16.xpose.msra.mxu0 %v5387_v38  ;;  %v736_v38 = vld [vmem:[%s6030_s7 + $0xf68] sm:$0xff] }
 0x346   : > { %5390 = vmatprep.subr.bf16.mxu0 %v5389_v41  ;;  %v4831_v41 = vpack.c.bf16 %v627_v36, %v555_v51  ;;  %v5409_v44 = vpack.c.bf16 %v808_v40, %v736_v38  ;;  %v1275_v36 = vld [vmem:[%s6030_s7 + $0x2040] sm:$0xff]  ;;  %v342_v38 = vld [vmem:[%s6030_s7 + $0x318] sm:$0xff] }
 0x347   : > { %v306_v40 = vld [vmem:[%s6030_s7 + $0x1f8] sm:$0xff] }
 0x34b   : > { %4816 = vmatpush1.bf16.xpose.msra.mxu1 %v4815_v63  ;;  %v916_v63 = vld [vmem:[%s6030_s7 + $0x1508] sm:$0xff] }
 0x34c   : > { %4818 = vmatprep.subr.bf16.mxu1 %v4817_v10  ;;  %v952_v10 = vld [vmem:[%s6030_s7 + $0x1628] sm:$0xff]  ;;  %v4837_v56 = vpack.c.bf16 %v916_v63, %v844_v52  ;;  %v341_v52 = vld [vmem:[%s6030_s7 + $0x310] sm:$0xff] }
 0x34d   : > { %5392 = vmatpush1.bf16.xpose.msra.mxu0 %v5391_v61  ;;  %v880_v61 = vld [vmem:[%s6030_s7 + $0x13e8] sm:$0xff]  ;;  %v305_v63 = vld [vmem:[%s6030_s7 + $0x1f0] sm:$0xff] }
 0x34e   : > { %5394 = vmatprep.subr.bf16.mxu0 %v5393_v60  ;;  %v4835_v60 = vpack.c.bf16 %v771_v46, %v699_v45  ;;  %v5413_v57 = vpack.c.bf16 %v952_v10, %v880_v61  ;;  %v1522_v46 = vcombine.high %v7057_v7, %v7057_v7  ;;  %v377_v61 = vld [vmem:[%s6030_s7 + $0x430] sm:$0xff]  ;;  %v414_v10 = vld [vmem:[%s6030_s7 + $0x558] sm:$0xff] }
 0x34f   : > { %v522_v7 = vld [vmem:[%s6030_s7 + $0x8b8] sm:$0xff] }
 0x353   : > { %4820 = vmatpush1.bf16.xpose.msra.mxu1 %v4819_v3  ;;  %v1060_v3 = vld [vmem:[%s6030_s7 + $0x1988] sm:$0xff] }
 0x354   : > { %4822 = vmatprep.subr.bf16.mxu1 %v4821_v5  ;;  %v1096_v5 = vld [vmem:[%s6030_s7 + $0x1aa8] sm:$0xff]  ;;  %v4841_v13 = vpack.c.bf16 %v1060_v3, %v988_v2  ;;  %v1691_v2 = vcombine.high %v7158_v8, %v7158_v8  ;;  %v413_v3 = vld [vmem:[%s6030_s7 + $0x550] sm:$0xff] }
 0x355   : > { %5396 = vmatpush1.bf16.xpose.msra.mxu0 %v5395_v4  ;;  %v1024_v4 = vld [vmem:[%s6030_s7 + $0x1868] sm:$0xff] }
 0x356   : > { %5398 = vmatprep.subr.bf16.mxu0 %v5397_v6  ;;  %v4839_v6 = vpack.c.bf16 %v915_v62, %v843_v9  ;;  %v5417_v16 = vpack.c.bf16 %v1096_v5, %v1024_v4  ;;  %v5431_v9 = vpack.c.bf16 %v377_v61, %v305_v63  ;;  %v485_v4 = vld [vmem:[%s6030_s7 + $0x790] sm:$0xff] }
 0x357   : > { %v449_v5 = vld [vmem:[%s6030_s7 + $0x670] sm:$0xff] }
 0x358   : > { %v1061_v63 = vld [vmem:[%s6030_s7 + $0x1990] sm:$0xff] }
 0x359   : > { %v1025_v61 = vld [vmem:[%s6030_s7 + $0x1870] sm:$0xff] }
 0x35a   : > { %2633 = vmatmul.mubr.f32.vlgmr.msra.gmra.mrb[0].mxu1 %v6985_v32  ;;  %v592_v32 = vld [vmem:[%s6030_s7 + $0xae8] sm:$0xff] }
 0x35b   : > { %4824 = vmatpush1.bf16.xpose.msra.mxu1 %v4823_v26  ;;  %2702 = vmatprep.mubr.f32.mxu1 %v1537_v19  ;;  %v5405_v37 = vpack.c.bf16 %v664_v35, %v592_v32  ;;  %v1204_v26 = vld [vmem:[%s6030_s7 + $0x1e08] sm:$0xff]  ;;  %v5419_v19 = vpack.c.bf16 %v1095_v29, %v1023_v12  ;;  %v557_v29 = vld [vmem:[%s6030_s7 + $0x9d0] sm:$0xff] }
 0x35c   : > { %3893 = vmatmul.mubr.f32.vlgmr.msra.gmra.mrb[0].mxu0 %v6990_v49  ;;  %4826 = vmatprep.subr.bf16.mxu1 %v4825_v28  ;;  %v4827_v49 = vpack.c.bf16 %v483_v22, %v411_v21  ;;  %v1240_v28 = vld [vmem:[%s6030_s7 + $0x1f28] sm:$0xff]  ;;  %v1131_v22 = vld [vmem:[%s6030_s7 + $0x1bc0] sm:$0xff] }
 0x35d   : > { %5400 = vmatpush1.bf16.xpose.msra.mxu0 %v5399_v15  ;;  %3962 = vmatprep.mubr.f32.mxu0 %v1690_v20  ;;  %v1168_v15 = vld [vmem:[%s6030_s7 + $0x1ce8] sm:$0xff]  ;;  %v4845_v20 = vpack.c.bf16 %v1204_v26, %v1132_v55  ;;  %v629_v55 = vld [vmem:[%s6030_s7 + $0xc10] sm:$0xff] }
 0x35e   : > { %5402 = vmatprep.subr.bf16.mxu0 %v5401_v18  ;;  %v4843_v18 = vpack.c.bf16 %v1059_v59, %v987_v27  ;;  %v5421_v21 = vpack.c.bf16 %v1240_v28, %v1168_v15  ;;  %v1348_v32 = vld [vmem:[%s6030_s7 + $0x2288] sm:$0xff]  ;;  %v593_v26 = vld [vmem:[%s6030_s7 + $0xaf0] sm:$0xff]  ;;  %v702_v28 = vld [vmem:[%s6030_s7 + $0xe58] sm:$0xff] }
 0x35f   : > { %v1312_v35 = vld [vmem:[%s6030_s7 + $0x2168] sm:$0xff]  ;;  %v665_v15 = vld [vmem:[%s6030_s7 + $0xd30] sm:$0xff] }
 0x363   : > { %4828 = vmatpush1.bf16.xpose.msra.mxu1 %v4827_v49  ;;  %v1384_v49 = vld [vmem:[%s6030_s7 + $0x23a8] sm:$0xff] }
 0x364   : > { %4830 = vmatprep.subr.bf16.mxu1 %v4829_v31  ;;  %v5423_v31 = vpack.c.bf16 %v1239_v25, %v1167_v24  ;;  %v5425_v51 = vpack.c.bf16 %v1384_v49, %v1312_v35  ;;  %v701_v25 = vld [vmem:[%s6030_s7 + $0xe50] sm:$0xff]  ;;  %v846_v49 = vld [vmem:[%s6030_s7 + $0x12d8] sm:$0xff] }
 0x365   : > { %5404 = vmatpush1.bf16.xpose.msra.mxu0 %v5403_v39  ;;  %v4847_v39 = vpack.c.bf16 %v1203_v23, %v1131_v22  ;;  %v5439_v22 = vpack.c.bf16 %v665_v15, %v593_v26  ;;  %v809_v35 = vld [vmem:[%s6030_s7 + $0x11b0] sm:$0xff]  ;;  %v272_v15 = vld [vmem:[%s6030_s7 + $0xe8] sm:$0xff] }
 0x366   : > { %5406 = vmatprep.subr.bf16.mxu0 %v5405_v37  ;;  %v4849_v37 = vpack.c.bf16 %v1348_v32, %v1276_v30  ;;  %v773_v30 = vld [vmem:[%s6030_s7 + $0x1090] sm:$0xff] }
 0x367   : > { %v737_v32 = vld [vmem:[%s6030_s7 + $0xf70] sm:$0xff] }
 0x368   : > { %v1385_v26 = vld [vmem:[%s6030_s7 + $0x23b0] sm:$0xff] }
 0x36b   : > { %4832 = vmatpush1.bf16.xpose.msra.mxu1 %v4831_v41  ;;  %v378_v41 = vld [vmem:[%s6030_s7 + $0x438] sm:$0xff] }
 0x36c   : > { %4834 = vmatprep.subr.bf16.mxu1 %v4833_v43  ;;  %v5427_v43 = vpack.c.bf16 %v1383_v34, %v1311_v48  ;;  %v5429_v45 = vpack.c.bf16 %v378_v41, %v306_v40  ;;  %v845_v34 = vld [vmem:[%s6030_s7 + $0x12d0] sm:$0xff]  ;;  %v990_v41 = vld [vmem:[%s6030_s7 + $0x1758] sm:$0xff] }
 0x36d   : > { %5408 = vmatpush1.bf16.xpose.msra.mxu0 %v5407_v42  ;;  %v4851_v42 = vpack.c.bf16 %v1347_v33, %v1275_v36  ;;  %v5443_v36 = vpack.c.bf16 %v809_v35, %v737_v32  ;;  %v953_v40 = vld [vmem:[%s6030_s7 + $0x1630] sm:$0xff]  ;;  %v343_v32 = vld [vmem:[%s6030_s7 + $0x320] sm:$0xff] }
 0x36e   : > { %5410 = vmatprep.subr.bf16.mxu0 %v5409_v44  ;;  %v4853_v44 = vpack.c.bf16 %v342_v38, %v270_v50  ;;  %v917_v50 = vld [vmem:[%s6030_s7 + $0x1510] sm:$0xff]  ;;  %v307_v35 = vld [vmem:[%s6030_s7 + $0x200] sm:$0xff] }
 0x36f   : > { %v881_v38 = vld [vmem:[%s6030_s7 + $0x13f0] sm:$0xff] }
 0x373   : > { %4836 = vmatpush1.bf16.xpose.msra.mxu1 %v4835_v60  ;;  %v486_v60 = vld [vmem:[%s6030_s7 + $0x798] sm:$0xff] }
 0x374   : > { %4838 = vmatprep.subr.bf16.mxu1 %v4837_v56  ;;  %v450_v56 = vld [vmem:[%s6030_s7 + $0x678] sm:$0xff]  ;;  %v4857_v62 = vpack.c.bf16 %v486_v60, %v414_v10  ;;  %v1097_v10 = vld [vmem:[%s6030_s7 + $0x1ab0] sm:$0xff] }
 0x375   : > { %5412 = vmatpush1.bf16.xpose.msra.mxu0 %v5411_v54  ;;  %v7153_v54 = vrot.slane %v1522_v46, %v6070_v47  ;;  %v5433_v0 = vpack.c.bf16 %v522_v7, %v450_v56  ;;  %v5447_v46 = vpack.c.bf16 %v953_v40, %v881_v38  ;;  %v1134_v60 = vld [vmem:[%s6030_s7 + $0x1bd8] sm:$0xff] }
 0x376   : > { %5414 = vmatprep.subr.bf16.mxu0 %v5413_v57  ;;  %v4855_v57 = vpack.c.bf16 %v341_v52, %v269_v58  ;;  %v989_v52 = vld [vmem:[%s6030_s7 + $0x1750] sm:$0xff]  ;;  %v1206_v56 = vld [vmem:[%s6030_s7 + $0x1e18] sm:$0xff] }
 0x377   : > { %v1538_v1 = vcombine.high %v7153_v54, %v7153_v54  ;;  %v1170_v7 = vld [vmem:[%s6030_s7 + $0x1cf8] sm:$0xff] }
 0x37b   : > { %4840 = vmatpush1.bf16.xpose.msra.mxu1 %v4839_v6  ;;  %v521_v6 = vld [vmem:[%s6030_s7 + $0x8b0] sm:$0xff] }
 0x37c   : > { %4842 = vmatprep.subr.bf16.mxu1 %v4841_v13  ;;  %v630_v13 = vld [vmem:[%s6030_s7 + $0xc18] sm:$0xff]  ;;  %v5435_v27 = vpack.c.bf16 %v521_v6, %v449_v5  ;;  %v1241_v5 = vld [vmem:[%s6030_s7 + $0x1f30] sm:$0xff] }
 0x37d   : > { %5416 = vmatpush1.bf16.xpose.msra.mxu0 %v5415_v11  ;;  %v558_v11 = vld [vmem:[%s6030_s7 + $0x9d8] sm:$0xff] }
 0x37e   : > { %5418 = vmatprep.subr.bf16.mxu0 %v5417_v16  ;;  %v666_v16 = vld [vmem:[%s6030_s7 + $0xd38] sm:$0xff]  ;;  %v4861_v59 = vpack.c.bf16 %v630_v13, %v558_v11 }
 0x37f   : > { %v1278_v6 = vld [vmem:[%s6030_s7 + $0x2058] sm:$0xff] }
 0x380   : > { %v1350_v11 = vld [vmem:[%s6030_s7 + $0x2298] sm:$0xff] }
 0x381   : > { %v1314_v13 = vld [vmem:[%s6030_s7 + $0x2178] sm:$0xff] }
 0x383   : > { %4844 = vmatpush1.bf16.xpose.msra.mxu1 %v4843_v18  ;;  %v774_v18 = vld [vmem:[%s6030_s7 + $0x1098] sm:$0xff] }
 0x384   : > { %4846 = vmatprep.subr.bf16.mxu1 %v4845_v20  ;;  %v810_v20 = vld [vmem:[%s6030_s7 + $0x11b8] sm:$0xff]  ;;  %v4865_v23 = vpack.c.bf16 %v774_v18, %v702_v28  ;;  %v344_v28 = vld [vmem:[%s6030_s7 + $0x328] sm:$0xff] }
 0x385   : > { %5420 = vmatpush1.bf16.xpose.msra.mxu0 %v5419_v19  ;;  %v738_v19 = vld [vmem:[%s6030_s7 + $0xf78] sm:$0xff]  ;;  %v308_v18 = vld [vmem:[%s6030_s7 + $0x208] sm:$0xff] }
 0x386   : > { %5422 = vmatprep.subr.bf16.mxu0 %v5421_v21  ;;  %v4863_v21 = vpack.c.bf16 %v629_v55, %v557_v29  ;;  %v5441_v24 = vpack.c.bf16 %v810_v20, %v738_v19  ;;  %v1349_v29 = vld [vmem:[%s6030_s7 + $0x2290] sm:$0xff]  ;;  %v380_v19 = vld [vmem:[%s6030_s7 + $0x448] sm:$0xff] }
 0x387   : > { %v1313_v55 = vld [vmem:[%s6030_s7 + $0x2170] sm:$0xff] }
 0x38b   : > { %4848 = vmatpush1.bf16.xpose.msra.mxu1 %v4847_v39  ;;  %v918_v39 = vld [vmem:[%s6030_s7 + $0x1518] sm:$0xff] }
 0x38c   : > { %4850 = vmatprep.subr.bf16.mxu1 %v4849_v37  ;;  %v954_v37 = vld [vmem:[%s6030_s7 + $0x1638] sm:$0xff]  ;;  %v4869_v33 = vpack.c.bf16 %v918_v39, %v846_v49  ;;  %v379_v49 = vld [vmem:[%s6030_s7 + $0x440] sm:$0xff]  ;;  %v416_v39 = vld [vmem:[%s6030_s7 + $0x568] sm:$0xff] }
 0x38d   : > { %5424 = vmatpush1.bf16.xpose.msra.mxu0 %v5423_v31  ;;  %v882_v31 = vld [vmem:[%s6030_s7 + $0x13f8] sm:$0xff] }
 0x38e   : > { %5426 = vmatprep.subr.bf16.mxu0 %v5425_v51  ;;  %v4867_v51 = vpack.c.bf16 %v773_v30, %v701_v25  ;;  %v5445_v48 = vpack.c.bf16 %v954_v37, %v882_v31  ;;  %v7230_v25 = vld [vmem:[%s7607_s0 + $0x80] sm:$0xff]  ;;  %v488_v31 = vld [vmem:[%s6030_s7 + $0x7a8] sm:$0xff] }
 0x38f   : > { %v271_v30 = vld [vmem:[%s6030_s7 + $0xe0] sm:$0xff] }
 0x393   : > { %4852 = vmatpush1.bf16.xpose.msra.mxu1 %v4851_v42  ;;  %v1062_v42 = vld [vmem:[%s6030_s7 + $0x1998] sm:$0xff] }
 0x394   : > { %4854 = vmatprep.subr.bf16.mxu1 %v4853_v44  ;;  %v1098_v44 = vld [vmem:[%s6030_s7 + $0x1ab8] sm:$0xff]  ;;  %v4873_v53 = vpack.c.bf16 %v1062_v42, %v990_v41  ;;  %v415_v42 = vld [vmem:[%s6030_s7 + $0x560] sm:$0xff] }
 0x395   : > { %5428 = vmatpush1.bf16.xpose.msra.mxu0 %v5427_v43  ;;  %v1026_v43 = vld [vmem:[%s6030_s7 + $0x1878] sm:$0xff] }
 0x396   : > { %5430 = vmatprep.subr.bf16.mxu0 %v5429_v45  ;;  %v4871_v45 = vpack.c.bf16 %v917_v50, %v845_v34  ;;  %v5449_v58 = vpack.c.bf16 %v1098_v44, %v1026_v43  ;;  %v5463_v34 = vpack.c.bf16 %v379_v49, %v307_v35  ;;  %v4889_v50 = vpack.c.bf16 %v488_v31, %v416_v39  ;;  %v487_v43 = vld [vmem:[%s6030_s7 + $0x7a0] sm:$0xff] }
 0x397   : > { %v451_v44 = vld [vmem:[%s6030_s7 + $0x680] sm:$0xff] }
 0x398   : > { %v991_v49 = vld [vmem:[%s6030_s7 + $0x1760] sm:$0xff] }
 0x399   : > { %v1063_v39 = vld [vmem:[%s6030_s7 + $0x19a0] sm:$0xff] }
 0x39a   : > { %2703 = vmatmul.mubr.f32.vlgmr.msra.gmra.mrb[0].mxu1 %v7072_v17  ;;  %v594_v17 = vld [vmem:[%s6030_s7 + $0xaf8] sm:$0xff]  ;;  %v1027_v31 = vld [vmem:[%s6030_s7 + $0x1880] sm:$0xff] }
 0x39b   : > { %4856 = vmatpush1.bf16.xpose.msra.mxu1 %v4855_v57  ;;  %2772 = vmatprep.mubr.f32.mxu1 %v1538_v1  ;;  %v5437_v12 = vpack.c.bf16 %v666_v16, %v594_v17  ;;  %v1242_v57 = vld [vmem:[%s6030_s7 + $0x1f38] sm:$0xff] }
 0x39c   : > { %3963 = vmatmul.mubr.f32.vlgmr.msra.gmra.mrb[0].mxu0 %v7078_v14  ;;  %4858 = vmatprep.subr.bf16.mxu1 %v4857_v62  ;;  %v4859_v14 = vpack.c.bf16 %v485_v4, %v413_v3  ;;  %v5451_v62 = vpack.c.bf16 %v1097_v10, %v1025_v61  ;;  %v5453_v1 = vpack.c.bf16 %v1242_v57, %v1170_v7  ;;  %v1205_v3 = vld [vmem:[%s6030_s7 + $0x1e10] sm:$0xff]  ;;  %v1386_v17 = vld [vmem:[%s6030_s7 + $0x23b8] sm:$0xff]  ;;  %v559_v10 = vld [vmem:[%s6030_s7 + $0x9e0] sm:$0xff] }
 0x39d   : > { %5432 = vmatpush1.bf16.xpose.msra.mxu0 %v5431_v9  ;;  %4032 = vmatprep.mubr.f32.mxu0 %v1691_v2  ;;  %v4875_v9 = vpack.c.bf16 %v1061_v63, %v989_v52  ;;  %v1133_v2 = vld [vmem:[%s6030_s7 + $0x1bd0] sm:$0xff]  ;;  %v667_v7 = vld [vmem:[%s6030_s7 + $0xd40] sm:$0xff]  ;;  %v704_v57 = vld [vmem:[%s6030_s7 + $0xe68] sm:$0xff] }
 0x39e   : > { %5434 = vmatprep.subr.bf16.mxu0 %v5433_v0  ;;  %v4877_v0 = vpack.c.bf16 %v1206_v56, %v1134_v60  ;;  %v1169_v4 = vld [vmem:[%s6030_s7 + $0x1cf0] sm:$0xff]  ;;  %v4879_v16 = vpack.c.bf16 %v1205_v3, %v1133_v2  ;;  %v631_v60 = vld [vmem:[%s6030_s7 + $0xc20] sm:$0xff] }
 0x39f   : > { %v595_v56 = vld [vmem:[%s6030_s7 + $0xb00] sm:$0xff] }
 0x3a0   : > { %v5471_v2 = vpack.c.bf16 %v667_v7, %v595_v56  ;;  %v1351_v56 = vld [vmem:[%s6030_s7 + $0x22a0] sm:$0xff] }
 0x3a1   : > { %v1315_v7 = vld [vmem:[%s6030_s7 + $0x2180] sm:$0xff] }
 0x3a3   : > { %4860 = vmatpush1.bf16.xpose.msra.mxu1 %v4859_v14  ;;  %v5455_v14 = vpack.c.bf16 %v1241_v5, %v1169_v4  ;;  %v703_v5 = vld [vmem:[%s6030_s7 + $0xe60] sm:$0xff] }
 0x3a4   : > { %4862 = vmatprep.subr.bf16.mxu1 %v4861_v59  ;;  %v5457_v59 = vpack.c.bf16 %v1386_v17, %v1314_v13  ;;  %v811_v13 = vld [vmem:[%s6030_s7 + $0x11c0] sm:$0xff]  ;;  %v848_v17 = vld [vmem:[%s6030_s7 + $0x12e8] sm:$0xff] }
 0x3a5   : > { %5436 = vmatpush1.bf16.xpose.msra.mxu0 %v5435_v27  ;;  %v4881_v27 = vpack.c.bf16 %v1350_v11, %v1278_v6  ;;  %v775_v6 = vld [vmem:[%s6030_s7 + $0x10a0] sm:$0xff] }
 0x3a6   : > { %5438 = vmatprep.subr.bf16.mxu0 %v5437_v12  ;;  %v1277_v12 = vld [vmem:[%s6030_s7 + $0x2050] sm:$0xff]  ;;  %v739_v11 = vld [vmem:[%s6030_s7 + $0xf80] sm:$0xff] }
 0x3a7   : > { %v4883_v20 = vpack.c.bf16 %v1349_v29, %v1277_v12  ;;  %v5475_v12 = vpack.c.bf16 %v811_v13, %v739_v11  ;;  %v1692_v11 = vcombine.high %v7230_v25, %v7230_v25  ;;  %v273_v13 = vld [vmem:[%s6030_s7 + $0xf0] sm:$0xff] }
 0x3ab   : > { %4864 = vmatpush1.bf16.xpose.msra.mxu1 %v4863_v21  ;;  %v5459_v21 = vpack.c.bf16 %v1385_v26, %v1313_v55  ;;  %v847_v26 = vld [vmem:[%s6030_s7 + $0x12e0] sm:$0xff] }
 0x3ac   : > { %4866 = vmatprep.subr.bf16.mxu1 %v4865_v23  ;;  %v5461_v23 = vpack.c.bf16 %v380_v19, %v308_v18  ;;  %v955_v18 = vld [vmem:[%s6030_s7 + $0x1640] sm:$0xff]  ;;  %v992_v19 = vld [vmem:[%s6030_s7 + $0x1768] sm:$0xff] }
 0x3ad   : > { %5440 = vmatpush1.bf16.xpose.msra.mxu0 %v5439_v22  ;;  %v4885_v22 = vpack.c.bf16 %v344_v28, %v272_v15  ;;  %v919_v15 = vld [vmem:[%s6030_s7 + $0x1520] sm:$0xff] }
 0x3ae   : > { %5442 = vmatprep.subr.bf16.mxu0 %v5441_v24  ;;  %v7225_v24 = vld [vmem:[%s7607_s0 + $0x38] sm:$0xff]  ;;  %v883_v28 = vld [vmem:[%s6030_s7 + $0x1400] sm:$0xff] }
 0x3af   : > { %v7240_v37 = vrot.slane %v7225_v24, %v6070_v47 }
 0x3b1   : > { %v1554_v40 = vcombine.high %v7240_v37, %v7240_v37 }
 0x3b3   : > { %4868 = vmatpush1.bf16.xpose.msra.mxu1 %v4867_v51  ;;  %v452_v51 = vld [vmem:[%s6030_s7 + $0x688] sm:$0xff] }
 0x3b4   : > { %4870 = vmatprep.subr.bf16.mxu1 %v4869_v33  ;;  %v7246_v33 = vrot.slane %v7230_v25, %v6070_v47  ;;  %v7326_v25 = vrot.slane %v1692_v11, %v6070_v47 }
 0x3b5   : > { %5444 = vmatpush1.bf16.xpose.msra.mxu0 %v5443_v36  ;;  %v524_v36 = vld [vmem:[%s6030_s7 + $0x8c8] sm:$0xff] }
 0x3b6   : > { %5446 = vmatprep.subr.bf16.mxu0 %v5445_v48  ;;  %v4887_v48 = vpack.c.bf16 %v343_v32, %v271_v30  ;;  %v5465_v38 = vpack.c.bf16 %v524_v36, %v452_v51  ;;  %v1707_v41 = vcombine.high %v7246_v33, %v7246_v33  ;;  %v5479_v30 = vpack.c.bf16 %v955_v18, %v883_v28  ;;  %v1099_v51 = vld [vmem:[%s6030_s7 + $0x1ac0] sm:$0xff]  ;;  %v1136_v36 = vld [vmem:[%s6030_s7 + $0x1be8] sm:$0xff] }
 0x3bb   : > { %4872 = vmatpush1.bf16.xpose.msra.mxu1 %v4871_v45  ;;  %v523_v45 = vld [vmem:[%s6030_s7 + $0x8c0] sm:$0xff] }
 0x3bc   : > { %4874 = vmatprep.subr.bf16.mxu1 %v4873_v53  ;;  %v632_v53 = vld [vmem:[%s6030_s7 + $0xc28] sm:$0xff]  ;;  %v5467_v52 = vpack.c.bf16 %v523_v45, %v451_v44  ;;  %v1207_v44 = vld [vmem:[%s6030_s7 + $0x1e20] sm:$0xff] }
 0x3bd   : > { %5448 = vmatpush1.bf16.xpose.msra.mxu0 %v5447_v46  ;;  %v560_v46 = vld [vmem:[%s6030_s7 + $0x9e8] sm:$0xff]  ;;  %v1171_v45 = vld [vmem:[%s6030_s7 + $0x1d00] sm:$0xff] }
 0x3be   : > { %5450 = vmatprep.subr.bf16.mxu0 %v5449_v58  ;;  %v668_v58 = vld [vmem:[%s6030_s7 + $0xd48] sm:$0xff]  ;;  %v4893_v63 = vpack.c.bf16 %v632_v53, %v560_v46  ;;  %v1243_v46 = vld [vmem:[%s6030_s7 + $0x1f40] sm:$0xff] }
 0x3bf   : > { %v1280_v53 = vld [vmem:[%s6030_s7 + $0x2068] sm:$0xff] }
 0x3c3   : > { %4876 = vmatpush1.bf16.xpose.msra.mxu1 %v4875_v9  ;;  %v776_v9 = vld [vmem:[%s6030_s7 + $0x10a8] sm:$0xff] }
 0x3c4   : > { %4878 = vmatprep.subr.bf16.mxu1 %v4877_v0  ;;  %v812_v0 = vld [vmem:[%s6030_s7 + $0x11c8] sm:$0xff]  ;;  %v4897_v3 = vpack.c.bf16 %v776_v9, %v704_v57  ;;  %v1387_v57 = vld [vmem:[%s6030_s7 + $0x23c0] sm:$0xff]  ;;  %v274_v9 = vld [vmem:[%s6030_s7 + $0xf8] sm:$0xff] }
 0x3c5   : > { %5452 = vmatpush1.bf16.xpose.msra.mxu0 %v5451_v62  ;;  %v740_v62 = vld [vmem:[%s6030_s7 + $0xf88] sm:$0xff] }
 0x3c6   : > { %5454 = vmatprep.subr.bf16.mxu0 %v5453_v1  ;;  %v4895_v1 = vpack.c.bf16 %v631_v60, %v559_v10  ;;  %v5473_v4 = vpack.c.bf16 %v812_v0, %v740_v62  ;;  %v1279_v60 = vld [vmem:[%s6030_s7 + $0x2060] sm:$0xff]  ;;  %v346_v62 = vld [vmem:[%s6030_s7 + $0x338] sm:$0xff] }
 0x3c7   : > { %v310_v0 = vld [vmem:[%s6030_s7 + $0x218] sm:$0xff] }
 0x3cb   : > { %4880 = vmatpush1.bf16.xpose.msra.mxu1 %v4879_v16  ;;  %v920_v16 = vld [vmem:[%s6030_s7 + $0x1528] sm:$0xff] }
 0x3cc   : > { %4882 = vmatprep.subr.bf16.mxu1 %v4881_v27  ;;  %v956_v27 = vld [vmem:[%s6030_s7 + $0x1648] sm:$0xff]  ;;  %v4901_v29 = vpack.c.bf16 %v920_v16, %v848_v17  ;;  %v345_v17 = vld [vmem:[%s6030_s7 + $0x330] sm:$0xff] }
 0x3cd   : > { %5456 = vmatpush1.bf16.xpose.msra.mxu0 %v5455_v14  ;;  %v884_v14 = vld [vmem:[%s6030_s7 + $0x1408] sm:$0xff]  ;;  %v309_v16 = vld [vmem:[%s6030_s7 + $0x210] sm:$0xff] }
 0x3ce   : > { %5458 = vmatprep.subr.bf16.mxu0 %v5457_v59  ;;  %v4899_v59 = vpack.c.bf16 %v775_v6, %v703_v5  ;;  %v5477_v55 = vpack.c.bf16 %v956_v27, %v884_v14  ;;  %v1539_v6 = vcombine.high %v7225_v24, %v7225_v24  ;;  %v381_v14 = vld [vmem:[%s6030_s7 + $0x450] sm:$0xff]  ;;  %v418_v27 = vld [vmem:[%s6030_s7 + $0x578] sm:$0xff] }
 0x3cf   : > { %v526_v24 = vld [vmem:[%s6030_s7 + $0x8d8] sm:$0xff] }
 0x3d3   : > { %4884 = vmatpush1.bf16.xpose.msra.mxu1 %v4883_v20  ;;  %v1064_v20 = vld [vmem:[%s6030_s7 + $0x19a8] sm:$0xff] }
 0x3d4   : > { %4886 = vmatprep.subr.bf16.mxu1 %v4885_v22  ;;  %v1100_v22 = vld [vmem:[%s6030_s7 + $0x1ac8] sm:$0xff]  ;;  %v4905_v32 = vpack.c.bf16 %v1064_v20, %v992_v19  ;;  %v1708_v19 = vcombine.high %v7326_v25, %v7326_v25  ;;  %v417_v20 = vld [vmem:[%s6030_s7 + $0x570] sm:$0xff] }
 0x3d5   : > { %5460 = vmatpush1.bf16.xpose.msra.mxu0 %v5459_v21  ;;  %v1028_v21 = vld [vmem:[%s6030_s7 + $0x1888] sm:$0xff] }
 0x3d6   : > { %5462 = vmatprep.subr.bf16.mxu0 %v5461_v23  ;;  %v4903_v23 = vpack.c.bf16 %v919_v15, %v847_v26  ;;  %v5481_v35 = vpack.c.bf16 %v1100_v22, %v1028_v21  ;;  %v5495_v26 = vpack.c.bf16 %v381_v14, %v309_v16  ;;  %v489_v21 = vld [vmem:[%s6030_s7 + $0x7b0] sm:$0xff] }
 0x3d7   : > { %v453_v22 = vld [vmem:[%s6030_s7 + $0x690] sm:$0xff] }
 0x3d8   : > { %v1065_v16 = vld [vmem:[%s6030_s7 + $0x19b0] sm:$0xff] }
 0x3d9   : > { %v1029_v14 = vld [vmem:[%s6030_s7 + $0x1890] sm:$0xff] }
 0x3da   : > { %2773 = vmatmul.mubr.f32.vlgmr.msra.gmra.mrb[0].mxu1 %v7153_v54  ;;  %v596_v54 = vld [vmem:[%s6030_s7 + $0xb08] sm:$0xff] }
 0x3db   : > { %4888 = vmatpush1.bf16.xpose.msra.mxu1 %v4887_v48  ;;  %2842 = vmatprep.mubr.f32.mxu1 %v1554_v40  ;;  %v5469_v61 = vpack.c.bf16 %v668_v58, %v596_v54  ;;  %v1208_v48 = vld [vmem:[%s6030_s7 + $0x1e28] sm:$0xff]  ;;  %v5483_v40 = vpack.c.bf16 %v1099_v51, %v1027_v31  ;;  %v561_v51 = vld [vmem:[%s6030_s7 + $0x9f0] sm:$0xff] }
 0x3dc   : > { %4033 = vmatmul.mubr.f32.vlgmr.msra.gmra.mrb[0].mxu0 %v7158_v8  ;;  %4890 = vmatprep.subr.bf16.mxu1 %v4889_v50  ;;  %v4891_v8 = vpack.c.bf16 %v487_v43, %v415_v42  ;;  %v1244_v50 = vld [vmem:[%s6030_s7 + $0x1f48] sm:$0xff]  ;;  %v1135_v43 = vld [vmem:[%s6030_s7 + $0x1be0] sm:$0xff] }
 0x3dd   : > { %5464 = vmatpush1.bf16.xpose.msra.mxu0 %v5463_v34  ;;  %4102 = vmatprep.mubr.f32.mxu0 %v1707_v41  ;;  %v1172_v34 = vld [vmem:[%s6030_s7 + $0x1d08] sm:$0xff]  ;;  %v4909_v41 = vpack.c.bf16 %v1208_v48, %v1136_v36  ;;  %v633_v36 = vld [vmem:[%s6030_s7 + $0xc30] sm:$0xff] }
 0x3de   : > { %5466 = vmatprep.subr.bf16.mxu0 %v5465_v38  ;;  %v4907_v38 = vpack.c.bf16 %v1063_v39, %v991_v49  ;;  %v5485_v42 = vpack.c.bf16 %v1244_v50, %v1172_v34  ;;  %v1352_v54 = vld [vmem:[%s6030_s7 + $0x22a8] sm:$0xff]  ;;  %v597_v48 = vld [vmem:[%s6030_s7 + $0xb10] sm:$0xff]  ;;  %v706_v50 = vld [vmem:[%s6030_s7 + $0xe78] sm:$0xff] }
 0x3df   : > { %v1316_v58 = vld [vmem:[%s6030_s7 + $0x2188] sm:$0xff]  ;;  %v669_v34 = vld [vmem:[%s6030_s7 + $0xd50] sm:$0xff] }
 0x3e3   : > { %4892 = vmatpush1.bf16.xpose.msra.mxu1 %v4891_v8  ;;  %v1388_v8 = vld [vmem:[%s6030_s7 + $0x23c8] sm:$0xff] }
 0x3e4   : > { %4894 = vmatprep.subr.bf16.mxu1 %v4893_v63  ;;  %v5487_v63 = vpack.c.bf16 %v1243_v46, %v1171_v45  ;;  %v5489_v10 = vpack.c.bf16 %v1388_v8, %v1316_v58  ;;  %v705_v46 = vld [vmem:[%s6030_s7 + $0xe70] sm:$0xff]  ;;  %v850_v8 = vld [vmem:[%s6030_s7 + $0x12f8] sm:$0xff] }
 0x3e5   : > { %5468 = vmatpush1.bf16.xpose.msra.mxu0 %v5467_v52  ;;  %v4911_v52 = vpack.c.bf16 %v1207_v44, %v1135_v43  ;;  %v5503_v43 = vpack.c.bf16 %v669_v34, %v597_v48  ;;  %v813_v58 = vld [vmem:[%s6030_s7 + $0x11d0] sm:$0xff]  ;;  %v276_v34 = vld [vmem:[%s6030_s7 + $0x108] sm:$0xff] }
 0x3e6   : > { %5470 = vmatprep.subr.bf16.mxu0 %v5469_v61  ;;  %v4913_v61 = vpack.c.bf16 %v1352_v54, %v1280_v53  ;;  %v777_v53 = vld [vmem:[%s6030_s7 + $0x10b0] sm:$0xff] }
 0x3e7   : > { %v741_v54 = vld [vmem:[%s6030_s7 + $0xf90] sm:$0xff] }
 0x3e8   : > { %v1389_v48 = vld [vmem:[%s6030_s7 + $0x23d0] sm:$0xff] }
 0x3eb   : > { %4896 = vmatpush1.bf16.xpose.msra.mxu1 %v4895_v1  ;;  %v382_v1 = vld [vmem:[%s6030_s7 + $0x458] sm:$0xff] }
 0x3ec   : > { %4898 = vmatprep.subr.bf16.mxu1 %v4897_v3  ;;  %v5491_v3 = vpack.c.bf16 %v1387_v57, %v1315_v7  ;;  %v5493_v5 = vpack.c.bf16 %v382_v1, %v310_v0  ;;  %v849_v57 = vld [vmem:[%s6030_s7 + $0x12f0] sm:$0xff]  ;;  %v994_v1 = vld [vmem:[%s6030_s7 + $0x1778] sm:$0xff] }
 0x3ed   : > { %5472 = vmatpush1.bf16.xpose.msra.mxu0 %v5471_v2  ;;  %v4915_v2 = vpack.c.bf16 %v1351_v56, %v1279_v60  ;;  %v5507_v60 = vpack.c.bf16 %v813_v58, %v741_v54  ;;  %v957_v0 = vld [vmem:[%s6030_s7 + $0x1650] sm:$0xff]  ;;  %v347_v54 = vld [vmem:[%s6030_s7 + $0x340] sm:$0xff] }
 0x3ee   : > { %5474 = vmatprep.subr.bf16.mxu0 %v5473_v4  ;;  %v4917_v4 = vpack.c.bf16 %v346_v62, %v274_v9  ;;  %v921_v9 = vld [vmem:[%s6030_s7 + $0x1530] sm:$0xff]  ;;  %v311_v58 = vld [vmem:[%s6030_s7 + $0x220] sm:$0xff] }
 0x3ef   : > { %v885_v62 = vld [vmem:[%s6030_s7 + $0x1410] sm:$0xff] }
 0x3f3   : > { %4900 = vmatpush1.bf16.xpose.msra.mxu1 %v4899_v59  ;;  %v490_v59 = vld [vmem:[%s6030_s7 + $0x7b8] sm:$0xff] }
 0x3f4   : > { %4902 = vmatprep.subr.bf16.mxu1 %v4901_v29  ;;  %v454_v29 = vld [vmem:[%s6030_s7 + $0x698] sm:$0xff]  ;;  %v4921_v15 = vpack.c.bf16 %v490_v59, %v418_v27  ;;  %v1101_v27 = vld [vmem:[%s6030_s7 + $0x1ad0] sm:$0xff] }
 0x3f5   : > { %5476 = vmatpush1.bf16.xpose.msra.mxu0 %v5475_v12  ;;  %v7321_v12 = vrot.slane %v1539_v6, %v6070_v47  ;;  %v5497_v28 = vpack.c.bf16 %v526_v24, %v454_v29  ;;  %v5511_v6 = vpack.c.bf16 %v957_v0, %v885_v62  ;;  %v1138_v59 = vld [vmem:[%s6030_s7 + $0x1bf8] sm:$0xff] }
 0x3f6   : > { %5478 = vmatprep.subr.bf16.mxu0 %v5477_v55  ;;  %v4919_v55 = vpack.c.bf16 %v345_v17, %v273_v13  ;;  %v993_v17 = vld [vmem:[%s6030_s7 + $0x1770] sm:$0xff]  ;;  %v1210_v29 = vld [vmem:[%s6030_s7 + $0x1e38] sm:$0xff] }
 0x3f7   : > { %v1555_v18 = vcombine.high %v7321_v12, %v7321_v12  ;;  %v1174_v24 = vld [vmem:[%s6030_s7 + $0x1d18] sm:$0xff] }
 0x3fb   : > { %4904 = vmatpush1.bf16.xpose.msra.mxu1 %v4903_v23  ;;  %v525_v23 = vld [vmem:[%s6030_s7 + $0x8d0] sm:$0xff] }
 0x3fc   : > { %4906 = vmatprep.subr.bf16.mxu1 %v4905_v32  ;;  %v634_v32 = vld [vmem:[%s6030_s7 + $0xc38] sm:$0xff]  ;;  %v5499_v49 = vpack.c.bf16 %v525_v23, %v453_v22  ;;  %v1245_v22 = vld [vmem:[%s6030_s7 + $0x1f50] sm:$0xff] }
 0x3fd   : > { %5480 = vmatpush1.bf16.xpose.msra.mxu0 %v5479_v30  ;;  %v562_v30 = vld [vmem:[%s6030_s7 + $0x9f8] sm:$0xff] }
 0x3fe   : > { %5482 = vmatprep.subr.bf16.mxu0 %v5481_v35  ;;  %v670_v35 = vld [vmem:[%s6030_s7 + $0xd58] sm:$0xff]  ;;  %v4925_v39 = vpack.c.bf16 %v634_v32, %v562_v30 }
 0x3ff   : > { %v1282_v23 = vld [vmem:[%s6030_s7 + $0x2078] sm:$0xff] }
 0x400   : > { %v1354_v30 = vld [vmem:[%s6030_s7 + $0x22b8] sm:$0xff] }
 0x401   : > { %v1318_v32 = vld [vmem:[%s6030_s7 + $0x2198] sm:$0xff] }
 0x403   : > { %4908 = vmatpush1.bf16.xpose.msra.mxu1 %v4907_v38  ;;  %v778_v38 = vld [vmem:[%s6030_s7 + $0x10b8] sm:$0xff] }
 0x404   : > { %4910 = vmatprep.subr.bf16.mxu1 %v4909_v41  ;;  %v814_v41 = vld [vmem:[%s6030_s7 + $0x11d8] sm:$0xff]  ;;  %v4929_v44 = vpack.c.bf16 %v778_v38, %v706_v50  ;;  %v348_v50 = vld [vmem:[%s6030_s7 + $0x348] sm:$0xff] }
 0x405   : > { %5484 = vmatpush1.bf16.xpose.msra.mxu0 %v5483_v40  ;;  %v742_v40 = vld [vmem:[%s6030_s7 + $0xf98] sm:$0xff]  ;;  %v312_v38 = vld [vmem:[%s6030_s7 + $0x228] sm:$0xff] }
 0x406   : > { %5486 = vmatprep.subr.bf16.mxu0 %v5485_v42  ;;  %v4927_v42 = vpack.c.bf16 %v633_v36, %v561_v51  ;;  %v5505_v45 = vpack.c.bf16 %v814_v41, %v742_v40  ;;  %v1353_v51 = vld [vmem:[%s6030_s7 + $0x22b0] sm:$0xff]  ;;  %v384_v40 = vld [vmem:[%s6030_s7 + $0x468] sm:$0xff] }
 0x407   : > { %v1317_v36 = vld [vmem:[%s6030_s7 + $0x2190] sm:$0xff] }
 0x40b   : > { %4912 = vmatpush1.bf16.xpose.msra.mxu1 %v4911_v52  ;;  %v922_v52 = vld [vmem:[%s6030_s7 + $0x1538] sm:$0xff] }
 0x40c   : > { %4914 = vmatprep.subr.bf16.mxu1 %v4913_v61  ;;  %v958_v61 = vld [vmem:[%s6030_s7 + $0x1658] sm:$0xff]  ;;  %v4933_v56 = vpack.c.bf16 %v922_v52, %v850_v8  ;;  %v383_v8 = vld [vmem:[%s6030_s7 + $0x460] sm:$0xff]  ;;  %v420_v52 = vld [vmem:[%s6030_s7 + $0x588] sm:$0xff] }
 0x40d   : > { %5488 = vmatpush1.bf16.xpose.msra.mxu0 %v5487_v63  ;;  %v886_v63 = vld [vmem:[%s6030_s7 + $0x1418] sm:$0xff] }
 0x40e   : > { %5490 = vmatprep.subr.bf16.mxu0 %v5489_v10  ;;  %v4931_v10 = vpack.c.bf16 %v777_v53, %v705_v46  ;;  %v5509_v7 = vpack.c.bf16 %v958_v61, %v886_v63  ;;  %v7398_v46 = vld [vmem:[%s7607_s0 + $0x88] sm:$0xff]  ;;  %v275_v53 = vld [vmem:[%s6030_s7 + $0x100] sm:$0xff] }
 0x40f   : > { %v492_v63 = vld [vmem:[%s6030_s7 + $0x7c8] sm:$0xff] }
 0x413   : > { %4916 = vmatpush1.bf16.xpose.msra.mxu1 %v4915_v2  ;;  %v1066_v2 = vld [vmem:[%s6030_s7 + $0x19b8] sm:$0xff] }
 0x414   : > { %4918 = vmatprep.subr.bf16.mxu1 %v4917_v4  ;;  %v1102_v4 = vld [vmem:[%s6030_s7 + $0x1ad8] sm:$0xff]  ;;  %v4937_v11 = vpack.c.bf16 %v1066_v2, %v994_v1  ;;  %v419_v2 = vld [vmem:[%s6030_s7 + $0x580] sm:$0xff] }
 0x415   : > { %5492 = vmatpush1.bf16.xpose.msra.mxu0 %v5491_v3  ;;  %v1030_v3 = vld [vmem:[%s6030_s7 + $0x1898] sm:$0xff] }
 0x416   : > { %5494 = vmatprep.subr.bf16.mxu0 %v5493_v5  ;;  %v4935_v5 = vpack.c.bf16 %v921_v9, %v849_v57  ;;  %v5513_v13 = vpack.c.bf16 %v1102_v4, %v1030_v3  ;;  %v5527_v57 = vpack.c.bf16 %v383_v8, %v311_v58  ;;  %v4953_v9 = vpack.c.bf16 %v492_v63, %v420_v52  ;;  %v491_v3 = vld [vmem:[%s6030_s7 + $0x7c0] sm:$0xff] }
 0x417   : > { %v455_v4 = vld [vmem:[%s6030_s7 + $0x6a0] sm:$0xff] }
 0x418   : > { %v995_v8 = vld [vmem:[%s6030_s7 + $0x1780] sm:$0xff] }
 0x419   : > { %v1067_v52 = vld [vmem:[%s6030_s7 + $0x19c0] sm:$0xff] }
 0x41a   : > { %2843 = vmatmul.mubr.f32.vlgmr.msra.gmra.mrb[0].mxu1 %v7240_v37  ;;  %v598_v37 = vld [vmem:[%s6030_s7 + $0xb18] sm:$0xff]  ;;  %v1031_v63 = vld [vmem:[%s6030_s7 + $0x18a0] sm:$0xff] }
 0x41b   : > { %4920 = vmatpush1.bf16.xpose.msra.mxu1 %v4919_v55  ;;  %2912 = vmatprep.mubr.f32.mxu1 %v1555_v18  ;;  %v5501_v31 = vpack.c.bf16 %v670_v35, %v598_v37  ;;  %v1246_v55 = vld [vmem:[%s6030_s7 + $0x1f58] sm:$0xff] }
 0x41c   : > { %4103 = vmatmul.mubr.f32.vlgmr.msra.gmra.mrb[0].mxu0 %v7246_v33  ;;  %4922 = vmatprep.subr.bf16.mxu1 %v4921_v15  ;;  %v4923_v33 = vpack.c.bf16 %v489_v21, %v417_v20  ;;  %v5515_v15 = vpack.c.bf16 %v1101_v27, %v1029_v14  ;;  %v5517_v18 = vpack.c.bf16 %v1246_v55, %v1174_v24  ;;  %v1209_v20 = vld [vmem:[%s6030_s7 + $0x1e30] sm:$0xff]  ;;  %v1390_v37 = vld [vmem:[%s6030_s7 + $0x23d8] sm:$0xff]  ;;  %v563_v27 = vld [vmem:[%s6030_s7 + $0xa00] sm:$0xff] }
 0x41d   : > { %5496 = vmatpush1.bf16.xpose.msra.mxu0 %v5495_v26  ;;  %4172 = vmatprep.mubr.f32.mxu0 %v1708_v19  ;;  %v4939_v26 = vpack.c.bf16 %v1065_v16, %v993_v17  ;;  %v1137_v19 = vld [vmem:[%s6030_s7 + $0x1bf0] sm:$0xff]  ;;  %v671_v24 = vld [vmem:[%s6030_s7 + $0xd60] sm:$0xff]  ;;  %v708_v55 = vld [vmem:[%s6030_s7 + $0xe88] sm:$0xff] }
 0x41e   : > { %5498 = vmatprep.subr.bf16.mxu0 %v5497_v28  ;;  %v4941_v28 = vpack.c.bf16 %v1210_v29, %v1138_v59  ;;  %v1173_v21 = vld [vmem:[%s6030_s7 + $0x1d10] sm:$0xff]  ;;  %v4943_v35 = vpack.c.bf16 %v1209_v20, %v1137_v19  ;;  %v635_v59 = vld [vmem:[%s6030_s7 + $0xc40] sm:$0xff] }
 0x41f   : > { %v599_v29 = vld [vmem:[%s6030_s7 + $0xb20] sm:$0xff] }
 0x420   : > { %v5535_v19 = vpack.c.bf16 %v671_v24, %v599_v29  ;;  %v1355_v29 = vld [vmem:[%s6030_s7 + $0x22c0] sm:$0xff] }
 0x421   : > { %v1319_v24 = vld [vmem:[%s6030_s7 + $0x21a0] sm:$0xff] }
 0x423   : > { %4924 = vmatpush1.bf16.xpose.msra.mxu1 %v4923_v33  ;;  %v5519_v33 = vpack.c.bf16 %v1245_v22, %v1173_v21  ;;  %v707_v22 = vld [vmem:[%s6030_s7 + $0xe80] sm:$0xff] }
 0x424   : > { %4926 = vmatprep.subr.bf16.mxu1 %v4925_v39  ;;  %v5521_v39 = vpack.c.bf16 %v1390_v37, %v1318_v32  ;;  %v815_v32 = vld [vmem:[%s6030_s7 + $0x11e0] sm:$0xff]  ;;  %v852_v37 = vld [vmem:[%s6030_s7 + $0x1308] sm:$0xff] }
 0x425   : > { %5500 = vmatpush1.bf16.xpose.msra.mxu0 %v5499_v49  ;;  %v4945_v49 = vpack.c.bf16 %v1354_v30, %v1282_v23  ;;  %v779_v23 = vld [vmem:[%s6030_s7 + $0x10c0] sm:$0xff] }
 0x426   : > { %5502 = vmatprep.subr.bf16.mxu0 %v5501_v31  ;;  %v1281_v31 = vld [vmem:[%s6030_s7 + $0x2070] sm:$0xff]  ;;  %v743_v30 = vld [vmem:[%s6030_s7 + $0xfa0] sm:$0xff] }
 0x427   : > { %v4947_v41 = vpack.c.bf16 %v1353_v51, %v1281_v31  ;;  %v5539_v31 = vpack.c.bf16 %v815_v32, %v743_v30  ;;  %v1709_v30 = vcombine.high %v7398_v46, %v7398_v46  ;;  %v277_v32 = vld [vmem:[%s6030_s7 + $0x110] sm:$0xff] }
 0x42b   : > { %4928 = vmatpush1.bf16.xpose.msra.mxu1 %v4927_v42  ;;  %v5523_v42 = vpack.c.bf16 %v1389_v48, %v1317_v36  ;;  %v851_v48 = vld [vmem:[%s6030_s7 + $0x1300] sm:$0xff] }
 0x42c   : > { %4930 = vmatprep.subr.bf16.mxu1 %v4929_v44  ;;  %v5525_v44 = vpack.c.bf16 %v384_v40, %v312_v38  ;;  %v959_v38 = vld [vmem:[%s6030_s7 + $0x1660] sm:$0xff]  ;;  %v996_v40 = vld [vmem:[%s6030_s7 + $0x1788] sm:$0xff] }
 0x42d   : > { %5504 = vmatpush1.bf16.xpose.msra.mxu0 %v5503_v43  ;;  %v4949_v43 = vpack.c.bf16 %v348_v50, %v276_v34  ;;  %v923_v34 = vld [vmem:[%s6030_s7 + $0x1540] sm:$0xff] }
 0x42e   : > { %5506 = vmatprep.subr.bf16.mxu0 %v5505_v45  ;;  %v7393_v45 = vld [vmem:[%s7607_s0 + $0x40] sm:$0xff] }
 0x42f   : > { %v7408_v61 = vrot.slane %v7393_v45, %v6070_v47  ;;  %v887_v50 = vld [vmem:[%s6030_s7 + $0x1420] sm:$0xff] }
 0x431   : > { %v1571_v0 = vcombine.high %v7408_v61, %v7408_v61 }
 0x433   : > { %4932 = vmatpush1.bf16.xpose.msra.mxu1 %v4931_v10  ;;  %v456_v10 = vld [vmem:[%s6030_s7 + $0x6a8] sm:$0xff] }
 0x434   : > { %4934 = vmatprep.subr.bf16.mxu1 %v4933_v56  ;;  %v7414_v56 = vrot.slane %v7398_v46, %v6070_v47  ;;  %v7494_v46 = vrot.slane %v1709_v30, %v6070_v47 }
 0x435   : > { %5508 = vmatpush1.bf16.xpose.msra.mxu0 %v5507_v60  ;;  %v528_v60 = vld [vmem:[%s6030_s7 + $0x8e8] sm:$0xff] }
 0x436   : > { %5510 = vmatprep.subr.bf16.mxu0 %v5509_v7  ;;  %v4951_v7 = vpack.c.bf16 %v347_v54, %v275_v53  ;;  %v5529_v62 = vpack.c.bf16 %v528_v60, %v456_v10  ;;  %v1724_v1 = vcombine.high %v7414_v56, %v7414_v56  ;;  %v5543_v53 = vpack.c.bf16 %v959_v38, %v887_v50  ;;  %v1103_v10 = vld [vmem:[%s6030_s7 + $0x1ae0] sm:$0xff]  ;;  %v1140_v60 = vld [vmem:[%s6030_s7 + $0x1c08] sm:$0xff] }
 0x43b   : > { %4936 = vmatpush1.bf16.xpose.msra.mxu1 %v4935_v5  ;;  %v527_v5 = vld [vmem:[%s6030_s7 + $0x8e0] sm:$0xff] }
 0x43c   : > { %4938 = vmatprep.subr.bf16.mxu1 %v4937_v11  ;;  %v636_v11 = vld [vmem:[%s6030_s7 + $0xc48] sm:$0xff]  ;;  %v5531_v17 = vpack.c.bf16 %v527_v5, %v455_v4  ;;  %v1211_v4 = vld [vmem:[%s6030_s7 + $0x1e40] sm:$0xff] }
 0x43d   : > { %5512 = vmatpush1.bf16.xpose.msra.mxu0 %v5511_v6  ;;  %v564_v6 = vld [vmem:[%s6030_s7 + $0xa08] sm:$0xff]  ;;  %v1175_v5 = vld [vmem:[%s6030_s7 + $0x1d20] sm:$0xff] }
 0x43e   : > { %5514 = vmatprep.subr.bf16.mxu0 %v5513_v13  ;;  %v672_v13 = vld [vmem:[%s6030_s7 + $0xd68] sm:$0xff]  ;;  %v4957_v16 = vpack.c.bf16 %v636_v11, %v564_v6  ;;  %v1247_v6 = vld [vmem:[%s6030_s7 + $0x1f60] sm:$0xff] }
 0x43f   : > { %v1284_v11 = vld [vmem:[%s6030_s7 + $0x2088] sm:$0xff] }
 0x443   : > { %4940 = vmatpush1.bf16.xpose.msra.mxu1 %v4939_v26  ;;  %v780_v26 = vld [vmem:[%s6030_s7 + $0x10c8] sm:$0xff] }
 0x444   : > { %4942 = vmatprep.subr.bf16.mxu1 %v4941_v28  ;;  %v816_v28 = vld [vmem:[%s6030_s7 + $0x11e8] sm:$0xff]  ;;  %v4961_v20 = vpack.c.bf16 %v780_v26, %v708_v55  ;;  %v1391_v55 = vld [vmem:[%s6030_s7 + $0x23e0] sm:$0xff]  ;;  %v278_v26 = vld [vmem:[%s6030_s7 + $0x118] sm:$0xff] }
 0x445   : > { %5516 = vmatpush1.bf16.xpose.msra.mxu0 %v5515_v15  ;;  %v744_v15 = vld [vmem:[%s6030_s7 + $0xfa8] sm:$0xff] }
 0x446   : > { %5518 = vmatprep.subr.bf16.mxu0 %v5517_v18  ;;  %v4959_v18 = vpack.c.bf16 %v635_v59, %v563_v27  ;;  %v5537_v21 = vpack.c.bf16 %v816_v28, %v744_v15  ;;  %v1283_v59 = vld [vmem:[%s6030_s7 + $0x2080] sm:$0xff]  ;;  %v350_v15 = vld [vmem:[%s6030_s7 + $0x358] sm:$0xff] }
 0x447   : > { %v314_v28 = vld [vmem:[%s6030_s7 + $0x238] sm:$0xff] }
 0x44b   : > { %4944 = vmatpush1.bf16.xpose.msra.mxu1 %v4943_v35  ;;  %v924_v35 = vld [vmem:[%s6030_s7 + $0x1548] sm:$0xff] }
 0x44c   : > { %4946 = vmatprep.subr.bf16.mxu1 %v4945_v49  ;;  %v960_v49 = vld [vmem:[%s6030_s7 + $0x1668] sm:$0xff]  ;;  %v4965_v51 = vpack.c.bf16 %v924_v35, %v852_v37  ;;  %v349_v37 = vld [vmem:[%s6030_s7 + $0x350] sm:$0xff] }
 0x44d   : > { %5520 = vmatpush1.bf16.xpose.msra.mxu0 %v5519_v33  ;;  %v888_v33 = vld [vmem:[%s6030_s7 + $0x1428] sm:$0xff]  ;;  %v313_v35 = vld [vmem:[%s6030_s7 + $0x230] sm:$0xff] }
 0x44e   : > { %5522 = vmatprep.subr.bf16.mxu0 %v5521_v39  ;;  %v4963_v39 = vpack.c.bf16 %v779_v23, %v707_v22  ;;  %v5541_v36 = vpack.c.bf16 %v960_v49, %v888_v33  ;;  %v1556_v23 = vcombine.high %v7393_v45, %v7393_v45  ;;  %v385_v33 = vld [vmem:[%s6030_s7 + $0x470] sm:$0xff]  ;;  %v422_v49 = vld [vmem:[%s6030_s7 + $0x598] sm:$0xff] }
 0x44f   : > { %v530_v45 = vld [vmem:[%s6030_s7 + $0x8f8] sm:$0xff] }
 0x453   : > { %4948 = vmatpush1.bf16.xpose.msra.mxu1 %v4947_v41  ;;  %v1068_v41 = vld [vmem:[%s6030_s7 + $0x19c8] sm:$0xff] }
 0x454   : > { %4950 = vmatprep.subr.bf16.mxu1 %v4949_v43  ;;  %v1104_v43 = vld [vmem:[%s6030_s7 + $0x1ae8] sm:$0xff]  ;;  %v4969_v54 = vpack.c.bf16 %v1068_v41, %v996_v40  ;;  %v1725_v40 = vcombine.high %v7494_v46, %v7494_v46  ;;  %v493_v41 = vld [vmem:[%s6030_s7 + $0x7d0] sm:$0xff] }
 0x455   : > { %5524 = vmatpush1.bf16.xpose.msra.mxu0 %v5523_v42  ;;  %v1032_v42 = vld [vmem:[%s6030_s7 + $0x18a8] sm:$0xff] }
 0x456   : > { %5526 = vmatprep.subr.bf16.mxu0 %v5525_v44  ;;  %v4967_v44 = vpack.c.bf16 %v923_v34, %v851_v48  ;;  %v5545_v58 = vpack.c.bf16 %v1104_v43, %v1032_v42  ;;  %v5559_v48 = vpack.c.bf16 %v385_v33, %v313_v35  ;;  %v457_v42 = vld [vmem:[%s6030_s7 + $0x6b0] sm:$0xff] }
 0x457   : > { %v529_v43 = vld [vmem:[%s6030_s7 + $0x8f0] sm:$0xff] }
 0x458   : > { %v1033_v35 = vld [vmem:[%s6030_s7 + $0x18b0] sm:$0xff] }
 0x459   : > { %v1105_v33 = vld [vmem:[%s6030_s7 + $0x1af0] sm:$0xff] }
 0x45a   : > { %2913 = vmatmul.mubr.f32.vlgmr.msra.gmra.mrb[0].mxu1 %v7321_v12  ;;  %v600_v12 = vld [vmem:[%s6030_s7 + $0xb28] sm:$0xff] }
 0x45b   : > { %4952 = vmatpush1.bf16.xpose.msra.mxu1 %v4951_v7  ;;  %2982 = vmatprep.mubr.f32.mxu1 %v1571_v0  ;;  %v5533_v14 = vpack.c.bf16 %v672_v13, %v600_v12  ;;  %v1212_v7 = vld [vmem:[%s6030_s7 + $0x1e48] sm:$0xff]  ;;  %v5547_v0 = vpack.c.bf16 %v1103_v10, %v1031_v63  ;;  %v565_v63 = vld [vmem:[%s6030_s7 + $0xa10] sm:$0xff] }
 0x45c   : > { %4173 = vmatmul.mubr.f32.vlgmr.msra.gmra.mrb[0].mxu0 %v7326_v25  ;;  %4954 = vmatprep.subr.bf16.mxu1 %v4953_v9  ;;  %v4955_v25 = vpack.c.bf16 %v491_v3, %v419_v2  ;;  %v1248_v9 = vld [vmem:[%s6030_s7 + $0x1f68] sm:$0xff]  ;;  %v1139_v3 = vld [vmem:[%s6030_s7 + $0x1c00] sm:$0xff]  ;;  %v637_v10 = vld [vmem:[%s6030_s7 + $0xc50] sm:$0xff] }
 0x45d   : > { %5528 = vmatpush1.bf16.xpose.msra.mxu0 %v5527_v57  ;;  %4242 = vmatprep.mubr.f32.mxu0 %v1724_v1  ;;  %v1176_v57 = vld [vmem:[%s6030_s7 + $0x1d28] sm:$0xff]  ;;  %v4973_v1 = vpack.c.bf16 %v1212_v7, %v1140_v60  ;;  %v601_v60 = vld [vmem:[%s6030_s7 + $0xb30] sm:$0xff] }
 0x45e   : > { %5530 = vmatprep.subr.bf16.mxu0 %v5529_v62  ;;  %v4971_v62 = vpack.c.bf16 %v1067_v52, %v995_v8  ;;  %v5549_v2 = vpack.c.bf16 %v1248_v9, %v1176_v57  ;;  %v1356_v12 = vld [vmem:[%s6030_s7 + $0x22c8] sm:$0xff]  ;;  %v673_v7 = vld [vmem:[%s6030_s7 + $0xd70] sm:$0xff]  ;;  %v710_v57 = vld [vmem:[%s6030_s7 + $0xe98] sm:$0xff] }
 0x45f   : > { %v1320_v13 = vld [vmem:[%s6030_s7 + $0x21a8] sm:$0xff]  ;;  %v782_v9 = vld [vmem:[%s6030_s7 + $0x10d8] sm:$0xff] }
 0x463   : > { %4956 = vmatpush1.bf16.xpose.msra.mxu1 %v4955_v25  ;;  %v1392_v25 = vld [vmem:[%s6030_s7 + $0x23e8] sm:$0xff] }
 0x464   : > { %4958 = vmatprep.subr.bf16.mxu1 %v4957_v16  ;;  %v5551_v16 = vpack.c.bf16 %v1247_v6, %v1175_v5  ;;  %v5553_v27 = vpack.c.bf16 %v1392_v25, %v1320_v13  ;;  %v709_v5 = vld [vmem:[%s6030_s7 + $0xe90] sm:$0xff]  ;;  %v854_v13 = vld [vmem:[%s6030_s7 + $0x1318] sm:$0xff] }
 0x465   : > { %5532 = vmatpush1.bf16.xpose.msra.mxu0 %v5531_v17  ;;  %v4975_v17 = vpack.c.bf16 %v1211_v4, %v1139_v3  ;;  %v4993_v3 = vpack.c.bf16 %v782_v9, %v710_v57  ;;  %v781_v6 = vld [vmem:[%s6030_s7 + $0x10d0] sm:$0xff]  ;;  %v926_v25 = vld [vmem:[%s6030_s7 + $0x1558] sm:$0xff]  ;;  %v4432_v57 = vld [vmem:[%s197_s8] ss:$0 sm:$0xff]  ;;  %s4320_s8 = scalar_lea.sflag [#allocation4], %s6026_s11 }
 0x466   : > { %5534 = vmatprep.subr.bf16.mxu0 %v5533_v14  ;;  %v4977_v14 = vpack.c.bf16 %v1356_v12, %v1284_v11  ;;  %v745_v11 = vld [vmem:[%s6030_s7 + $0xfb0] sm:$0xff] }
 0x467   : > { %v817_v12 = vld [vmem:[%s6030_s7 + $0x11f0] sm:$0xff] }
 0x46b   : > { %4960 = vmatpush1.bf16.xpose.msra.mxu1 %v4959_v18  ;;  %v386_v18 = vld [vmem:[%s6030_s7 + $0x478] sm:$0xff] }
 0x46c   : > { %4962 = vmatprep.subr.bf16.mxu1 %v4961_v20  ;;  %v5555_v20 = vpack.c.bf16 %v1391_v55, %v1319_v24  ;;  %v5557_v22 = vpack.c.bf16 %v386_v18, %v314_v28  ;;  %v853_v24 = vld [vmem:[%s6030_s7 + $0x1310] sm:$0xff]  ;;  %v998_v28 = vld [vmem:[%s6030_s7 + $0x1798] sm:$0xff] }
 0x46d   : > { %5536 = vmatpush1.bf16.xpose.msra.mxu0 %v5535_v19  ;;  %v4979_v19 = vpack.c.bf16 %v1355_v29, %v1283_v59  ;;  %v4997_v59 = vpack.c.bf16 %v926_v25, %v854_v13  ;;  %v925_v55 = vld [vmem:[%s6030_s7 + $0x1550] sm:$0xff]  ;;  %v1070_v18 = vld [vmem:[%s6030_s7 + $0x19d8] sm:$0xff] }
 0x46e   : > { %5538 = vmatprep.subr.bf16.mxu0 %v5537_v21  ;;  %v4981_v21 = vpack.c.bf16 %v350_v15, %v278_v26  ;;  %v889_v26 = vld [vmem:[%s6030_s7 + $0x1430] sm:$0xff] }
 0x46f   : > { %v961_v15 = vld [vmem:[%s6030_s7 + $0x1670] sm:$0xff] }
 0x473   : > { %4964 = vmatpush1.bf16.xpose.msra.mxu1 %v4963_v39  ;;  %v494_v39 = vld [vmem:[%s6030_s7 + $0x7d8] sm:$0xff] }
 0x474   : > { %4966 = vmatprep.subr.bf16.mxu1 %v4965_v51  ;;  %v458_v51 = vld [vmem:[%s6030_s7 + $0x6b8] sm:$0xff]  ;;  %v4985_v34 = vpack.c.bf16 %v494_v39, %v422_v49 }
 0x475   : > { %5540 = vmatpush1.bf16.xpose.msra.mxu0 %v5539_v31  ;;  %v7489_v31 = vrot.slane %v1556_v23, %v6070_v47  ;;  %v5561_v50 = vpack.c.bf16 %v530_v45, %v458_v51  ;;  %v421_v47 = vld [vmem:[%s6030_s7 + $0x590] sm:$0xff]  ;;  %v5001_v23 = vpack.c.bf16 %v1070_v18, %v998_v28  ;;  %v1142_v49 = vld [vmem:[%s6030_s7 + $0x1c18] sm:$0xff] }
 0x476   : > { %5542 = vmatprep.subr.bf16.mxu0 %v5541_v36  ;;  %v4983_v36 = vpack.c.bf16 %v349_v37, %v277_v32  ;;  %v997_v32 = vld [vmem:[%s6030_s7 + $0x1790] sm:$0xff]  ;;  %v1214_v39 = vld [vmem:[%s6030_s7 + $0x1e58] sm:$0xff] }
 0x477   : > { %v1572_v38 = vcombine.high %v7489_v31, %v7489_v31  ;;  %v1069_v37 = vld [vmem:[%s6030_s7 + $0x19d0] sm:$0xff]  ;;  %v1178_v51 = vld [vmem:[%s6030_s7 + $0x1d38] sm:$0xff] }
 0x478   : > { %v1250_v45 = vld [vmem:[%s6030_s7 + $0x1f78] sm:$0xff] }
 0x47b   : > { %4968 = vmatpush1.bf16.xpose.msra.mxu1 %v4967_v44  ;;  %v566_v44 = vld [vmem:[%s6030_s7 + $0xa18] sm:$0xff] }
 0x47c   : > { %4970 = vmatprep.subr.bf16.mxu1 %v4969_v54  ;;  %v674_v54 = vld [vmem:[%s6030_s7 + $0xd78] sm:$0xff] }
 0x47d   : > { %5544 = vmatpush1.bf16.xpose.msra.mxu0 %v5543_v53  ;;  %v638_v53 = vld [vmem:[%s6030_s7 + $0xc58] sm:$0xff] }
 0x47e   : > { %5546 = vmatprep.subr.bf16.mxu0 %v5545_v58  ;;  %v5563_v58 = vpack.c.bf16 %v529_v43, %v457_v42  ;;  %v4989_v8 = vpack.c.bf16 %v638_v53, %v566_v44  ;;  %v1286_v42 = vld [vmem:[%s6030_s7 + $0x2098] sm:$0xff] }
 0x47f   : > { %v1358_v43 = vld [vmem:[%s6030_s7 + $0x22d8] sm:$0xff] }
 0x480   : > { %v1322_v44 = vld [vmem:[%s6030_s7 + $0x21b8] sm:$0xff] }
 0x481   : > { %v1394_v53 = vld [vmem:[%s6030_s7 + $0x23f8] sm:$0xff] }
 0x483   : > { %4972 = vmatpush1.bf16.xpose.msra.mxu1 %v4971_v62  ;;  %v746_v62 = vld [vmem:[%s6030_s7 + $0xfb8] sm:$0xff] }
 0x484   : > { %4974 = vmatprep.subr.bf16.mxu1 %v4973_v1  ;;  %v4991_v1 = vpack.c.bf16 %v637_v10, %v565_v63  ;;  %v1321_v63 = vld [vmem:[%s6030_s7 + $0x21b0] sm:$0xff] }
 0x485   : > { %5548 = vmatpush1.bf16.xpose.msra.mxu0 %v5547_v0  ;;  %v818_v0 = vld [vmem:[%s6030_s7 + $0x11f8] sm:$0xff]  ;;  %v1393_v10 = vld [vmem:[%s6030_s7 + $0x23f0] sm:$0xff] }
 0x486   : > { %5550 = vmatprep.subr.bf16.mxu0 %v5549_v2  ;;  %v5567_v2 = vpack.c.bf16 %v673_v7, %v601_v60  ;;  %v5569_v4 = vpack.c.bf16 %v818_v0, %v746_v62  ;;  %v5587_v7 = vpack.c.bf16 %v1393_v10, %v1321_v63 }
 0x48b   : > { %4976 = vmatpush1.bf16.xpose.msra.mxu1 %v4975_v17  ;;  %v890_v17 = vld [vmem:[%s6030_s7 + $0x1438] sm:$0xff] }
 0x48c   : > { %4978 = vmatprep.subr.bf16.mxu1 %v4977_v14  ;;  %v4995_v14 = vpack.c.bf16 %v781_v6, %v709_v5 }
 0x48d   : > { %5552 = vmatpush1.bf16.xpose.msra.mxu0 %v5551_v16  ;;  %v962_v16 = vld [vmem:[%s6030_s7 + $0x1678] sm:$0xff] }
 0x48e   : > { %5554 = vmatprep.subr.bf16.mxu0 %v5553_v27  ;;  %v5571_v27 = vpack.c.bf16 %v817_v12, %v745_v11  ;;  %v5573_v29 = vpack.c.bf16 %v962_v16, %v890_v17 }
 0x493   : > { %4980 = vmatpush1.bf16.xpose.msra.mxu1 %v4979_v19  ;;  %v1034_v19 = vld [vmem:[%s6030_s7 + $0x18b8] sm:$0xff] }
 0x494   : > { %4982 = vmatprep.subr.bf16.mxu1 %v4981_v21  ;;  %v4999_v21 = vpack.c.bf16 %v925_v55, %v853_v24 }
 0x495   : > { %5556 = vmatpush1.bf16.xpose.msra.mxu0 %v5555_v20  ;;  %v1106_v20 = vld [vmem:[%s6030_s7 + $0x1af8] sm:$0xff] }
 0x496   : > { %5558 = vmatprep.subr.bf16.mxu0 %v5557_v22  ;;  %v5575_v22 = vpack.c.bf16 %v961_v15, %v889_v26  ;;  %v5577_v30 = vpack.c.bf16 %v1106_v20, %v1034_v19 }
 0x49a   : > { %2983 = vmatmul.mubr.f32.vlgmr.msra.gmra.mrb[0].mxu1 %v7408_v61  ;;  %v602_v61 = vld [vmem:[%s6030_s7 + $0xb38] sm:$0xff] }
 0x49b   : > { %4984 = vmatpush1.bf16.xpose.msra.mxu1 %v4983_v36  ;;  %3052 = vmatprep.mubr.f32.mxu1 %v1572_v38  ;;  %v5565_v52 = vpack.c.bf16 %v674_v54, %v602_v61  ;;  %v5003_v36 = vpack.c.bf16 %v1069_v37, %v997_v32  ;;  %v1141_v38 = vld [vmem:[%s6030_s7 + $0x1c10] sm:$0xff] }
 0x49c   : > { %4243 = vmatmul.mubr.f32.vlgmr.msra.gmra.mrb[0].mxu0 %v7414_v56  ;;  %4986 = vmatprep.subr.bf16.mxu1 %v4985_v34  ;;  %v4987_v56 = vpack.c.bf16 %v493_v41, %v421_v47  ;;  %v5005_v34 = vpack.c.bf16 %v1214_v39, %v1142_v49  ;;  %v1177_v47 = vld [vmem:[%s6030_s7 + $0x1d30] sm:$0xff] }
 0x49d   : > { %5560 = vmatpush1.bf16.xpose.msra.mxu0 %v5559_v48  ;;  %4312 = vmatprep.mubr.f32.mxu0 %v1725_v40  ;;  %v5579_v48 = vpack.c.bf16 %v1105_v33, %v1033_v35  ;;  %v1213_v40 = vld [vmem:[%s6030_s7 + $0x1e50] sm:$0xff] }
 0x49e   : > { %5562 = vmatprep.subr.bf16.mxu0 %v5561_v50  ;;  %v5581_v50 = vpack.c.bf16 %v1250_v45, %v1178_v51  ;;  %v1249_v41 = vld [vmem:[%s6030_s7 + $0x1f70] sm:$0xff]  ;;  %v5007_v61 = vpack.c.bf16 %v1213_v40, %v1141_v38 }
 0x49f   : > { %v5583_v54 = vpack.c.bf16 %v1249_v41, %v1177_v47 }
 0x4a3   : > { %4988 = vmatpush1.bf16.xpose.msra.mxu1 %v4987_v56  ;;  %v5009_v56 = vpack.c.bf16 %v1358_v43, %v1286_v42 }
 0x4a4   : > { %4990 = vmatprep.subr.bf16.mxu1 %v4989_v8  ;;  %v1285_v8 = vld [vmem:[%s6030_s7 + $0x2090] sm:$0xff] }
 0x4a5   : > { %5564 = vmatpush1.bf16.xpose.msra.mxu0 %v5563_v58  ;;  %v5585_v58 = vpack.c.bf16 %v1394_v53, %v1322_v44 }
 0x4a6   : > { %5566 = vmatprep.subr.bf16.mxu0 %v5565_v52  ;;  %v1357_v52 = vld [vmem:[%s6030_s7 + $0x22d0] sm:$0xff] }
 0x4a7   : > { %v5011_v60 = vpack.c.bf16 %v1357_v52, %v1285_v8 }
 0x4ab   : > { %4992 = vmatpush1.bf16.xpose.msra.mxu1 %v4991_v1 }
 0x4ac   : > { %4994 = vmatprep.subr.bf16.mxu1 %v4993_v3 }
 0x4ad   : > { %5568 = vmatpush1.bf16.xpose.msra.mxu0 %v5567_v2 }
 0x4ae   : > { %5570 = vmatprep.subr.bf16.mxu0 %v5569_v4 }
 0x4b3   : > { %4996 = vmatpush1.bf16.xpose.msra.mxu1 %v4995_v14 }
 0x4b4   : > { %4998 = vmatprep.subr.bf16.mxu1 %v4997_v59 }
 0x4b5   : > { %5572 = vmatpush1.bf16.xpose.msra.mxu0 %v5571_v27 }
 0x4b6   : > { %5574 = vmatprep.subr.bf16.mxu0 %v5573_v29 }
 0x4bb   : > { %5000 = vmatpush1.bf16.xpose.msra.mxu1 %v4999_v21 }
 0x4bc   : > { %5002 = vmatprep.subr.bf16.mxu1 %v5001_v23 }
 0x4bd   : > { %5576 = vmatpush1.bf16.xpose.msra.mxu0 %v5575_v22 }
 0x4be   : > { %5578 = vmatprep.subr.bf16.mxu0 %v5577_v30 }
 0x4c3   : > { %5004 = vmatpush1.bf16.xpose.msra.mxu1 %v5003_v36 }
 0x4c4   : > { %5006 = vmatprep.subr.bf16.mxu1 %v5005_v34 }
 0x4c5   : > { %5580 = vmatpush1.bf16.xpose.msra.mxu0 %v5579_v48 }
 0x4c6   : > { %5582 = vmatprep.subr.bf16.mxu0 %v5581_v50 }
 0x4cb   : > { %5008 = vmatpush1.bf16.xpose.msra.mxu1 %v5007_v61 }
 0x4cc   : > { %5010 = vmatprep.subr.bf16.mxu1 %v5009_v56 }
 0x4cd   : > { %5584 = vmatpush1.bf16.xpose.msra.mxu0 %v5583_v54 }
 0x4ce   : > { %5586 = vmatprep.subr.bf16.mxu0 %v5585_v58 }
 0x4d3   : > { %5012 = vmatpush1.bf16.xpose.msra.mxu1 %v5011_v60 }
 0x4d5   : > { %5588 = vmatpush1.bf16.xpose.msra.mxu0 %v5587_v7 }
 0x4da   : > { %3053 = vmatmul.mubr.f32.vlgmr.msra.gmra.mrb[0].mxu1 %v7489_v31 }
 0x4dc   : > { %4313 = vmatmul.mubr.f32.vlgmr.msra.gmra.mrb[0].mxu0 %v7494_v46 }
 0x5ad   : > { %v3054_v9 = vpop.f32.mrb[0].mxu1 }
 0x5ae   : > { %v5589_v62 = vadd.f32 %v4432_v57, %v3054_v9  ;;  %v3056_v1 = vpop.f32.mrb[1].mxu1 }
 0x5af   : > { %v4314_v0 = vpop.f32.mrb[0].mxu0 }
 0x5b0   : > { %v4316_v2 = vpop.f32.mrb[1].mxu0  ;;  %v5590_v3 = vadd.f32 %v5589_v62, %v4314_v0 }
 0x5b2   : > { %4318 = vst [vmem:[%s223_s25] sm:$0x3] %v5590_v3 }
 0x5b3   : > { %5807 = shalt.err (!%p5804_p3)
}
 0x5b4   : > { %s5808_s11 = scalar_lea.hbm %s7563_s10, 32  ;;  %s5812_s20 = scalar_lea.hbm %s7610_s3, 64 }
 0x5b5   : > { %p5809_p12 = scmp.ne.s32.totalorder %s7563_s10, %s5808_s11  ;;  %p5813_p2 = scmp.lt.u32.totalorder %s7563_s10, %s7610_s3 }
 0x5b6   : > { %p5814_p10 = scmp.lt.u32.totalorder %s5812_s20, %s5808_s11  ;;  %p5816_p13 = scmp.lt.u32.totalorder %s5808_s11, %s7563_s10 }
 0x5b7   : > { %p5810_p8 = pnand %p5809_p12, %p7620_p1 }
 0x5b8   : > { %p5815_p6 = por %p5814_p10, %p5813_p2 }
 0x5b9   : > { %p5811_p0 = pneg %p5810_p8 }
 0x5ba   : > { %p5817_p11 = por %p5816_p13, %p5815_p6 }
 0x5bc   : > { %p5818_p4 = pnand %p5817_p11, %p5811_p0 }
 0x5be   : > { %5821 = shalt.err (!%p5818_p4)
}
 0x5bf   : > { %5666 = dma.vmem_to_hbm [thread:$0]  (%p7620_p1), %s7565_s5, 32, %s7563_s10, %s4320_s8  }
 0x5c0 PF: > { %s4345_s27 = sand.u32 1, %s5852_s12   ;;  %p7621_p5 = scmp.ne.s32.totalorder %s7615_s24, 0 }
 0x5c1   : > { %p7622_p7 = scmp.ge.s32.totalorder %s5864_s15, 2  ;;  %s4346_s28 = scalar_lea.sflag [#allocation4], %s4345_s27 }
 0x5c3   : > { %p5676_p9 = pnand %p7622_p7, %p7621_p5 }
 0x5c5   : > { %5847 = dma.done.wait (!%p5676_p9), %s4346_s28, 32  }
 0x5c6   : > { %5849 = vsyncadd (!%p5676_p9), %s4346_s28, 4294967264  ;;  %p19_p3 = scmp.ge.s32.totalorder %s5917_s18, 4   ;;  %s7623_s12 = smov %s5856_s13 }
 0x5c7   : > { %s7624_s13 = smov %s5860_s14  ;;  %s7625_s14 = smov %s5929_s21 }
 0x5c8   : > { %s7626_s15 = smov %s5917_s18  ;;  %21 = sbr.rel (!%p19_p3) target bundleno = 7 (0x7), region = 90 }
 0x5cf   :  { %4351 = vsyncpa [#allocation3], 1 }
 0x5d0   :  { %4353 = vsyncpa [#allocation3 + $0x1], 1 }
 0x5d1   :  { %4354 = vsyncpa [#allocation6], 1 }
 0x5d2   :  { %4356 = vsyncpa [#allocation6 + $0x1], 1 }
 0x5d3   :  { %4357 = vsyncpa [#allocation4], 1 }
 0x5d4   :  { %4359 = vsyncpa [#allocation4 + $0x1], 1 }

</bundles_post_ra>
